<compile_context>
chip_gen: v6e
topology: v6e:2x2x1
jax: 0.10.0
libtpu: 0.0.40
codegen_flags: <defaults>
</compile_context>

<pallas_src>
import functools
import math

import jax
import jax.numpy as jnp
from jax.experimental import pallas as pl
from jax.experimental.pallas import tpu as pltpu


def _layer_norm(x, gamma, beta, eps=1e-5):
    # torch.nn.LayerNorm: population variance, eps inside the sqrt.
    mean = jnp.mean(x, axis=-1, keepdims=True)
    xc = x - mean
    var = jnp.mean(xc * xc, axis=-1, keepdims=True)
    inv = jax.lax.rsqrt(var + eps)
    return xc * inv * gamma + beta


def _erf_poly(x):
    # Abramowitz & Stegun 7.1.26, |error| < 1.5e-7.  The divide goes to the
    # otherwise-idle EUP via pl.reciprocal(approx=True).
    p = 0.3275911
    a1, a2, a3, a4, a5 = (0.254829592, -0.284496736, 1.421413741,
                          -1.453152027, 1.061405429)
    sign = jnp.where(x >= 0.0, 1.0, -1.0)
    ax = jnp.abs(x)
    t = pl.reciprocal(1.0 + p * ax, approx=True)
    poly = ((((a5 * t + a4) * t + a3) * t + a2) * t + a1) * t
    return sign * (1.0 - poly * jnp.exp(-ax * ax))


def _gelu_exact(x):
    # torch.nn.GELU() default = exact (erf-based) GELU.
    return 0.5 * x * (1.0 + _erf_poly(x * (1.0 / math.sqrt(2.0))))


def behavior_interaction_kernel(x_ref, wqkv_ref, bqkv_ref, wo_ref, bo_ref,
                                ln_ref, w1_ref, b1_ref, w2_ref, b2_ref,
                                out_ref, ctx_ref, *,
                                num_layers, num_heads, head_dim,
                                batch_tile, seq_len):
    """Processes a (Bt, S, D) batch tile: full transformer stack in VMEM."""
    d_model = num_heads * head_dim
    bt, s = batch_tile, seq_len
    rows = bt * s

    # Fold batch into the MXU M dimension: (Bt, S, D) -> (Bt*S, D).
    x = x_ref[...].reshape(rows, d_model)

    for l in range(num_layers):
        # ---------- multi-head self-attention ----------
        # Fused QKV projection over all folded rows (bf16 operands, f32 acc).
        qkv = jnp.dot(x.astype(jnp.bfloat16), wqkv_ref[l],
                      preferred_element_type=jnp.float32) + bqkv_ref[l]
        q = qkv[:, 0 * d_model:1 * d_model]   # 1/sqrt(hd) already folded in
        k = qkv[:, 1 * d_model:2 * d_model]
        v = qkv[:, 2 * d_model:3 * d_model]

        # Attention is per batch element; head outputs are written straight
        # into a (Bt, S, D) VMEM scratch (no lane-axis concatenate).
        for bi in range(bt):
            r0 = bi * s
            qb = q[r0:r0 + s, :].astype(jnp.bfloat16)
            kb = k[r0:r0 + s, :].astype(jnp.bfloat16)
            vb = v[r0:r0 + s, :].astype(jnp.bfloat16)
            for h in range(num_heads):
                lo = h * head_dim
                hi = lo + head_dim
                # scores = (q / sqrt(hd)) @ k^T  (NT dot, no transpose)
                sc = jax.lax.dot_general(
                    qb[:, lo:hi], kb[:, lo:hi], (((1,), (1,)), ((), ())),
                    preferred_element_type=jnp.float32)            # (S, S)
                sc = sc - jnp.max(sc, axis=-1, keepdims=True)
                e = jnp.exp(sc)
                pr = e * pl.reciprocal(
                    jnp.sum(e, axis=-1, keepdims=True), approx=True)
                ctx_ref[bi, :, lo:hi] = jnp.dot(
                    pr.astype(jnp.bfloat16), vb[:, lo:hi],
                    preferred_element_type=jnp.float32)             # (S, hd)

        ctx = ctx_ref[...].reshape(rows, d_model).astype(jnp.bfloat16)
        attn = jnp.dot(ctx, wo_ref[l],
                       preferred_element_type=jnp.float32) + bo_ref[l]

        # residual + LayerNorm1 (dropout = identity in eval mode)
        x = _layer_norm(x + attn, ln_ref[l, 0], ln_ref[l, 1])

        # ---------- feed-forward ----------
        hid = jnp.dot(x.astype(jnp.bfloat16), w1_ref[l],
                      preferred_element_type=jnp.float32) + b1_ref[l]
        hid = _gelu_exact(hid)
        ffn = jnp.dot(hid.astype(jnp.bfloat16), w2_ref[l],
                      preferred_element_type=jnp.float32) + b2_ref[l]

        # residual + LayerNorm2
        x = _layer_norm(x + ffn, ln_ref[l, 2], ln_ref[l, 3])

    # Emit only the last sequence position per batch element: a lane-dense,
    # unmasked (Bt, 1, D) store (S x less HBM writeback than the full seq).
    out_ref[...] = x.reshape(bt, s, d_model)[:, s - 1:s, :]


def _resident(arr):
    """Full-array block with a grid-invariant index map (fetched once)."""
    n = arr.ndim
    return pl.BlockSpec(arr.shape, lambda i, _n=n: (0,) * _n)


def _pick_batch_tile(batch, seq, target_rows=256):
    """Fold enough batch elements per block that Bt*S approaches the MXU
    M dimension (256 on v6e/v7x), while keeping >= 2 grid steps when the
    batch allows so both v7x TensorCores get work."""
    bt = max(1, min(batch, -(-target_rows // seq)))
    while batch % bt:
        bt -= 1
    if batch // bt < 2 and batch >= 2:
        bt = max(1, batch // 2)
        while batch % bt:
            bt -= 1
    return bt


def behavior_interaction_forward(behavior_embeddings, kparams, num_heads):
    """behavior_embeddings: f32 [B, S, D] -> user embedding f32 [B, D]."""
    b, s, d = behavior_embeddings.shape
    num_layers = kparams["wqkv"].shape[0]
    ff_dim = kparams["w1"].shape[-1]
    head_dim = d // num_heads
    bt = _pick_batch_tile(b, s)

    kernel = functools.partial(
        behavior_interaction_kernel,
        num_layers=num_layers, num_heads=num_heads, head_dim=head_dim,
        batch_tile=bt, seq_len=s)

    # Advisory cost estimate for XLA scheduling around the fused call.
    rows = b * s
    matmul_flops = 2 * rows * (d * 3 * d + d * d + 2 * d * ff_dim)
    attn_flops = 4 * b * num_heads * s * s * head_dim
    flops = num_layers * (matmul_flops + attn_flops)
    transcendentals = num_layers * (b * num_heads * s * s + rows * ff_dim
                                    + 2 * rows)
    weight_bytes = sum(int(v.size) * v.dtype.itemsize for v in kparams.values())
    bytes_accessed = behavior_embeddings.size * 4 + b * d * 4 + weight_bytes

    out = pl.pallas_call(
        kernel,
        out_shape=jax.ShapeDtypeStruct((b, 1, d), behavior_embeddings.dtype),
        grid_spec=pltpu.PrefetchScalarGridSpec(
            num_scalar_prefetch=0,
            grid=(b // bt,),
            in_specs=[
                pl.BlockSpec((bt, s, d), lambda i: (i, 0, 0)),
                _resident(kparams["wqkv"]),
                _resident(kparams["bqkv"]),
                _resident(kparams["wo"]),
                _resident(kparams["bo"]),
                _resident(kparams["ln"]),
                _resident(kparams["w1"]),
                _resident(kparams["b1"]),
                _resident(kparams["w2"]),
                _resident(kparams["b2"]),
            ],
            out_specs=pl.BlockSpec((bt, 1, d), lambda i: (i, 0, 0)),
            scratch_shapes=[pltpu.VMEM((bt, s, d), jnp.float32)],
        ),
        compiler_params=pltpu.CompilerParams(
            dimension_semantics=("parallel",),   # v7x: batch tiles over 2 TCs
        ),
        cost_estimate=pl.CostEstimate(
            flops=int(flops), transcendentals=int(transcendentals),
            bytes_accessed=int(bytes_accessed)),
    )(behavior_embeddings, kparams["wqkv"], kparams["bqkv"], kparams["wo"],
      kparams["bo"], kparams["ln"], kparams["w1"], kparams["b1"],
      kparams["w2"], kparams["b2"])

    # user embedding = last behavior position (already selected in-kernel)
    return out.reshape(b, d)


def init_params(key, num_layers, embed_dim, ff_dim):
    """PyTorch-equivalent params: nn.Linear weight/bias ~ U(-1/sqrt(fan_in),+)
    stored as (in, out) so forward is x @ W + b; LayerNorm gamma=1, beta=0."""
    d, f = embed_dim, ff_dim
    ks = jax.random.split(key, num_layers * 12)

    def uni(k, shape, fan_in):
        bound = 1.0 / math.sqrt(fan_in)
        return jax.random.uniform(k, shape, jnp.float32, -bound, bound)

    layers = []
    for l in range(num_layers):
        k = [ks[l * 12 + j] for j in range(12)]
        layers.append(dict(
            wq=uni(k[0], (d, d), d), bq=uni(k[1], (d,), d),
            wk=uni(k[2], (d, d), d), bk=uni(k[3], (d,), d),
            wv=uni(k[4], (d, d), d), bv=uni(k[5], (d,), d),
            wo=uni(k[6], (d, d), d), bo=uni(k[7], (d,), d),
            w1=uni(k[8], (d, f), d), b1=uni(k[9], (f,), d),
            w2=uni(k[10], (f, d), f), b2=uni(k[11], (d,), f),
            g1=jnp.ones((d,), jnp.float32), be1=jnp.zeros((d,), jnp.float32),
            g2=jnp.ones((d,), jnp.float32), be2=jnp.zeros((d,), jnp.float32),
        ))
    return layers


def prepare_kernel_params(layers, num_heads):
    """One-time parameter transform for the kernel:
       * fuse Q/K/V into a single (D, 3D) projection,
       * fold the 1/sqrt(head_dim) attention scale into the Q weight/bias,
       * store matmul weights in bf16 (MXU operands); biases / LN stay f32."""
    d = layers[0]["wq"].shape[0]
    scale = 1.0 / math.sqrt(d // num_heads)
    wqkv, bqkv, wo, bo, ln, w1, b1, w2, b2 = ([] for _ in range(9))
    for p in layers:
        wqkv.append(jnp.concatenate([p["wq"] * scale, p["wk"], p["wv"]], -1))
        bqkv.append(jnp.concatenate([p["bq"] * scale, p["bk"], p["bv"]])[None])
        wo.append(p["wo"]); bo.append(p["bo"][None, :])
        w1.append(p["w1"]); b1.append(p["b1"][None, :])
        w2.append(p["w2"]); b2.append(p["b2"][None, :])
        ln.append(jnp.stack([p["g1"], p["be1"], p["g2"], p["be2"]])[:, None, :])
    return {
        "wqkv": jnp.stack(wqkv).astype(jnp.bfloat16),   # (L, D, 3D)
        "bqkv": jnp.stack(bqkv),                        # (L, 1, 3D) f32
        "wo": jnp.stack(wo).astype(jnp.bfloat16),       # (L, D, D)
        "bo": jnp.stack(bo),                            # (L, 1, D) f32
        "ln": jnp.stack(ln),                            # (L, 4, 1, D) f32
        "w1": jnp.stack(w1).astype(jnp.bfloat16),       # (L, D, F)
        "b1": jnp.stack(b1),                            # (L, 1, F) f32
        "w2": jnp.stack(w2).astype(jnp.bfloat16),       # (L, F, D)
        "b2": jnp.stack(b2),                            # (L, 1, D) f32
    }


def reference_forward(x, layers, num_heads, matmul_dtype=jnp.float32):
    """Pure-JAX reference mirroring the PyTorch module (eval mode).
    matmul_dtype=bfloat16 mirrors the kernel's mixed precision (bf16 MXU
    operands, f32 accumulation, f32 elementwise)."""
    b, s, d = x.shape
    hd = d // num_heads
    prec = (jax.lax.Precision.HIGHEST if matmul_dtype == jnp.float32
            else jax.lax.Precision.DEFAULT)
    cast = lambda a: a.astype(matmul_dtype)
    f32 = jnp.float32

    for p in layers:
        q = jnp.einsum("bsd,de->bse", cast(x), cast(p["wq"]), precision=prec,
                       preferred_element_type=f32) + p["bq"]
        k = jnp.einsum("bsd,de->bse", cast(x), cast(p["wk"]), precision=prec,
                       preferred_element_type=f32) + p["bk"]
        v = jnp.einsum("bsd,de->bse", cast(x), cast(p["wv"]), precision=prec,
                       preferred_element_type=f32) + p["bv"]

        def split(t):
            return t.reshape(b, s, num_heads, hd).transpose(0, 2, 1, 3)

        qh, kh, vh = split(q), split(k), split(v)
        scores = jnp.einsum("bhqe,bhke->bhqk", cast(qh), cast(kh),
                            precision=prec,
                            preferred_element_type=f32) / math.sqrt(hd)
        attnw = jax.nn.softmax(scores, axis=-1)
        ctx = jnp.einsum("bhqk,bhke->bhqe", cast(attnw), cast(vh),
                         precision=prec, preferred_element_type=f32)
        ctx = ctx.transpose(0, 2, 1, 3).reshape(b, s, d)
        a = jnp.einsum("bsd,de->bse", cast(ctx), cast(p["wo"]),
                       precision=prec, preferred_element_type=f32) + p["bo"]
        x = _layer_norm(x + a, p["g1"], p["be1"])

        h = jnp.einsum("bsd,df->bsf", cast(x), cast(p["w1"]),
                       precision=prec, preferred_element_type=f32) + p["b1"]
        h = 0.5 * h * (1.0 + jax.scipy.special.erf(h / math.sqrt(2.0)))
        fo = jnp.einsum("bsf,fd->bsd", cast(h), cast(p["w2"]),
                        precision=prec, preferred_element_type=f32) + p["b2"]
        x = _layer_norm(x + fo, p["g2"], p["be2"])
    return x[:, -1, :]


if __name__ == "__main__":
    # Small shapes consistent with the module (lane-dense embed_dim).
    embed_dim = 128
    num_heads = 4
    ff_dim = 256
    num_layers = 2
    # batch=4 exercises batch folding (Bt=2 -> 16 folded rows per matmul)
    # while keeping a 2-step "parallel" grid for v7x's two TensorCores.
    batch, num_behaviors = 4, 8

    root = jax.random.PRNGKey(0)
    k_params, k_x = jax.random.split(root)
    layers = init_params(k_params, num_layers, embed_dim, ff_dim)
    kparams = prepare_kernel_params(layers, num_heads)
    behavior_embeddings = jax.random.normal(
        k_x, (batch, num_behaviors, embed_dim), jnp.float32)

    user_embedding = behavior_interaction_forward(
        behavior_embeddings, kparams, num_heads)
    user_embedding = jax.block_until_ready(user_embedding)
    assert user_embedding.shape == (batch, embed_dim)

    # (1) Tight check vs a reference that mirrors the kernel's numerics
    #     (bf16 MXU operands, f32 accumulation/elementwise).  Remaining
    #     differences: MXU accumulation order, erf polynomial (<1.5e-7),
    #     EUP approximate reciprocal, and the Q-scale weight folding.
    ref_bf16 = reference_forward(behavior_embeddings, layers, num_heads,
                                 matmul_dtype=jnp.bfloat16)
    assert jnp.allclose(user_embedding, ref_bf16, atol=1e-2, rtol=1e-2), \
        "mismatch vs mixed-precision reference"

    # (2) Sanity check vs the exact f32 (HIGHEST precision) reference of the
    #     PyTorch module; the looser tolerance covers bf16 operand rounding
    #     accumulated across the 2-layer stack (f32 accumulation throughout).
    ref_f32 = reference_forward(behavior_embeddings, layers, num_heads)
    assert jnp.allclose(user_embedding, ref_f32, atol=5e-2, rtol=5e-2), \
        "mismatch vs f32 reference"

    print("KERNEL_OK")
</pallas_src>

<mosaic_0001>
module attributes {stable_mosaic.version = 11 : i64} {
  func.func @behavior_interaction_kernel(%arg0: i32, %arg1: memref<2x8x128xf32, #tpu.memory_space<vmem>>, %arg2: memref<2x128x384xbf16, #tpu.memory_space<vmem>>, %arg3: memref<2x1x384xf32, #tpu.memory_space<vmem>>, %arg4: memref<2x128x128xbf16, #tpu.memory_space<vmem>>, %arg5: memref<2x1x128xf32, #tpu.memory_space<vmem>>, %arg6: memref<2x4x1x128xf32, #tpu.memory_space<vmem>>, %arg7: memref<2x128x256xbf16, #tpu.memory_space<vmem>>, %arg8: memref<2x1x256xf32, #tpu.memory_space<vmem>>, %arg9: memref<2x256x128xbf16, #tpu.memory_space<vmem>>, %arg10: memref<2x1x128xf32, #tpu.memory_space<vmem>>, %arg11: memref<2x1x128xf32, #tpu.memory_space<vmem>>, %arg12: memref<2x8x128xf32, #tpu.memory_space<vmem>>) attributes {dimension_semantics = [#tpu.dimension_semantics<parallel>], iteration_bounds = array<i64: 2>, scalar_prefetch = 0 : i64, scratch_operands = 1 : i64, tpu.core_type = #tpu.core_type<tc>, window_params = [{transform_indices = @transform_0, window_bounds = array<i64: 2, 8, 128>}, {pipeline_mode = #tpu.pipeline_mode<synchronous>, transform_indices = @transform_1, window_bounds = array<i64: 2, 128, 384>}, {pipeline_mode = #tpu.pipeline_mode<synchronous>, transform_indices = @transform_2, window_bounds = array<i64: 2, 1, 384>}, {pipeline_mode = #tpu.pipeline_mode<synchronous>, transform_indices = @transform_3, window_bounds = array<i64: 2, 128, 128>}, {pipeline_mode = #tpu.pipeline_mode<synchronous>, transform_indices = @transform_4, window_bounds = array<i64: 2, 1, 128>}, {pipeline_mode = #tpu.pipeline_mode<synchronous>, transform_indices = @transform_5, window_bounds = array<i64: 2, 4, 1, 128>}, {pipeline_mode = #tpu.pipeline_mode<synchronous>, transform_indices = @transform_6, window_bounds = array<i64: 2, 128, 256>}, {pipeline_mode = #tpu.pipeline_mode<synchronous>, transform_indices = @transform_7, window_bounds = array<i64: 2, 1, 256>}, {pipeline_mode = #tpu.pipeline_mode<synchronous>, transform_indices = @transform_8, window_bounds = array<i64: 2, 256, 128>}, {pipeline_mode = #tpu.pipeline_mode<synchronous>, transform_indices = @transform_9, window_bounds = array<i64: 2, 1, 128>}, {transform_indices = @transform_10, window_bounds = array<i64: 2, 1, 128>}]} {
    %c0 = arith.constant 0 : index
    %c0_0 = arith.constant 0 : index
    %c0_1 = arith.constant 0 : index
    %0 = vector.load %arg1[%c0, %c0_0, %c0_1] : memref<2x8x128xf32, #tpu.memory_space<vmem>>, vector<2x8x128xf32>
    %1 = vector.shape_cast %0 : vector<2x8x128xf32> to vector<16x128xf32>
    %2 = arith.truncf %1 : vector<16x128xf32> to vector<16x128xbf16>
    %c0_2 = arith.constant 0 : index
    %c0_3 = arith.constant 0 : index
    %c0_4 = arith.constant 0 : index
    %3 = vector.load %arg2[%c0_2, %c0_3, %c0_4] : memref<2x128x384xbf16, #tpu.memory_space<vmem>>, vector<1x128x384xbf16>
    %4 = vector.shape_cast %3 : vector<1x128x384xbf16> to vector<128x384xbf16>
    %cst = arith.constant dense<0.000000e+00> : vector<16x384xf32>
    %5 = tpu.matmul %2, %4, %cst {dimension_numbers = #tpu.dot_dimension_numbers<[1], [0], [0], [1], [0, 0, 1, 1], [], []>} : vector<16x128xbf16>, vector<128x384xbf16>, vector<16x384xf32> -> vector<16x384xf32>
    %c0_5 = arith.constant 0 : index
    %c0_6 = arith.constant 0 : index
    %c0_7 = arith.constant 0 : index
    %6 = vector.load %arg3[%c0_5, %c0_6, %c0_7] : memref<2x1x384xf32, #tpu.memory_space<vmem>>, vector<1x1x384xf32>
    %7 = vector.shape_cast %6 : vector<1x1x384xf32> to vector<1x384xf32>
    %8 = vector.broadcast %7 : vector<1x384xf32> to vector<16x384xf32>
    %9 = arith.addf %5, %8 : vector<16x384xf32>
    %10 = vector.extract_strided_slice %9 {offsets = [0, 0], sizes = [16, 128], strides = [1, 1]} : vector<16x384xf32> to vector<16x128xf32>
    %11 = vector.extract_strided_slice %9 {offsets = [0, 128], sizes = [16, 128], strides = [1, 1]} : vector<16x384xf32> to vector<16x128xf32>
    %12 = vector.extract_strided_slice %9 {offsets = [0, 256], sizes = [16, 128], strides = [1, 1]} : vector<16x384xf32> to vector<16x128xf32>
    %13 = vector.extract_strided_slice %10 {offsets = [0, 0], sizes = [8, 128], strides = [1, 1]} : vector<16x128xf32> to vector<8x128xf32>
    %14 = arith.truncf %13 : vector<8x128xf32> to vector<8x128xbf16>
    %15 = vector.extract_strided_slice %11 {offsets = [0, 0], sizes = [8, 128], strides = [1, 1]} : vector<16x128xf32> to vector<8x128xf32>
    %16 = arith.truncf %15 : vector<8x128xf32> to vector<8x128xbf16>
    %17 = vector.extract_strided_slice %12 {offsets = [0, 0], sizes = [8, 128], strides = [1, 1]} : vector<16x128xf32> to vector<8x128xf32>
    %18 = arith.truncf %17 : vector<8x128xf32> to vector<8x128xbf16>
    %19 = vector.extract_strided_slice %14 {offsets = [0, 0], sizes = [8, 32], strides = [1, 1]} : vector<8x128xbf16> to vector<8x32xbf16>
    %20 = vector.extract_strided_slice %16 {offsets = [0, 0], sizes = [8, 32], strides = [1, 1]} : vector<8x128xbf16> to vector<8x32xbf16>
    %cst_8 = arith.constant dense<0.000000e+00> : vector<8x8xf32>
    %21 = tpu.matmul %19, %20, %cst_8 {dimension_numbers = #tpu.dot_dimension_numbers<[1], [1], [0], [0], [0, 0, 1, 0], [], []>} : vector<8x32xbf16>, vector<8x32xbf16>, vector<8x8xf32> -> vector<8x8xf32>
    %cst_9 = arith.constant dense<0xFF800000> : vector<8xf32>
    %22 = vector.multi_reduction <maximumf>, %21, %cst_9 [1] : vector<8x8xf32> to vector<8xf32>
    %23 = vector.shape_cast %22 : vector<8xf32> to vector<8x1xf32>
    %24 = vector.broadcast %23 : vector<8x1xf32> to vector<8x8xf32>
    %25 = arith.subf %21, %24 : vector<8x8xf32>
    %26 = math.exp %25 : vector<8x8xf32>
    %cst_10 = arith.constant dense<0.000000e+00> : vector<8xf32>
    %27 = vector.multi_reduction <add>, %26, %cst_10 [1] : vector<8x8xf32> to vector<8xf32>
    %28 = vector.shape_cast %27 : vector<8xf32> to vector<8x1xf32>
    %29 = tpu.reciprocal %28 {approx = true} : vector<8x1xf32> -> vector<8x1xf32>
    %30 = vector.broadcast %29 : vector<8x1xf32> to vector<8x8xf32>
    %31 = arith.mulf %26, %30 : vector<8x8xf32>
    %32 = arith.truncf %31 : vector<8x8xf32> to vector<8x8xbf16>
    %33 = vector.extract_strided_slice %18 {offsets = [0, 0], sizes = [8, 32], strides = [1, 1]} : vector<8x128xbf16> to vector<8x32xbf16>
    %cst_11 = arith.constant dense<0.000000e+00> : vector<8x32xf32>
    %34 = tpu.matmul %32, %33, %cst_11 {dimension_numbers = #tpu.dot_dimension_numbers<[1], [0], [0], [1], [0, 0, 1, 1], [], []>} : vector<8x8xbf16>, vector<8x32xbf16>, vector<8x32xf32> -> vector<8x32xf32>
    %c0_12 = arith.constant 0 : index
    %c0_13 = arith.constant 0 : index
    %c0_14 = arith.constant 0 : index
    %35 = vector.load %arg12[%c0_12, %c0_13, %c0_14] : memref<2x8x128xf32, #tpu.memory_space<vmem>>, vector<1x8x32xf32>
    %36 = vector.shape_cast %35 : vector<1x8x32xf32> to vector<8x32xf32>
    %37 = vector.shape_cast %34 : vector<8x32xf32> to vector<1x8x32xf32>
    tpu.vector_store %arg12[%c0_12, %c0_13, %c0_14], %37 {strides = array<i32>} : memref<2x8x128xf32, #tpu.memory_space<vmem>>, vector<1x8x32xf32>,
    %38 = vector.extract_strided_slice %14 {offsets = [0, 32], sizes = [8, 32], strides = [1, 1]} : vector<8x128xbf16> to vector<8x32xbf16>
    %39 = vector.extract_strided_slice %16 {offsets = [0, 32], sizes = [8, 32], strides = [1, 1]} : vector<8x128xbf16> to vector<8x32xbf16>
    %cst_15 = arith.constant dense<0.000000e+00> : vector<8x8xf32>
    %40 = tpu.matmul %38, %39, %cst_15 {dimension_numbers = #tpu.dot_dimension_numbers<[1], [1], [0], [0], [0, 0, 1, 0], [], []>} : vector<8x32xbf16>, vector<8x32xbf16>, vector<8x8xf32> -> vector<8x8xf32>
    %cst_16 = arith.constant dense<0xFF800000> : vector<8xf32>
    %41 = vector.multi_reduction <maximumf>, %40, %cst_16 [1] : vector<8x8xf32> to vector<8xf32>
    %42 = vector.shape_cast %41 : vector<8xf32> to vector<8x1xf32>
    %43 = vector.broadcast %42 : vector<8x1xf32> to vector<8x8xf32>
    %44 = arith.subf %40, %43 : vector<8x8xf32>
    %45 = math.exp %44 : vector<8x8xf32>
    %cst_17 = arith.constant dense<0.000000e+00> : vector<8xf32>
    %46 = vector.multi_reduction <add>, %45, %cst_17 [1] : vector<8x8xf32> to vector<8xf32>
    %47 = vector.shape_cast %46 : vector<8xf32> to vector<8x1xf32>
    %48 = tpu.reciprocal %47 {approx = true} : vector<8x1xf32> -> vector<8x1xf32>
    %49 = vector.broadcast %48 : vector<8x1xf32> to vector<8x8xf32>
    %50 = arith.mulf %45, %49 : vector<8x8xf32>
    %51 = arith.truncf %50 : vector<8x8xf32> to vector<8x8xbf16>
    %52 = vector.extract_strided_slice %18 {offsets = [0, 32], sizes = [8, 32], strides = [1, 1]} : vector<8x128xbf16> to vector<8x32xbf16>
    %cst_18 = arith.constant dense<0.000000e+00> : vector<8x32xf32>
    %53 = tpu.matmul %51, %52, %cst_18 {dimension_numbers = #tpu.dot_dimension_numbers<[1], [0], [0], [1], [0, 0, 1, 1], [], []>} : vector<8x8xbf16>, vector<8x32xbf16>, vector<8x32xf32> -> vector<8x32xf32>
    %c0_19 = arith.constant 0 : index
    %c0_20 = arith.constant 0 : index
    %c32 = arith.constant 32 : index
    %54 = vector.load %arg12[%c0_19, %c0_20, %c32] : memref<2x8x128xf32, #tpu.memory_space<vmem>>, vector<1x8x32xf32>
    %55 = vector.shape_cast %54 : vector<1x8x32xf32> to vector<8x32xf32>
    %56 = vector.shape_cast %53 : vector<8x32xf32> to vector<1x8x32xf32>
    tpu.vector_store %arg12[%c0_19, %c0_20, %c32], %56 {strides = array<i32>} : memref<2x8x128xf32, #tpu.memory_space<vmem>>, vector<1x8x32xf32>,
    %57 = vector.extract_strided_slice %14 {offsets = [0, 64], sizes = [8, 32], strides = [1, 1]} : vector<8x128xbf16> to vector<8x32xbf16>
    %58 = vector.extract_strided_slice %16 {offsets = [0, 64], sizes = [8, 32], strides = [1, 1]} : vector<8x128xbf16> to vector<8x32xbf16>
    %cst_21 = arith.constant dense<0.000000e+00> : vector<8x8xf32>
    %59 = tpu.matmul %57, %58, %cst_21 {dimension_numbers = #tpu.dot_dimension_numbers<[1], [1], [0], [0], [0, 0, 1, 0], [], []>} : vector<8x32xbf16>, vector<8x32xbf16>, vector<8x8xf32> -> vector<8x8xf32>
    %cst_22 = arith.constant dense<0xFF800000> : vector<8xf32>
    %60 = vector.multi_reduction <maximumf>, %59, %cst_22 [1] : vector<8x8xf32> to vector<8xf32>
    %61 = vector.shape_cast %60 : vector<8xf32> to vector<8x1xf32>
    %62 = vector.broadcast %61 : vector<8x1xf32> to vector<8x8xf32>
    %63 = arith.subf %59, %62 : vector<8x8xf32>
    %64 = math.exp %63 : vector<8x8xf32>
    %cst_23 = arith.constant dense<0.000000e+00> : vector<8xf32>
    %65 = vector.multi_reduction <add>, %64, %cst_23 [1] : vector<8x8xf32> to vector<8xf32>
    %66 = vector.shape_cast %65 : vector<8xf32> to vector<8x1xf32>
    %67 = tpu.reciprocal %66 {approx = true} : vector<8x1xf32> -> vector<8x1xf32>
    %68 = vector.broadcast %67 : vector<8x1xf32> to vector<8x8xf32>
    %69 = arith.mulf %64, %68 : vector<8x8xf32>
    %70 = arith.truncf %69 : vector<8x8xf32> to vector<8x8xbf16>
    %71 = vector.extract_strided_slice %18 {offsets = [0, 64], sizes = [8, 32], strides = [1, 1]} : vector<8x128xbf16> to vector<8x32xbf16>
    %cst_24 = arith.constant dense<0.000000e+00> : vector<8x32xf32>
    %72 = tpu.matmul %70, %71, %cst_24 {dimension_numbers = #tpu.dot_dimension_numbers<[1], [0], [0], [1], [0, 0, 1, 1], [], []>} : vector<8x8xbf16>, vector<8x32xbf16>, vector<8x32xf32> -> vector<8x32xf32>
    %c0_25 = arith.constant 0 : index
    %c0_26 = arith.constant 0 : index
    %c64 = arith.constant 64 : index
    %73 = vector.load %arg12[%c0_25, %c0_26, %c64] : memref<2x8x128xf32, #tpu.memory_space<vmem>>, vector<1x8x32xf32>
    %74 = vector.shape_cast %73 : vector<1x8x32xf32> to vector<8x32xf32>
    %75 = vector.shape_cast %72 : vector<8x32xf32> to vector<1x8x32xf32>
    tpu.vector_store %arg12[%c0_25, %c0_26, %c64], %75 {strides = array<i32>} : memref<2x8x128xf32, #tpu.memory_space<vmem>>, vector<1x8x32xf32>,
    %76 = vector.extract_strided_slice %14 {offsets = [0, 96], sizes = [8, 32], strides = [1, 1]} : vector<8x128xbf16> to vector<8x32xbf16>
    %77 = vector.extract_strided_slice %16 {offsets = [0, 96], sizes = [8, 32], strides = [1, 1]} : vector<8x128xbf16> to vector<8x32xbf16>
    %cst_27 = arith.constant dense<0.000000e+00> : vector<8x8xf32>
    %78 = tpu.matmul %76, %77, %cst_27 {dimension_numbers = #tpu.dot_dimension_numbers<[1], [1], [0], [0], [0, 0, 1, 0], [], []>} : vector<8x32xbf16>, vector<8x32xbf16>, vector<8x8xf32> -> vector<8x8xf32>
    %cst_28 = arith.constant dense<0xFF800000> : vector<8xf32>
    %79 = vector.multi_reduction <maximumf>, %78, %cst_28 [1] : vector<8x8xf32> to vector<8xf32>
    %80 = vector.shape_cast %79 : vector<8xf32> to vector<8x1xf32>
    %81 = vector.broadcast %80 : vector<8x1xf32> to vector<8x8xf32>
    %82 = arith.subf %78, %81 : vector<8x8xf32>
    %83 = math.exp %82 : vector<8x8xf32>
    %cst_29 = arith.constant dense<0.000000e+00> : vector<8xf32>
    %84 = vector.multi_reduction <add>, %83, %cst_29 [1] : vector<8x8xf32> to vector<8xf32>
    %85 = vector.shape_cast %84 : vector<8xf32> to vector<8x1xf32>
    %86 = tpu.reciprocal %85 {approx = true} : vector<8x1xf32> -> vector<8x1xf32>
    %87 = vector.broadcast %86 : vector<8x1xf32> to vector<8x8xf32>
    %88 = arith.mulf %83, %87 : vector<8x8xf32>
    %89 = arith.truncf %88 : vector<8x8xf32> to vector<8x8xbf16>
    %90 = vector.extract_strided_slice %18 {offsets = [0, 96], sizes = [8, 32], strides = [1, 1]} : vector<8x128xbf16> to vector<8x32xbf16>
    %cst_30 = arith.constant dense<0.000000e+00> : vector<8x32xf32>
    %91 = tpu.matmul %89, %90, %cst_30 {dimension_numbers = #tpu.dot_dimension_numbers<[1], [0], [0], [1], [0, 0, 1, 1], [], []>} : vector<8x8xbf16>, vector<8x32xbf16>, vector<8x32xf32> -> vector<8x32xf32>
    %c0_31 = arith.constant 0 : index
    %c0_32 = arith.constant 0 : index
    %c96 = arith.constant 96 : index
    %92 = vector.load %arg12[%c0_31, %c0_32, %c96] : memref<2x8x128xf32, #tpu.memory_space<vmem>>, vector<1x8x32xf32>
    %93 = vector.shape_cast %92 : vector<1x8x32xf32> to vector<8x32xf32>
    %94 = vector.shape_cast %91 : vector<8x32xf32> to vector<1x8x32xf32>
    tpu.vector_store %arg12[%c0_31, %c0_32, %c96], %94 {strides = array<i32>} : memref<2x8x128xf32, #tpu.memory_space<vmem>>, vector<1x8x32xf32>,
    %95 = vector.extract_strided_slice %10 {offsets = [8, 0], sizes = [8, 128], strides = [1, 1]} : vector<16x128xf32> to vector<8x128xf32>
    %96 = arith.truncf %95 : vector<8x128xf32> to vector<8x128xbf16>
    %97 = vector.extract_strided_slice %11 {offsets = [8, 0], sizes = [8, 128], strides = [1, 1]} : vector<16x128xf32> to vector<8x128xf32>
    %98 = arith.truncf %97 : vector<8x128xf32> to vector<8x128xbf16>
    %99 = vector.extract_strided_slice %12 {offsets = [8, 0], sizes = [8, 128], strides = [1, 1]} : vector<16x128xf32> to vector<8x128xf32>
    %100 = arith.truncf %99 : vector<8x128xf32> to vector<8x128xbf16>
    %101 = vector.extract_strided_slice %96 {offsets = [0, 0], sizes = [8, 32], strides = [1, 1]} : vector<8x128xbf16> to vector<8x32xbf16>
    %102 = vector.extract_strided_slice %98 {offsets = [0, 0], sizes = [8, 32], strides = [1, 1]} : vector<8x128xbf16> to vector<8x32xbf16>
    %cst_33 = arith.constant dense<0.000000e+00> : vector<8x8xf32>
    %103 = tpu.matmul %101, %102, %cst_33 {dimension_numbers = #tpu.dot_dimension_numbers<[1], [1], [0], [0], [0, 0, 1, 0], [], []>} : vector<8x32xbf16>, vector<8x32xbf16>, vector<8x8xf32> -> vector<8x8xf32>
    %cst_34 = arith.constant dense<0xFF800000> : vector<8xf32>
    %104 = vector.multi_reduction <maximumf>, %103, %cst_34 [1] : vector<8x8xf32> to vector<8xf32>
    %105 = vector.shape_cast %104 : vector<8xf32> to vector<8x1xf32>
    %106 = vector.broadcast %105 : vector<8x1xf32> to vector<8x8xf32>
    %107 = arith.subf %103, %106 : vector<8x8xf32>
    %108 = math.exp %107 : vector<8x8xf32>
    %cst_35 = arith.constant dense<0.000000e+00> : vector<8xf32>
    %109 = vector.multi_reduction <add>, %108, %cst_35 [1] : vector<8x8xf32> to vector<8xf32>
    %110 = vector.shape_cast %109 : vector<8xf32> to vector<8x1xf32>
    %111 = tpu.reciprocal %110 {approx = true} : vector<8x1xf32> -> vector<8x1xf32>
    %112 = vector.broadcast %111 : vector<8x1xf32> to vector<8x8xf32>
    %113 = arith.mulf %108, %112 : vector<8x8xf32>
    %114 = arith.truncf %113 : vector<8x8xf32> to vector<8x8xbf16>
    %115 = vector.extract_strided_slice %100 {offsets = [0, 0], sizes = [8, 32], strides = [1, 1]} : vector<8x128xbf16> to vector<8x32xbf16>
    %cst_36 = arith.constant dense<0.000000e+00> : vector<8x32xf32>
    %116 = tpu.matmul %114, %115, %cst_36 {dimension_numbers = #tpu.dot_dimension_numbers<[1], [0], [0], [1], [0, 0, 1, 1], [], []>} : vector<8x8xbf16>, vector<8x32xbf16>, vector<8x32xf32> -> vector<8x32xf32>
    %c1 = arith.constant 1 : index
    %c0_37 = arith.constant 0 : index
    %c0_38 = arith.constant 0 : index
    %117 = vector.load %arg12[%c1, %c0_37, %c0_38] : memref<2x8x128xf32, #tpu.memory_space<vmem>>, vector<1x8x32xf32>
    %118 = vector.shape_cast %117 : vector<1x8x32xf32> to vector<8x32xf32>
    %119 = vector.shape_cast %116 : vector<8x32xf32> to vector<1x8x32xf32>
    tpu.vector_store %arg12[%c1, %c0_37, %c0_38], %119 {strides = array<i32>} : memref<2x8x128xf32, #tpu.memory_space<vmem>>, vector<1x8x32xf32>,
    %120 = vector.extract_strided_slice %96 {offsets = [0, 32], sizes = [8, 32], strides = [1, 1]} : vector<8x128xbf16> to vector<8x32xbf16>
    %121 = vector.extract_strided_slice %98 {offsets = [0, 32], sizes = [8, 32], strides = [1, 1]} : vector<8x128xbf16> to vector<8x32xbf16>
    %cst_39 = arith.constant dense<0.000000e+00> : vector<8x8xf32>
    %122 = tpu.matmul %120, %121, %cst_39 {dimension_numbers = #tpu.dot_dimension_numbers<[1], [1], [0], [0], [0, 0, 1, 0], [], []>} : vector<8x32xbf16>, vector<8x32xbf16>, vector<8x8xf32> -> vector<8x8xf32>
    %cst_40 = arith.constant dense<0xFF800000> : vector<8xf32>
    %123 = vector.multi_reduction <maximumf>, %122, %cst_40 [1] : vector<8x8xf32> to vector<8xf32>
    %124 = vector.shape_cast %123 : vector<8xf32> to vector<8x1xf32>
    %125 = vector.broadcast %124 : vector<8x1xf32> to vector<8x8xf32>
    %126 = arith.subf %122, %125 : vector<8x8xf32>
    %127 = math.exp %126 : vector<8x8xf32>
    %cst_41 = arith.constant dense<0.000000e+00> : vector<8xf32>
    %128 = vector.multi_reduction <add>, %127, %cst_41 [1] : vector<8x8xf32> to vector<8xf32>
    %129 = vector.shape_cast %128 : vector<8xf32> to vector<8x1xf32>
    %130 = tpu.reciprocal %129 {approx = true} : vector<8x1xf32> -> vector<8x1xf32>
    %131 = vector.broadcast %130 : vector<8x1xf32> to vector<8x8xf32>
    %132 = arith.mulf %127, %131 : vector<8x8xf32>
    %133 = arith.truncf %132 : vector<8x8xf32> to vector<8x8xbf16>
    %134 = vector.extract_strided_slice %100 {offsets = [0, 32], sizes = [8, 32], strides = [1, 1]} : vector<8x128xbf16> to vector<8x32xbf16>
    %cst_42 = arith.constant dense<0.000000e+00> : vector<8x32xf32>
    %135 = tpu.matmul %133, %134, %cst_42 {dimension_numbers = #tpu.dot_dimension_numbers<[1], [0], [0], [1], [0, 0, 1, 1], [], []>} : vector<8x8xbf16>, vector<8x32xbf16>, vector<8x32xf32> -> vector<8x32xf32>
    %c1_43 = arith.constant 1 : index
    %c0_44 = arith.constant 0 : index
    %c32_45 = arith.constant 32 : index
    %136 = vector.load %arg12[%c1_43, %c0_44, %c32_45] : memref<2x8x128xf32, #tpu.memory_space<vmem>>, vector<1x8x32xf32>
    %137 = vector.shape_cast %136 : vector<1x8x32xf32> to vector<8x32xf32>
    %138 = vector.shape_cast %135 : vector<8x32xf32> to vector<1x8x32xf32>
    tpu.vector_store %arg12[%c1_43, %c0_44, %c32_45], %138 {strides = array<i32>} : memref<2x8x128xf32, #tpu.memory_space<vmem>>, vector<1x8x32xf32>,
    %139 = vector.extract_strided_slice %96 {offsets = [0, 64], sizes = [8, 32], strides = [1, 1]} : vector<8x128xbf16> to vector<8x32xbf16>
    %140 = vector.extract_strided_slice %98 {offsets = [0, 64], sizes = [8, 32], strides = [1, 1]} : vector<8x128xbf16> to vector<8x32xbf16>
    %cst_46 = arith.constant dense<0.000000e+00> : vector<8x8xf32>
    %141 = tpu.matmul %139, %140, %cst_46 {dimension_numbers = #tpu.dot_dimension_numbers<[1], [1], [0], [0], [0, 0, 1, 0], [], []>} : vector<8x32xbf16>, vector<8x32xbf16>, vector<8x8xf32> -> vector<8x8xf32>
    %cst_47 = arith.constant dense<0xFF800000> : vector<8xf32>
    %142 = vector.multi_reduction <maximumf>, %141, %cst_47 [1] : vector<8x8xf32> to vector<8xf32>
    %143 = vector.shape_cast %142 : vector<8xf32> to vector<8x1xf32>
    %144 = vector.broadcast %143 : vector<8x1xf32> to vector<8x8xf32>
    %145 = arith.subf %141, %144 : vector<8x8xf32>
    %146 = math.exp %145 : vector<8x8xf32>
    %cst_48 = arith.constant dense<0.000000e+00> : vector<8xf32>
    %147 = vector.multi_reduction <add>, %146, %cst_48 [1] : vector<8x8xf32> to vector<8xf32>
    %148 = vector.shape_cast %147 : vector<8xf32> to vector<8x1xf32>
    %149 = tpu.reciprocal %148 {approx = true} : vector<8x1xf32> -> vector<8x1xf32>
    %150 = vector.broadcast %149 : vector<8x1xf32> to vector<8x8xf32>
    %151 = arith.mulf %146, %150 : vector<8x8xf32>
    %152 = arith.truncf %151 : vector<8x8xf32> to vector<8x8xbf16>
    %153 = vector.extract_strided_slice %100 {offsets = [0, 64], sizes = [8, 32], strides = [1, 1]} : vector<8x128xbf16> to vector<8x32xbf16>
    %cst_49 = arith.constant dense<0.000000e+00> : vector<8x32xf32>
    %154 = tpu.matmul %152, %153, %cst_49 {dimension_numbers = #tpu.dot_dimension_numbers<[1], [0], [0], [1], [0, 0, 1, 1], [], []>} : vector<8x8xbf16>, vector<8x32xbf16>, vector<8x32xf32> -> vector<8x32xf32>
    %c1_50 = arith.constant 1 : index
    %c0_51 = arith.constant 0 : index
    %c64_52 = arith.constant 64 : index
    %155 = vector.load %arg12[%c1_50, %c0_51, %c64_52] : memref<2x8x128xf32, #tpu.memory_space<vmem>>, vector<1x8x32xf32>
    %156 = vector.shape_cast %155 : vector<1x8x32xf32> to vector<8x32xf32>
    %157 = vector.shape_cast %154 : vector<8x32xf32> to vector<1x8x32xf32>
    tpu.vector_store %arg12[%c1_50, %c0_51, %c64_52], %157 {strides = array<i32>} : memref<2x8x128xf32, #tpu.memory_space<vmem>>, vector<1x8x32xf32>,
    %158 = vector.extract_strided_slice %96 {offsets = [0, 96], sizes = [8, 32], strides = [1, 1]} : vector<8x128xbf16> to vector<8x32xbf16>
    %159 = vector.extract_strided_slice %98 {offsets = [0, 96], sizes = [8, 32], strides = [1, 1]} : vector<8x128xbf16> to vector<8x32xbf16>
    %cst_53 = arith.constant dense<0.000000e+00> : vector<8x8xf32>
    %160 = tpu.matmul %158, %159, %cst_53 {dimension_numbers = #tpu.dot_dimension_numbers<[1], [1], [0], [0], [0, 0, 1, 0], [], []>} : vector<8x32xbf16>, vector<8x32xbf16>, vector<8x8xf32> -> vector<8x8xf32>
    %cst_54 = arith.constant dense<0xFF800000> : vector<8xf32>
    %161 = vector.multi_reduction <maximumf>, %160, %cst_54 [1] : vector<8x8xf32> to vector<8xf32>
    %162 = vector.shape_cast %161 : vector<8xf32> to vector<8x1xf32>
    %163 = vector.broadcast %162 : vector<8x1xf32> to vector<8x8xf32>
    %164 = arith.subf %160, %163 : vector<8x8xf32>
    %165 = math.exp %164 : vector<8x8xf32>
    %cst_55 = arith.constant dense<0.000000e+00> : vector<8xf32>
    %166 = vector.multi_reduction <add>, %165, %cst_55 [1] : vector<8x8xf32> to vector<8xf32>
    %167 = vector.shape_cast %166 : vector<8xf32> to vector<8x1xf32>
    %168 = tpu.reciprocal %167 {approx = true} : vector<8x1xf32> -> vector<8x1xf32>
    %169 = vector.broadcast %168 : vector<8x1xf32> to vector<8x8xf32>
    %170 = arith.mulf %165, %169 : vector<8x8xf32>
    %171 = arith.truncf %170 : vector<8x8xf32> to vector<8x8xbf16>
    %172 = vector.extract_strided_slice %100 {offsets = [0, 96], sizes = [8, 32], strides = [1, 1]} : vector<8x128xbf16> to vector<8x32xbf16>
    %cst_56 = arith.constant dense<0.000000e+00> : vector<8x32xf32>
    %173 = tpu.matmul %171, %172, %cst_56 {dimension_numbers = #tpu.dot_dimension_numbers<[1], [0], [0], [1], [0, 0, 1, 1], [], []>} : vector<8x8xbf16>, vector<8x32xbf16>, vector<8x32xf32> -> vector<8x32xf32>
    %c1_57 = arith.constant 1 : index
    %c0_58 = arith.constant 0 : index
    %c96_59 = arith.constant 96 : index
    %174 = vector.load %arg12[%c1_57, %c0_58, %c96_59] : memref<2x8x128xf32, #tpu.memory_space<vmem>>, vector<1x8x32xf32>
    %175 = vector.shape_cast %174 : vector<1x8x32xf32> to vector<8x32xf32>
    %176 = vector.shape_cast %173 : vector<8x32xf32> to vector<1x8x32xf32>
    tpu.vector_store %arg12[%c1_57, %c0_58, %c96_59], %176 {strides = array<i32>} : memref<2x8x128xf32, #tpu.memory_space<vmem>>, vector<1x8x32xf32>,
    %c0_60 = arith.constant 0 : index
    %c0_61 = arith.constant 0 : index
    %c0_62 = arith.constant 0 : index
    %177 = vector.load %arg12[%c0_60, %c0_61, %c0_62] : memref<2x8x128xf32, #tpu.memory_space<vmem>>, vector<2x8x128xf32>
    %178 = vector.shape_cast %177 : vector<2x8x128xf32> to vector<16x128xf32>
    %179 = arith.truncf %178 : vector<16x128xf32> to vector<16x128xbf16>
    %c0_63 = arith.constant 0 : index
    %c0_64 = arith.constant 0 : index
    %c0_65 = arith.constant 0 : index
    %180 = vector.load %arg4[%c0_63, %c0_64, %c0_65] : memref<2x128x128xbf16, #tpu.memory_space<vmem>>, vector<1x128x128xbf16>
    %181 = vector.shape_cast %180 : vector<1x128x128xbf16> to vector<128x128xbf16>
    %cst_66 = arith.constant dense<0.000000e+00> : vector<16x128xf32>
    %182 = tpu.matmul %179, %181, %cst_66 {dimension_numbers = #tpu.dot_dimension_numbers<[1], [0], [0], [1], [0, 0, 1, 1], [], []>} : vector<16x128xbf16>, vector<128x128xbf16>, vector<16x128xf32> -> vector<16x128xf32>
    %c0_67 = arith.constant 0 : index
    %c0_68 = arith.constant 0 : index
    %c0_69 = arith.constant 0 : index
    %183 = vector.load %arg5[%c0_67, %c0_68, %c0_69] : memref<2x1x128xf32, #tpu.memory_space<vmem>>, vector<1x1x128xf32>
    %184 = vector.shape_cast %183 : vector<1x1x128xf32> to vector<1x128xf32>
    %185 = vector.broadcast %184 : vector<1x128xf32> to vector<16x128xf32>
    %186 = arith.addf %182, %185 : vector<16x128xf32>
    %187 = arith.addf %1, %186 : vector<16x128xf32>
    %c0_70 = arith.constant 0 : index
    %c0_71 = arith.constant 0 : index
    %c0_72 = arith.constant 0 : index
    %c0_73 = arith.constant 0 : index
    %188 = vector.load %arg6[%c0_70, %c0_71, %c0_72, %c0_73] : memref<2x4x1x128xf32, #tpu.memory_space<vmem>>, vector<1x1x1x128xf32>
    %189 = vector.shape_cast %188 : vector<1x1x1x128xf32> to vector<1x128xf32>
    %c0_74 = arith.constant 0 : index
    %c1_75 = arith.constant 1 : index
    %c0_76 = arith.constant 0 : index
    %c0_77 = arith.constant 0 : index
    %190 = vector.load %arg6[%c0_74, %c1_75, %c0_76, %c0_77] : memref<2x4x1x128xf32, #tpu.memory_space<vmem>>, vector<1x1x1x128xf32>
    %191 = vector.shape_cast %190 : vector<1x1x1x128xf32> to vector<1x128xf32>
    %cst_78 = arith.constant dense<0.000000e+00> : vector<16xf32>
    %192 = vector.multi_reduction <add>, %187, %cst_78 [1] : vector<16x128xf32> to vector<16xf32>
    %193 = vector.shape_cast %192 : vector<16xf32> to vector<16x1xf32>
    %cst_79 = arith.constant 1.280000e+02 : f32
    %194 = vector.broadcast %cst_79 : f32 to vector<16x1xf32>
    %195 = arith.divf %193, %194 : vector<16x1xf32>
    %196 = vector.broadcast %195 : vector<16x1xf32> to vector<16x128xf32>
    %197 = arith.subf %187, %196 : vector<16x128xf32>
    %198 = arith.mulf %197, %197 : vector<16x128xf32>
    %cst_80 = arith.constant dense<0.000000e+00> : vector<16xf32>
    %199 = vector.multi_reduction <add>, %198, %cst_80 [1] : vector<16x128xf32> to vector<16xf32>
    %200 = vector.shape_cast %199 : vector<16xf32> to vector<16x1xf32>
    %cst_81 = arith.constant 1.280000e+02 : f32
    %201 = vector.broadcast %cst_81 : f32 to vector<16x1xf32>
    %202 = arith.divf %200, %201 : vector<16x1xf32>
    %cst_82 = arith.constant 9.99999974E-6 : f32
    %203 = vector.broadcast %cst_82 : f32 to vector<16x1xf32>
    %204 = arith.addf %202, %203 : vector<16x1xf32>
    %205 = math.rsqrt %204 : vector<16x1xf32>
    %206 = vector.broadcast %205 : vector<16x1xf32> to vector<16x128xf32>
    %207 = arith.mulf %197, %206 : vector<16x128xf32>
    %208 = vector.broadcast %189 : vector<1x128xf32> to vector<16x128xf32>
    %209 = arith.mulf %207, %208 : vector<16x128xf32>
    %210 = vector.broadcast %191 : vector<1x128xf32> to vector<16x128xf32>
    %211 = arith.addf %209, %210 : vector<16x128xf32>
    %212 = arith.truncf %211 : vector<16x128xf32> to vector<16x128xbf16>
    %c0_83 = arith.constant 0 : index
    %c0_84 = arith.constant 0 : index
    %c0_85 = arith.constant 0 : index
    %213 = vector.load %arg7[%c0_83, %c0_84, %c0_85] : memref<2x128x256xbf16, #tpu.memory_space<vmem>>, vector<1x128x256xbf16>
    %214 = vector.shape_cast %213 : vector<1x128x256xbf16> to vector<128x256xbf16>
    %cst_86 = arith.constant dense<0.000000e+00> : vector<16x256xf32>
    %215 = tpu.matmul %212, %214, %cst_86 {dimension_numbers = #tpu.dot_dimension_numbers<[1], [0], [0], [1], [0, 0, 1, 1], [], []>} : vector<16x128xbf16>, vector<128x256xbf16>, vector<16x256xf32> -> vector<16x256xf32>
    %c0_87 = arith.constant 0 : index
    %c0_88 = arith.constant 0 : index
    %c0_89 = arith.constant 0 : index
    %216 = vector.load %arg8[%c0_87, %c0_88, %c0_89] : memref<2x1x256xf32, #tpu.memory_space<vmem>>, vector<1x1x256xf32>
    %217 = vector.shape_cast %216 : vector<1x1x256xf32> to vector<1x256xf32>
    %218 = vector.broadcast %217 : vector<1x256xf32> to vector<16x256xf32>
    %219 = arith.addf %215, %218 : vector<16x256xf32>
    %cst_90 = arith.constant 5.000000e-01 : f32
    %220 = vector.broadcast %cst_90 : f32 to vector<16x256xf32>
    %221 = arith.mulf %220, %219 : vector<16x256xf32>
    %cst_91 = arith.constant 0.707106769 : f32
    %222 = vector.broadcast %cst_91 : f32 to vector<16x256xf32>
    %223 = arith.mulf %219, %222 : vector<16x256xf32>
    %cst_92 = arith.constant 0.000000e+00 : f32
    %224 = vector.broadcast %cst_92 : f32 to vector<16x256xf32>
    %225 = arith.cmpf oge, %223, %224 : vector<16x256xf32>
    %cst_93 = arith.constant 1.000000e+00 : f32
    %cst_94 = arith.constant -1.000000e+00 : f32
    %226 = vector.broadcast %cst_93 : f32 to vector<16x256xf32>
    %227 = vector.broadcast %cst_94 : f32 to vector<16x256xf32>
    %228 = arith.select %225, %226, %227 : vector<16x256xi1>, vector<16x256xf32>
    %229 = math.absf %223 : vector<16x256xf32>
    %cst_95 = arith.constant 0.327591091 : f32
    %230 = vector.broadcast %cst_95 : f32 to vector<16x256xf32>
    %231 = arith.mulf %230, %229 : vector<16x256xf32>
    %cst_96 = arith.constant 1.000000e+00 : f32
    %232 = vector.broadcast %cst_96 : f32 to vector<16x256xf32>
    %233 = arith.addf %232, %231 : vector<16x256xf32>
    %234 = tpu.reciprocal %233 {approx = true} : vector<16x256xf32> -> vector<16x256xf32>
    %cst_97 = arith.constant 1.06140542 : f32
    %235 = vector.broadcast %cst_97 : f32 to vector<16x256xf32>
    %236 = arith.mulf %235, %234 : vector<16x256xf32>
    %cst_98 = arith.constant -1.45315206 : f32
    %237 = vector.broadcast %cst_98 : f32 to vector<16x256xf32>
    %238 = arith.addf %236, %237 : vector<16x256xf32>
    %239 = arith.mulf %238, %234 : vector<16x256xf32>
    %cst_99 = arith.constant 1.42141378 : f32
    %240 = vector.broadcast %cst_99 : f32 to vector<16x256xf32>
    %241 = arith.addf %239, %240 : vector<16x256xf32>
    %242 = arith.mulf %241, %234 : vector<16x256xf32>
    %cst_100 = arith.constant -0.284496725 : f32
    %243 = vector.broadcast %cst_100 : f32 to vector<16x256xf32>
    %244 = arith.addf %242, %243 : vector<16x256xf32>
    %245 = arith.mulf %244, %234 : vector<16x256xf32>
    %cst_101 = arith.constant 0.254829586 : f32
    %246 = vector.broadcast %cst_101 : f32 to vector<16x256xf32>
    %247 = arith.addf %245, %246 : vector<16x256xf32>
    %248 = arith.mulf %247, %234 : vector<16x256xf32>
    %cst_102 = arith.constant 0.000000e+00 : f32
    %249 = vector.broadcast %cst_102 : f32 to vector<16x256xf32>
    %250 = arith.subf %249, %229 : vector<16x256xf32>
    %251 = arith.mulf %250, %229 : vector<16x256xf32>
    %252 = math.exp %251 : vector<16x256xf32>
    %253 = arith.mulf %248, %252 : vector<16x256xf32>
    %cst_103 = arith.constant 1.000000e+00 : f32
    %254 = vector.broadcast %cst_103 : f32 to vector<16x256xf32>
    %255 = arith.subf %254, %253 : vector<16x256xf32>
    %256 = arith.mulf %228, %255 : vector<16x256xf32>
    %cst_104 = arith.constant 1.000000e+00 : f32
    %257 = vector.broadcast %cst_104 : f32 to vector<16x256xf32>
    %258 = arith.addf %257, %256 : vector<16x256xf32>
    %259 = arith.mulf %221, %258 : vector<16x256xf32>
    %260 = arith.truncf %259 : vector<16x256xf32> to vector<16x256xbf16>
    %c0_105 = arith.constant 0 : index
    %c0_106 = arith.constant 0 : index
    %c0_107 = arith.constant 0 : index
    %261 = vector.load %arg9[%c0_105, %c0_106, %c0_107] : memref<2x256x128xbf16, #tpu.memory_space<vmem>>, vector<1x256x128xbf16>
    %262 = vector.shape_cast %261 : vector<1x256x128xbf16> to vector<256x128xbf16>
    %cst_108 = arith.constant dense<0.000000e+00> : vector<16x128xf32>
    %263 = tpu.matmul %260, %262, %cst_108 {dimension_numbers = #tpu.dot_dimension_numbers<[1], [0], [0], [1], [0, 0, 1, 1], [], []>} : vector<16x256xbf16>, vector<256x128xbf16>, vector<16x128xf32> -> vector<16x128xf32>
    %c0_109 = arith.constant 0 : index
    %c0_110 = arith.constant 0 : index
    %c0_111 = arith.constant 0 : index
    %264 = vector.load %arg10[%c0_109, %c0_110, %c0_111] : memref<2x1x128xf32, #tpu.memory_space<vmem>>, vector<1x1x128xf32>
    %265 = vector.shape_cast %264 : vector<1x1x128xf32> to vector<1x128xf32>
    %266 = vector.broadcast %265 : vector<1x128xf32> to vector<16x128xf32>
    %267 = arith.addf %263, %266 : vector<16x128xf32>
    %268 = arith.addf %211, %267 : vector<16x128xf32>
    %c0_112 = arith.constant 0 : index
    %c2 = arith.constant 2 : index
    %c0_113 = arith.constant 0 : index
    %c0_114 = arith.constant 0 : index
    %269 = vector.load %arg6[%c0_112, %c2, %c0_113, %c0_114] : memref<2x4x1x128xf32, #tpu.memory_space<vmem>>, vector<1x1x1x128xf32>
    %270 = vector.shape_cast %269 : vector<1x1x1x128xf32> to vector<1x128xf32>
    %c0_115 = arith.constant 0 : index
    %c3 = arith.constant 3 : index
    %c0_116 = arith.constant 0 : index
    %c0_117 = arith.constant 0 : index
    %271 = vector.load %arg6[%c0_115, %c3, %c0_116, %c0_117] : memref<2x4x1x128xf32, #tpu.memory_space<vmem>>, vector<1x1x1x128xf32>
    %272 = vector.shape_cast %271 : vector<1x1x1x128xf32> to vector<1x128xf32>
    %cst_118 = arith.constant dense<0.000000e+00> : vector<16xf32>
    %273 = vector.multi_reduction <add>, %268, %cst_118 [1] : vector<16x128xf32> to vector<16xf32>
    %274 = vector.shape_cast %273 : vector<16xf32> to vector<16x1xf32>
    %cst_119 = arith.constant 1.280000e+02 : f32
    %275 = vector.broadcast %cst_119 : f32 to vector<16x1xf32>
    %276 = arith.divf %274, %275 : vector<16x1xf32>
    %277 = vector.broadcast %276 : vector<16x1xf32> to vector<16x128xf32>
    %278 = arith.subf %268, %277 : vector<16x128xf32>
    %279 = arith.mulf %278, %278 : vector<16x128xf32>
    %cst_120 = arith.constant dense<0.000000e+00> : vector<16xf32>
    %280 = vector.multi_reduction <add>, %279, %cst_120 [1] : vector<16x128xf32> to vector<16xf32>
    %281 = vector.shape_cast %280 : vector<16xf32> to vector<16x1xf32>
    %cst_121 = arith.constant 1.280000e+02 : f32
    %282 = vector.broadcast %cst_121 : f32 to vector<16x1xf32>
    %283 = arith.divf %281, %282 : vector<16x1xf32>
    %cst_122 = arith.constant 9.99999974E-6 : f32
    %284 = vector.broadcast %cst_122 : f32 to vector<16x1xf32>
    %285 = arith.addf %283, %284 : vector<16x1xf32>
    %286 = math.rsqrt %285 : vector<16x1xf32>
    %287 = vector.broadcast %286 : vector<16x1xf32> to vector<16x128xf32>
    %288 = arith.mulf %278, %287 : vector<16x128xf32>
    %289 = vector.broadcast %270 : vector<1x128xf32> to vector<16x128xf32>
    %290 = arith.mulf %288, %289 : vector<16x128xf32>
    %291 = vector.broadcast %272 : vector<1x128xf32> to vector<16x128xf32>
    %292 = arith.addf %290, %291 : vector<16x128xf32>
    %293 = arith.truncf %292 : vector<16x128xf32> to vector<16x128xbf16>
    %c1_123 = arith.constant 1 : index
    %c0_124 = arith.constant 0 : index
    %c0_125 = arith.constant 0 : index
    %294 = vector.load %arg2[%c1_123, %c0_124, %c0_125] : memref<2x128x384xbf16, #tpu.memory_space<vmem>>, vector<1x128x384xbf16>
    %295 = vector.shape_cast %294 : vector<1x128x384xbf16> to vector<128x384xbf16>
    %cst_126 = arith.constant dense<0.000000e+00> : vector<16x384xf32>
    %296 = tpu.matmul %293, %295, %cst_126 {dimension_numbers = #tpu.dot_dimension_numbers<[1], [0], [0], [1], [0, 0, 1, 1], [], []>} : vector<16x128xbf16>, vector<128x384xbf16>, vector<16x384xf32> -> vector<16x384xf32>
    %c1_127 = arith.constant 1 : index
    %c0_128 = arith.constant 0 : index
    %c0_129 = arith.constant 0 : index
    %297 = vector.load %arg3[%c1_127, %c0_128, %c0_129] : memref<2x1x384xf32, #tpu.memory_space<vmem>>, vector<1x1x384xf32>
    %298 = vector.shape_cast %297 : vector<1x1x384xf32> to vector<1x384xf32>
    %299 = vector.broadcast %298 : vector<1x384xf32> to vector<16x384xf32>
    %300 = arith.addf %296, %299 : vector<16x384xf32>
    %301 = vector.extract_strided_slice %300 {offsets = [0, 0], sizes = [16, 128], strides = [1, 1]} : vector<16x384xf32> to vector<16x128xf32>
    %302 = vector.extract_strided_slice %300 {offsets = [0, 128], sizes = [16, 128], strides = [1, 1]} : vector<16x384xf32> to vector<16x128xf32>
    %303 = vector.extract_strided_slice %300 {offsets = [0, 256], sizes = [16, 128], strides = [1, 1]} : vector<16x384xf32> to vector<16x128xf32>
    %304 = vector.extract_strided_slice %301 {offsets = [0, 0], sizes = [8, 128], strides = [1, 1]} : vector<16x128xf32> to vector<8x128xf32>
    %305 = arith.truncf %304 : vector<8x128xf32> to vector<8x128xbf16>
    %306 = vector.extract_strided_slice %302 {offsets = [0, 0], sizes = [8, 128], strides = [1, 1]} : vector<16x128xf32> to vector<8x128xf32>
    %307 = arith.truncf %306 : vector<8x128xf32> to vector<8x128xbf16>
    %308 = vector.extract_strided_slice %303 {offsets = [0, 0], sizes = [8, 128], strides = [1, 1]} : vector<16x128xf32> to vector<8x128xf32>
    %309 = arith.truncf %308 : vector<8x128xf32> to vector<8x128xbf16>
    %310 = vector.extract_strided_slice %305 {offsets = [0, 0], sizes = [8, 32], strides = [1, 1]} : vector<8x128xbf16> to vector<8x32xbf16>
    %311 = vector.extract_strided_slice %307 {offsets = [0, 0], sizes = [8, 32], strides = [1, 1]} : vector<8x128xbf16> to vector<8x32xbf16>
    %cst_130 = arith.constant dense<0.000000e+00> : vector<8x8xf32>
    %312 = tpu.matmul %310, %311, %cst_130 {dimension_numbers = #tpu.dot_dimension_numbers<[1], [1], [0], [0], [0, 0, 1, 0], [], []>} : vector<8x32xbf16>, vector<8x32xbf16>, vector<8x8xf32> -> vector<8x8xf32>
    %cst_131 = arith.constant dense<0xFF800000> : vector<8xf32>
    %313 = vector.multi_reduction <maximumf>, %312, %cst_131 [1] : vector<8x8xf32> to vector<8xf32>
    %314 = vector.shape_cast %313 : vector<8xf32> to vector<8x1xf32>
    %315 = vector.broadcast %314 : vector<8x1xf32> to vector<8x8xf32>
    %316 = arith.subf %312, %315 : vector<8x8xf32>
    %317 = math.exp %316 : vector<8x8xf32>
    %cst_132 = arith.constant dense<0.000000e+00> : vector<8xf32>
    %318 = vector.multi_reduction <add>, %317, %cst_132 [1] : vector<8x8xf32> to vector<8xf32>
    %319 = vector.shape_cast %318 : vector<8xf32> to vector<8x1xf32>
    %320 = tpu.reciprocal %319 {approx = true} : vector<8x1xf32> -> vector<8x1xf32>
    %321 = vector.broadcast %320 : vector<8x1xf32> to vector<8x8xf32>
    %322 = arith.mulf %317, %321 : vector<8x8xf32>
    %323 = arith.truncf %322 : vector<8x8xf32> to vector<8x8xbf16>
    %324 = vector.extract_strided_slice %309 {offsets = [0, 0], sizes = [8, 32], strides = [1, 1]} : vector<8x128xbf16> to vector<8x32xbf16>
    %cst_133 = arith.constant dense<0.000000e+00> : vector<8x32xf32>
    %325 = tpu.matmul %323, %324, %cst_133 {dimension_numbers = #tpu.dot_dimension_numbers<[1], [0], [0], [1], [0, 0, 1, 1], [], []>} : vector<8x8xbf16>, vector<8x32xbf16>, vector<8x32xf32> -> vector<8x32xf32>
    %c0_134 = arith.constant 0 : index
    %c0_135 = arith.constant 0 : index
    %c0_136 = arith.constant 0 : index
    %326 = vector.load %arg12[%c0_134, %c0_135, %c0_136] : memref<2x8x128xf32, #tpu.memory_space<vmem>>, vector<1x8x32xf32>
    %327 = vector.shape_cast %326 : vector<1x8x32xf32> to vector<8x32xf32>
    %328 = vector.shape_cast %325 : vector<8x32xf32> to vector<1x8x32xf32>
    tpu.vector_store %arg12[%c0_134, %c0_135, %c0_136], %328 {strides = array<i32>} : memref<2x8x128xf32, #tpu.memory_space<vmem>>, vector<1x8x32xf32>,
    %329 = vector.extract_strided_slice %305 {offsets = [0, 32], sizes = [8, 32], strides = [1, 1]} : vector<8x128xbf16> to vector<8x32xbf16>
    %330 = vector.extract_strided_slice %307 {offsets = [0, 32], sizes = [8, 32], strides = [1, 1]} : vector<8x128xbf16> to vector<8x32xbf16>
    %cst_137 = arith.constant dense<0.000000e+00> : vector<8x8xf32>
    %331 = tpu.matmul %329, %330, %cst_137 {dimension_numbers = #tpu.dot_dimension_numbers<[1], [1], [0], [0], [0, 0, 1, 0], [], []>} : vector<8x32xbf16>, vector<8x32xbf16>, vector<8x8xf32> -> vector<8x8xf32>
    %cst_138 = arith.constant dense<0xFF800000> : vector<8xf32>
    %332 = vector.multi_reduction <maximumf>, %331, %cst_138 [1] : vector<8x8xf32> to vector<8xf32>
    %333 = vector.shape_cast %332 : vector<8xf32> to vector<8x1xf32>
    %334 = vector.broadcast %333 : vector<8x1xf32> to vector<8x8xf32>
    %335 = arith.subf %331, %334 : vector<8x8xf32>
    %336 = math.exp %335 : vector<8x8xf32>
    %cst_139 = arith.constant dense<0.000000e+00> : vector<8xf32>
    %337 = vector.multi_reduction <add>, %336, %cst_139 [1] : vector<8x8xf32> to vector<8xf32>
    %338 = vector.shape_cast %337 : vector<8xf32> to vector<8x1xf32>
    %339 = tpu.reciprocal %338 {approx = true} : vector<8x1xf32> -> vector<8x1xf32>
    %340 = vector.broadcast %339 : vector<8x1xf32> to vector<8x8xf32>
    %341 = arith.mulf %336, %340 : vector<8x8xf32>
    %342 = arith.truncf %341 : vector<8x8xf32> to vector<8x8xbf16>
    %343 = vector.extract_strided_slice %309 {offsets = [0, 32], sizes = [8, 32], strides = [1, 1]} : vector<8x128xbf16> to vector<8x32xbf16>
    %cst_140 = arith.constant dense<0.000000e+00> : vector<8x32xf32>
    %344 = tpu.matmul %342, %343, %cst_140 {dimension_numbers = #tpu.dot_dimension_numbers<[1], [0], [0], [1], [0, 0, 1, 1], [], []>} : vector<8x8xbf16>, vector<8x32xbf16>, vector<8x32xf32> -> vector<8x32xf32>
    %c0_141 = arith.constant 0 : index
    %c0_142 = arith.constant 0 : index
    %c32_143 = arith.constant 32 : index
    %345 = vector.load %arg12[%c0_141, %c0_142, %c32_143] : memref<2x8x128xf32, #tpu.memory_space<vmem>>, vector<1x8x32xf32>
    %346 = vector.shape_cast %345 : vector<1x8x32xf32> to vector<8x32xf32>
    %347 = vector.shape_cast %344 : vector<8x32xf32> to vector<1x8x32xf32>
    tpu.vector_store %arg12[%c0_141, %c0_142, %c32_143], %347 {strides = array<i32>} : memref<2x8x128xf32, #tpu.memory_space<vmem>>, vector<1x8x32xf32>,
    %348 = vector.extract_strided_slice %305 {offsets = [0, 64], sizes = [8, 32], strides = [1, 1]} : vector<8x128xbf16> to vector<8x32xbf16>
    %349 = vector.extract_strided_slice %307 {offsets = [0, 64], sizes = [8, 32], strides = [1, 1]} : vector<8x128xbf16> to vector<8x32xbf16>
    %cst_144 = arith.constant dense<0.000000e+00> : vector<8x8xf32>
    %350 = tpu.matmul %348, %349, %cst_144 {dimension_numbers = #tpu.dot_dimension_numbers<[1], [1], [0], [0], [0, 0, 1, 0], [], []>} : vector<8x32xbf16>, vector<8x32xbf16>, vector<8x8xf32> -> vector<8x8xf32>
    %cst_145 = arith.constant dense<0xFF800000> : vector<8xf32>
    %351 = vector.multi_reduction <maximumf>, %350, %cst_145 [1] : vector<8x8xf32> to vector<8xf32>
    %352 = vector.shape_cast %351 : vector<8xf32> to vector<8x1xf32>
    %353 = vector.broadcast %352 : vector<8x1xf32> to vector<8x8xf32>
    %354 = arith.subf %350, %353 : vector<8x8xf32>
    %355 = math.exp %354 : vector<8x8xf32>
    %cst_146 = arith.constant dense<0.000000e+00> : vector<8xf32>
    %356 = vector.multi_reduction <add>, %355, %cst_146 [1] : vector<8x8xf32> to vector<8xf32>
    %357 = vector.shape_cast %356 : vector<8xf32> to vector<8x1xf32>
    %358 = tpu.reciprocal %357 {approx = true} : vector<8x1xf32> -> vector<8x1xf32>
    %359 = vector.broadcast %358 : vector<8x1xf32> to vector<8x8xf32>
    %360 = arith.mulf %355, %359 : vector<8x8xf32>
    %361 = arith.truncf %360 : vector<8x8xf32> to vector<8x8xbf16>
    %362 = vector.extract_strided_slice %309 {offsets = [0, 64], sizes = [8, 32], strides = [1, 1]} : vector<8x128xbf16> to vector<8x32xbf16>
    %cst_147 = arith.constant dense<0.000000e+00> : vector<8x32xf32>
    %363 = tpu.matmul %361, %362, %cst_147 {dimension_numbers = #tpu.dot_dimension_numbers<[1], [0], [0], [1], [0, 0, 1, 1], [], []>} : vector<8x8xbf16>, vector<8x32xbf16>, vector<8x32xf32> -> vector<8x32xf32>
    %c0_148 = arith.constant 0 : index
    %c0_149 = arith.constant 0 : index
    %c64_150 = arith.constant 64 : index
    %364 = vector.load %arg12[%c0_148, %c0_149, %c64_150] : memref<2x8x128xf32, #tpu.memory_space<vmem>>, vector<1x8x32xf32>
    %365 = vector.shape_cast %364 : vector<1x8x32xf32> to vector<8x32xf32>
    %366 = vector.shape_cast %363 : vector<8x32xf32> to vector<1x8x32xf32>
    tpu.vector_store %arg12[%c0_148, %c0_149, %c64_150], %366 {strides = array<i32>} : memref<2x8x128xf32, #tpu.memory_space<vmem>>, vector<1x8x32xf32>,
    %367 = vector.extract_strided_slice %305 {offsets = [0, 96], sizes = [8, 32], strides = [1, 1]} : vector<8x128xbf16> to vector<8x32xbf16>
    %368 = vector.extract_strided_slice %307 {offsets = [0, 96], sizes = [8, 32], strides = [1, 1]} : vector<8x128xbf16> to vector<8x32xbf16>
    %cst_151 = arith.constant dense<0.000000e+00> : vector<8x8xf32>
    %369 = tpu.matmul %367, %368, %cst_151 {dimension_numbers = #tpu.dot_dimension_numbers<[1], [1], [0], [0], [0, 0, 1, 0], [], []>} : vector<8x32xbf16>, vector<8x32xbf16>, vector<8x8xf32> -> vector<8x8xf32>
    %cst_152 = arith.constant dense<0xFF800000> : vector<8xf32>
    %370 = vector.multi_reduction <maximumf>, %369, %cst_152 [1] : vector<8x8xf32> to vector<8xf32>
    %371 = vector.shape_cast %370 : vector<8xf32> to vector<8x1xf32>
    %372 = vector.broadcast %371 : vector<8x1xf32> to vector<8x8xf32>
    %373 = arith.subf %369, %372 : vector<8x8xf32>
    %374 = math.exp %373 : vector<8x8xf32>
    %cst_153 = arith.constant dense<0.000000e+00> : vector<8xf32>
    %375 = vector.multi_reduction <add>, %374, %cst_153 [1] : vector<8x8xf32> to vector<8xf32>
    %376 = vector.shape_cast %375 : vector<8xf32> to vector<8x1xf32>
    %377 = tpu.reciprocal %376 {approx = true} : vector<8x1xf32> -> vector<8x1xf32>
    %378 = vector.broadcast %377 : vector<8x1xf32> to vector<8x8xf32>
    %379 = arith.mulf %374, %378 : vector<8x8xf32>
    %380 = arith.truncf %379 : vector<8x8xf32> to vector<8x8xbf16>
    %381 = vector.extract_strided_slice %309 {offsets = [0, 96], sizes = [8, 32], strides = [1, 1]} : vector<8x128xbf16> to vector<8x32xbf16>
    %cst_154 = arith.constant dense<0.000000e+00> : vector<8x32xf32>
    %382 = tpu.matmul %380, %381, %cst_154 {dimension_numbers = #tpu.dot_dimension_numbers<[1], [0], [0], [1], [0, 0, 1, 1], [], []>} : vector<8x8xbf16>, vector<8x32xbf16>, vector<8x32xf32> -> vector<8x32xf32>
    %c0_155 = arith.constant 0 : index
    %c0_156 = arith.constant 0 : index
    %c96_157 = arith.constant 96 : index
    %383 = vector.load %arg12[%c0_155, %c0_156, %c96_157] : memref<2x8x128xf32, #tpu.memory_space<vmem>>, vector<1x8x32xf32>
    %384 = vector.shape_cast %383 : vector<1x8x32xf32> to vector<8x32xf32>
    %385 = vector.shape_cast %382 : vector<8x32xf32> to vector<1x8x32xf32>
    tpu.vector_store %arg12[%c0_155, %c0_156, %c96_157], %385 {strides = array<i32>} : memref<2x8x128xf32, #tpu.memory_space<vmem>>, vector<1x8x32xf32>,
    %386 = vector.extract_strided_slice %301 {offsets = [8, 0], sizes = [8, 128], strides = [1, 1]} : vector<16x128xf32> to vector<8x128xf32>
    %387 = arith.truncf %386 : vector<8x128xf32> to vector<8x128xbf16>
    %388 = vector.extract_strided_slice %302 {offsets = [8, 0], sizes = [8, 128], strides = [1, 1]} : vector<16x128xf32> to vector<8x128xf32>
    %389 = arith.truncf %388 : vector<8x128xf32> to vector<8x128xbf16>
    %390 = vector.extract_strided_slice %303 {offsets = [8, 0], sizes = [8, 128], strides = [1, 1]} : vector<16x128xf32> to vector<8x128xf32>
    %391 = arith.truncf %390 : vector<8x128xf32> to vector<8x128xbf16>
    %392 = vector.extract_strided_slice %387 {offsets = [0, 0], sizes = [8, 32], strides = [1, 1]} : vector<8x128xbf16> to vector<8x32xbf16>
    %393 = vector.extract_strided_slice %389 {offsets = [0, 0], sizes = [8, 32], strides = [1, 1]} : vector<8x128xbf16> to vector<8x32xbf16>
    %cst_158 = arith.constant dense<0.000000e+00> : vector<8x8xf32>
    %394 = tpu.matmul %392, %393, %cst_158 {dimension_numbers = #tpu.dot_dimension_numbers<[1], [1], [0], [0], [0, 0, 1, 0], [], []>} : vector<8x32xbf16>, vector<8x32xbf16>, vector<8x8xf32> -> vector<8x8xf32>
    %cst_159 = arith.constant dense<0xFF800000> : vector<8xf32>
    %395 = vector.multi_reduction <maximumf>, %394, %cst_159 [1] : vector<8x8xf32> to vector<8xf32>
    %396 = vector.shape_cast %395 : vector<8xf32> to vector<8x1xf32>
    %397 = vector.broadcast %396 : vector<8x1xf32> to vector<8x8xf32>
    %398 = arith.subf %394, %397 : vector<8x8xf32>
    %399 = math.exp %398 : vector<8x8xf32>
    %cst_160 = arith.constant dense<0.000000e+00> : vector<8xf32>
    %400 = vector.multi_reduction <add>, %399, %cst_160 [1] : vector<8x8xf32> to vector<8xf32>
    %401 = vector.shape_cast %400 : vector<8xf32> to vector<8x1xf32>
    %402 = tpu.reciprocal %401 {approx = true} : vector<8x1xf32> -> vector<8x1xf32>
    %403 = vector.broadcast %402 : vector<8x1xf32> to vector<8x8xf32>
    %404 = arith.mulf %399, %403 : vector<8x8xf32>
    %405 = arith.truncf %404 : vector<8x8xf32> to vector<8x8xbf16>
    %406 = vector.extract_strided_slice %391 {offsets = [0, 0], sizes = [8, 32], strides = [1, 1]} : vector<8x128xbf16> to vector<8x32xbf16>
    %cst_161 = arith.constant dense<0.000000e+00> : vector<8x32xf32>
    %407 = tpu.matmul %405, %406, %cst_161 {dimension_numbers = #tpu.dot_dimension_numbers<[1], [0], [0], [1], [0, 0, 1, 1], [], []>} : vector<8x8xbf16>, vector<8x32xbf16>, vector<8x32xf32> -> vector<8x32xf32>
    %c1_162 = arith.constant 1 : index
    %c0_163 = arith.constant 0 : index
    %c0_164 = arith.constant 0 : index
    %408 = vector.load %arg12[%c1_162, %c0_163, %c0_164] : memref<2x8x128xf32, #tpu.memory_space<vmem>>, vector<1x8x32xf32>
    %409 = vector.shape_cast %408 : vector<1x8x32xf32> to vector<8x32xf32>
    %410 = vector.shape_cast %407 : vector<8x32xf32> to vector<1x8x32xf32>
    tpu.vector_store %arg12[%c1_162, %c0_163, %c0_164], %410 {strides = array<i32>} : memref<2x8x128xf32, #tpu.memory_space<vmem>>, vector<1x8x32xf32>,
    %411 = vector.extract_strided_slice %387 {offsets = [0, 32], sizes = [8, 32], strides = [1, 1]} : vector<8x128xbf16> to vector<8x32xbf16>
    %412 = vector.extract_strided_slice %389 {offsets = [0, 32], sizes = [8, 32], strides = [1, 1]} : vector<8x128xbf16> to vector<8x32xbf16>
    %cst_165 = arith.constant dense<0.000000e+00> : vector<8x8xf32>
    %413 = tpu.matmul %411, %412, %cst_165 {dimension_numbers = #tpu.dot_dimension_numbers<[1], [1], [0], [0], [0, 0, 1, 0], [], []>} : vector<8x32xbf16>, vector<8x32xbf16>, vector<8x8xf32> -> vector<8x8xf32>
    %cst_166 = arith.constant dense<0xFF800000> : vector<8xf32>
    %414 = vector.multi_reduction <maximumf>, %413, %cst_166 [1] : vector<8x8xf32> to vector<8xf32>
    %415 = vector.shape_cast %414 : vector<8xf32> to vector<8x1xf32>
    %416 = vector.broadcast %415 : vector<8x1xf32> to vector<8x8xf32>
    %417 = arith.subf %413, %416 : vector<8x8xf32>
    %418 = math.exp %417 : vector<8x8xf32>
    %cst_167 = arith.constant dense<0.000000e+00> : vector<8xf32>
    %419 = vector.multi_reduction <add>, %418, %cst_167 [1] : vector<8x8xf32> to vector<8xf32>
    %420 = vector.shape_cast %419 : vector<8xf32> to vector<8x1xf32>
    %421 = tpu.reciprocal %420 {approx = true} : vector<8x1xf32> -> vector<8x1xf32>
    %422 = vector.broadcast %421 : vector<8x1xf32> to vector<8x8xf32>
    %423 = arith.mulf %418, %422 : vector<8x8xf32>
    %424 = arith.truncf %423 : vector<8x8xf32> to vector<8x8xbf16>
    %425 = vector.extract_strided_slice %391 {offsets = [0, 32], sizes = [8, 32], strides = [1, 1]} : vector<8x128xbf16> to vector<8x32xbf16>
    %cst_168 = arith.constant dense<0.000000e+00> : vector<8x32xf32>
    %426 = tpu.matmul %424, %425, %cst_168 {dimension_numbers = #tpu.dot_dimension_numbers<[1], [0], [0], [1], [0, 0, 1, 1], [], []>} : vector<8x8xbf16>, vector<8x32xbf16>, vector<8x32xf32> -> vector<8x32xf32>
    %c1_169 = arith.constant 1 : index
    %c0_170 = arith.constant 0 : index
    %c32_171 = arith.constant 32 : index
    %427 = vector.load %arg12[%c1_169, %c0_170, %c32_171] : memref<2x8x128xf32, #tpu.memory_space<vmem>>, vector<1x8x32xf32>
    %428 = vector.shape_cast %427 : vector<1x8x32xf32> to vector<8x32xf32>
    %429 = vector.shape_cast %426 : vector<8x32xf32> to vector<1x8x32xf32>
    tpu.vector_store %arg12[%c1_169, %c0_170, %c32_171], %429 {strides = array<i32>} : memref<2x8x128xf32, #tpu.memory_space<vmem>>, vector<1x8x32xf32>,
    %430 = vector.extract_strided_slice %387 {offsets = [0, 64], sizes = [8, 32], strides = [1, 1]} : vector<8x128xbf16> to vector<8x32xbf16>
    %431 = vector.extract_strided_slice %389 {offsets = [0, 64], sizes = [8, 32], strides = [1, 1]} : vector<8x128xbf16> to vector<8x32xbf16>
    %cst_172 = arith.constant dense<0.000000e+00> : vector<8x8xf32>
    %432 = tpu.matmul %430, %431, %cst_172 {dimension_numbers = #tpu.dot_dimension_numbers<[1], [1], [0], [0], [0, 0, 1, 0], [], []>} : vector<8x32xbf16>, vector<8x32xbf16>, vector<8x8xf32> -> vector<8x8xf32>
    %cst_173 = arith.constant dense<0xFF800000> : vector<8xf32>
    %433 = vector.multi_reduction <maximumf>, %432, %cst_173 [1] : vector<8x8xf32> to vector<8xf32>
    %434 = vector.shape_cast %433 : vector<8xf32> to vector<8x1xf32>
    %435 = vector.broadcast %434 : vector<8x1xf32> to vector<8x8xf32>
    %436 = arith.subf %432, %435 : vector<8x8xf32>
    %437 = math.exp %436 : vector<8x8xf32>
    %cst_174 = arith.constant dense<0.000000e+00> : vector<8xf32>
    %438 = vector.multi_reduction <add>, %437, %cst_174 [1] : vector<8x8xf32> to vector<8xf32>
    %439 = vector.shape_cast %438 : vector<8xf32> to vector<8x1xf32>
    %440 = tpu.reciprocal %439 {approx = true} : vector<8x1xf32> -> vector<8x1xf32>
    %441 = vector.broadcast %440 : vector<8x1xf32> to vector<8x8xf32>
    %442 = arith.mulf %437, %441 : vector<8x8xf32>
    %443 = arith.truncf %442 : vector<8x8xf32> to vector<8x8xbf16>
    %444 = vector.extract_strided_slice %391 {offsets = [0, 64], sizes = [8, 32], strides = [1, 1]} : vector<8x128xbf16> to vector<8x32xbf16>
    %cst_175 = arith.constant dense<0.000000e+00> : vector<8x32xf32>
    %445 = tpu.matmul %443, %444, %cst_175 {dimension_numbers = #tpu.dot_dimension_numbers<[1], [0], [0], [1], [0, 0, 1, 1], [], []>} : vector<8x8xbf16>, vector<8x32xbf16>, vector<8x32xf32> -> vector<8x32xf32>
    %c1_176 = arith.constant 1 : index
    %c0_177 = arith.constant 0 : index
    %c64_178 = arith.constant 64 : index
    %446 = vector.load %arg12[%c1_176, %c0_177, %c64_178] : memref<2x8x128xf32, #tpu.memory_space<vmem>>, vector<1x8x32xf32>
    %447 = vector.shape_cast %446 : vector<1x8x32xf32> to vector<8x32xf32>
    %448 = vector.shape_cast %445 : vector<8x32xf32> to vector<1x8x32xf32>
    tpu.vector_store %arg12[%c1_176, %c0_177, %c64_178], %448 {strides = array<i32>} : memref<2x8x128xf32, #tpu.memory_space<vmem>>, vector<1x8x32xf32>,
    %449 = vector.extract_strided_slice %387 {offsets = [0, 96], sizes = [8, 32], strides = [1, 1]} : vector<8x128xbf16> to vector<8x32xbf16>
    %450 = vector.extract_strided_slice %389 {offsets = [0, 96], sizes = [8, 32], strides = [1, 1]} : vector<8x128xbf16> to vector<8x32xbf16>
    %cst_179 = arith.constant dense<0.000000e+00> : vector<8x8xf32>
    %451 = tpu.matmul %449, %450, %cst_179 {dimension_numbers = #tpu.dot_dimension_numbers<[1], [1], [0], [0], [0, 0, 1, 0], [], []>} : vector<8x32xbf16>, vector<8x32xbf16>, vector<8x8xf32> -> vector<8x8xf32>
    %cst_180 = arith.constant dense<0xFF800000> : vector<8xf32>
    %452 = vector.multi_reduction <maximumf>, %451, %cst_180 [1] : vector<8x8xf32> to vector<8xf32>
    %453 = vector.shape_cast %452 : vector<8xf32> to vector<8x1xf32>
    %454 = vector.broadcast %453 : vector<8x1xf32> to vector<8x8xf32>
    %455 = arith.subf %451, %454 : vector<8x8xf32>
    %456 = math.exp %455 : vector<8x8xf32>
    %cst_181 = arith.constant dense<0.000000e+00> : vector<8xf32>
    %457 = vector.multi_reduction <add>, %456, %cst_181 [1] : vector<8x8xf32> to vector<8xf32>
    %458 = vector.shape_cast %457 : vector<8xf32> to vector<8x1xf32>
    %459 = tpu.reciprocal %458 {approx = true} : vector<8x1xf32> -> vector<8x1xf32>
    %460 = vector.broadcast %459 : vector<8x1xf32> to vector<8x8xf32>
    %461 = arith.mulf %456, %460 : vector<8x8xf32>
    %462 = arith.truncf %461 : vector<8x8xf32> to vector<8x8xbf16>
    %463 = vector.extract_strided_slice %391 {offsets = [0, 96], sizes = [8, 32], strides = [1, 1]} : vector<8x128xbf16> to vector<8x32xbf16>
    %cst_182 = arith.constant dense<0.000000e+00> : vector<8x32xf32>
    %464 = tpu.matmul %462, %463, %cst_182 {dimension_numbers = #tpu.dot_dimension_numbers<[1], [0], [0], [1], [0, 0, 1, 1], [], []>} : vector<8x8xbf16>, vector<8x32xbf16>, vector<8x32xf32> -> vector<8x32xf32>
    %c1_183 = arith.constant 1 : index
    %c0_184 = arith.constant 0 : index
    %c96_185 = arith.constant 96 : index
    %465 = vector.load %arg12[%c1_183, %c0_184, %c96_185] : memref<2x8x128xf32, #tpu.memory_space<vmem>>, vector<1x8x32xf32>
    %466 = vector.shape_cast %465 : vector<1x8x32xf32> to vector<8x32xf32>
    %467 = vector.shape_cast %464 : vector<8x32xf32> to vector<1x8x32xf32>
    tpu.vector_store %arg12[%c1_183, %c0_184, %c96_185], %467 {strides = array<i32>} : memref<2x8x128xf32, #tpu.memory_space<vmem>>, vector<1x8x32xf32>,
    %c0_186 = arith.constant 0 : index
    %c0_187 = arith.constant 0 : index
    %c0_188 = arith.constant 0 : index
    %468 = vector.load %arg12[%c0_186, %c0_187, %c0_188] : memref<2x8x128xf32, #tpu.memory_space<vmem>>, vector<2x8x128xf32>
    %469 = vector.shape_cast %468 : vector<2x8x128xf32> to vector<16x128xf32>
    %470 = arith.truncf %469 : vector<16x128xf32> to vector<16x128xbf16>
    %c1_189 = arith.constant 1 : index
    %c0_190 = arith.constant 0 : index
    %c0_191 = arith.constant 0 : index
    %471 = vector.load %arg4[%c1_189, %c0_190, %c0_191] : memref<2x128x128xbf16, #tpu.memory_space<vmem>>, vector<1x128x128xbf16>
    %472 = vector.shape_cast %471 : vector<1x128x128xbf16> to vector<128x128xbf16>
    %cst_192 = arith.constant dense<0.000000e+00> : vector<16x128xf32>
    %473 = tpu.matmul %470, %472, %cst_192 {dimension_numbers = #tpu.dot_dimension_numbers<[1], [0], [0], [1], [0, 0, 1, 1], [], []>} : vector<16x128xbf16>, vector<128x128xbf16>, vector<16x128xf32> -> vector<16x128xf32>
    %c1_193 = arith.constant 1 : index
    %c0_194 = arith.constant 0 : index
    %c0_195 = arith.constant 0 : index
    %474 = vector.load %arg5[%c1_193, %c0_194, %c0_195] : memref<2x1x128xf32, #tpu.memory_space<vmem>>, vector<1x1x128xf32>
    %475 = vector.shape_cast %474 : vector<1x1x128xf32> to vector<1x128xf32>
    %476 = vector.broadcast %475 : vector<1x128xf32> to vector<16x128xf32>
    %477 = arith.addf %473, %476 : vector<16x128xf32>
    %478 = arith.addf %292, %477 : vector<16x128xf32>
    %c1_196 = arith.constant 1 : index
    %c0_197 = arith.constant 0 : index
    %c0_198 = arith.constant 0 : index
    %c0_199 = arith.constant 0 : index
    %479 = vector.load %arg6[%c1_196, %c0_197, %c0_198, %c0_199] : memref<2x4x1x128xf32, #tpu.memory_space<vmem>>, vector<1x1x1x128xf32>
    %480 = vector.shape_cast %479 : vector<1x1x1x128xf32> to vector<1x128xf32>
    %c1_200 = arith.constant 1 : index
    %c1_201 = arith.constant 1 : index
    %c0_202 = arith.constant 0 : index
    %c0_203 = arith.constant 0 : index
    %481 = vector.load %arg6[%c1_200, %c1_201, %c0_202, %c0_203] : memref<2x4x1x128xf32, #tpu.memory_space<vmem>>, vector<1x1x1x128xf32>
    %482 = vector.shape_cast %481 : vector<1x1x1x128xf32> to vector<1x128xf32>
    %cst_204 = arith.constant dense<0.000000e+00> : vector<16xf32>
    %483 = vector.multi_reduction <add>, %478, %cst_204 [1] : vector<16x128xf32> to vector<16xf32>
    %484 = vector.shape_cast %483 : vector<16xf32> to vector<16x1xf32>
    %cst_205 = arith.constant 1.280000e+02 : f32
    %485 = vector.broadcast %cst_205 : f32 to vector<16x1xf32>
    %486 = arith.divf %484, %485 : vector<16x1xf32>
    %487 = vector.broadcast %486 : vector<16x1xf32> to vector<16x128xf32>
    %488 = arith.subf %478, %487 : vector<16x128xf32>
    %489 = arith.mulf %488, %488 : vector<16x128xf32>
    %cst_206 = arith.constant dense<0.000000e+00> : vector<16xf32>
    %490 = vector.multi_reduction <add>, %489, %cst_206 [1] : vector<16x128xf32> to vector<16xf32>
    %491 = vector.shape_cast %490 : vector<16xf32> to vector<16x1xf32>
    %cst_207 = arith.constant 1.280000e+02 : f32
    %492 = vector.broadcast %cst_207 : f32 to vector<16x1xf32>
    %493 = arith.divf %491, %492 : vector<16x1xf32>
    %cst_208 = arith.constant 9.99999974E-6 : f32
    %494 = vector.broadcast %cst_208 : f32 to vector<16x1xf32>
    %495 = arith.addf %493, %494 : vector<16x1xf32>
    %496 = math.rsqrt %495 : vector<16x1xf32>
    %497 = vector.broadcast %496 : vector<16x1xf32> to vector<16x128xf32>
    %498 = arith.mulf %488, %497 : vector<16x128xf32>
    %499 = vector.broadcast %480 : vector<1x128xf32> to vector<16x128xf32>
    %500 = arith.mulf %498, %499 : vector<16x128xf32>
    %501 = vector.broadcast %482 : vector<1x128xf32> to vector<16x128xf32>
    %502 = arith.addf %500, %501 : vector<16x128xf32>
    %503 = arith.truncf %502 : vector<16x128xf32> to vector<16x128xbf16>
    %c1_209 = arith.constant 1 : index
    %c0_210 = arith.constant 0 : index
    %c0_211 = arith.constant 0 : index
    %504 = vector.load %arg7[%c1_209, %c0_210, %c0_211] : memref<2x128x256xbf16, #tpu.memory_space<vmem>>, vector<1x128x256xbf16>
    %505 = vector.shape_cast %504 : vector<1x128x256xbf16> to vector<128x256xbf16>
    %cst_212 = arith.constant dense<0.000000e+00> : vector<16x256xf32>
    %506 = tpu.matmul %503, %505, %cst_212 {dimension_numbers = #tpu.dot_dimension_numbers<[1], [0], [0], [1], [0, 0, 1, 1], [], []>} : vector<16x128xbf16>, vector<128x256xbf16>, vector<16x256xf32> -> vector<16x256xf32>
    %c1_213 = arith.constant 1 : index
    %c0_214 = arith.constant 0 : index
    %c0_215 = arith.constant 0 : index
    %507 = vector.load %arg8[%c1_213, %c0_214, %c0_215] : memref<2x1x256xf32, #tpu.memory_space<vmem>>, vector<1x1x256xf32>
    %508 = vector.shape_cast %507 : vector<1x1x256xf32> to vector<1x256xf32>
    %509 = vector.broadcast %508 : vector<1x256xf32> to vector<16x256xf32>
    %510 = arith.addf %506, %509 : vector<16x256xf32>
    %cst_216 = arith.constant 5.000000e-01 : f32
    %511 = vector.broadcast %cst_216 : f32 to vector<16x256xf32>
    %512 = arith.mulf %511, %510 : vector<16x256xf32>
    %cst_217 = arith.constant 0.707106769 : f32
    %513 = vector.broadcast %cst_217 : f32 to vector<16x256xf32>
    %514 = arith.mulf %510, %513 : vector<16x256xf32>
    %cst_218 = arith.constant 0.000000e+00 : f32
    %515 = vector.broadcast %cst_218 : f32 to vector<16x256xf32>
    %516 = arith.cmpf oge, %514, %515 : vector<16x256xf32>
    %cst_219 = arith.constant 1.000000e+00 : f32
    %cst_220 = arith.constant -1.000000e+00 : f32
    %517 = vector.broadcast %cst_219 : f32 to vector<16x256xf32>
    %518 = vector.broadcast %cst_220 : f32 to vector<16x256xf32>
    %519 = arith.select %516, %517, %518 : vector<16x256xi1>, vector<16x256xf32>
    %520 = math.absf %514 : vector<16x256xf32>
    %cst_221 = arith.constant 0.327591091 : f32
    %521 = vector.broadcast %cst_221 : f32 to vector<16x256xf32>
    %522 = arith.mulf %521, %520 : vector<16x256xf32>
    %cst_222 = arith.constant 1.000000e+00 : f32
    %523 = vector.broadcast %cst_222 : f32 to vector<16x256xf32>
    %524 = arith.addf %523, %522 : vector<16x256xf32>
    %525 = tpu.reciprocal %524 {approx = true} : vector<16x256xf32> -> vector<16x256xf32>
    %cst_223 = arith.constant 1.06140542 : f32
    %526 = vector.broadcast %cst_223 : f32 to vector<16x256xf32>
    %527 = arith.mulf %526, %525 : vector<16x256xf32>
    %cst_224 = arith.constant -1.45315206 : f32
    %528 = vector.broadcast %cst_224 : f32 to vector<16x256xf32>
    %529 = arith.addf %527, %528 : vector<16x256xf32>
    %530 = arith.mulf %529, %525 : vector<16x256xf32>
    %cst_225 = arith.constant 1.42141378 : f32
    %531 = vector.broadcast %cst_225 : f32 to vector<16x256xf32>
    %532 = arith.addf %530, %531 : vector<16x256xf32>
    %533 = arith.mulf %532, %525 : vector<16x256xf32>
    %cst_226 = arith.constant -0.284496725 : f32
    %534 = vector.broadcast %cst_226 : f32 to vector<16x256xf32>
    %535 = arith.addf %533, %534 : vector<16x256xf32>
    %536 = arith.mulf %535, %525 : vector<16x256xf32>
    %cst_227 = arith.constant 0.254829586 : f32
    %537 = vector.broadcast %cst_227 : f32 to vector<16x256xf32>
    %538 = arith.addf %536, %537 : vector<16x256xf32>
    %539 = arith.mulf %538, %525 : vector<16x256xf32>
    %cst_228 = arith.constant 0.000000e+00 : f32
    %540 = vector.broadcast %cst_228 : f32 to vector<16x256xf32>
    %541 = arith.subf %540, %520 : vector<16x256xf32>
    %542 = arith.mulf %541, %520 : vector<16x256xf32>
    %543 = math.exp %542 : vector<16x256xf32>
    %544 = arith.mulf %539, %543 : vector<16x256xf32>
    %cst_229 = arith.constant 1.000000e+00 : f32
    %545 = vector.broadcast %cst_229 : f32 to vector<16x256xf32>
    %546 = arith.subf %545, %544 : vector<16x256xf32>
    %547 = arith.mulf %519, %546 : vector<16x256xf32>
    %cst_230 = arith.constant 1.000000e+00 : f32
    %548 = vector.broadcast %cst_230 : f32 to vector<16x256xf32>
    %549 = arith.addf %548, %547 : vector<16x256xf32>
    %550 = arith.mulf %512, %549 : vector<16x256xf32>
    %551 = arith.truncf %550 : vector<16x256xf32> to vector<16x256xbf16>
    %c1_231 = arith.constant 1 : index
    %c0_232 = arith.constant 0 : index
    %c0_233 = arith.constant 0 : index
    %552 = vector.load %arg9[%c1_231, %c0_232, %c0_233] : memref<2x256x128xbf16, #tpu.memory_space<vmem>>, vector<1x256x128xbf16>
    %553 = vector.shape_cast %552 : vector<1x256x128xbf16> to vector<256x128xbf16>
    %cst_234 = arith.constant dense<0.000000e+00> : vector<16x128xf32>
    %554 = tpu.matmul %551, %553, %cst_234 {dimension_numbers = #tpu.dot_dimension_numbers<[1], [0], [0], [1], [0, 0, 1, 1], [], []>} : vector<16x256xbf16>, vector<256x128xbf16>, vector<16x128xf32> -> vector<16x128xf32>
    %c1_235 = arith.constant 1 : index
    %c0_236 = arith.constant 0 : index
    %c0_237 = arith.constant 0 : index
    %555 = vector.load %arg10[%c1_235, %c0_236, %c0_237] : memref<2x1x128xf32, #tpu.memory_space<vmem>>, vector<1x1x128xf32>
    %556 = vector.shape_cast %555 : vector<1x1x128xf32> to vector<1x128xf32>
    %557 = vector.broadcast %556 : vector<1x128xf32> to vector<16x128xf32>
    %558 = arith.addf %554, %557 : vector<16x128xf32>
    %559 = arith.addf %502, %558 : vector<16x128xf32>
    %c1_238 = arith.constant 1 : index
    %c2_239 = arith.constant 2 : index
    %c0_240 = arith.constant 0 : index
    %c0_241 = arith.constant 0 : index
    %560 = vector.load %arg6[%c1_238, %c2_239, %c0_240, %c0_241] : memref<2x4x1x128xf32, #tpu.memory_space<vmem>>, vector<1x1x1x128xf32>
    %561 = vector.shape_cast %560 : vector<1x1x1x128xf32> to vector<1x128xf32>
    %c1_242 = arith.constant 1 : index
    %c3_243 = arith.constant 3 : index
    %c0_244 = arith.constant 0 : index
    %c0_245 = arith.constant 0 : index
    %562 = vector.load %arg6[%c1_242, %c3_243, %c0_244, %c0_245] : memref<2x4x1x128xf32, #tpu.memory_space<vmem>>, vector<1x1x1x128xf32>
    %563 = vector.shape_cast %562 : vector<1x1x1x128xf32> to vector<1x128xf32>
    %cst_246 = arith.constant dense<0.000000e+00> : vector<16xf32>
    %564 = vector.multi_reduction <add>, %559, %cst_246 [1] : vector<16x128xf32> to vector<16xf32>
    %565 = vector.shape_cast %564 : vector<16xf32> to vector<16x1xf32>
    %cst_247 = arith.constant 1.280000e+02 : f32
    %566 = vector.broadcast %cst_247 : f32 to vector<16x1xf32>
    %567 = arith.divf %565, %566 : vector<16x1xf32>
    %568 = vector.broadcast %567 : vector<16x1xf32> to vector<16x128xf32>
    %569 = arith.subf %559, %568 : vector<16x128xf32>
    %570 = arith.mulf %569, %569 : vector<16x128xf32>
    %cst_248 = arith.constant dense<0.000000e+00> : vector<16xf32>
    %571 = vector.multi_reduction <add>, %570, %cst_248 [1] : vector<16x128xf32> to vector<16xf32>
    %572 = vector.shape_cast %571 : vector<16xf32> to vector<16x1xf32>
    %cst_249 = arith.constant 1.280000e+02 : f32
    %573 = vector.broadcast %cst_249 : f32 to vector<16x1xf32>
    %574 = arith.divf %572, %573 : vector<16x1xf32>
    %cst_250 = arith.constant 9.99999974E-6 : f32
    %575 = vector.broadcast %cst_250 : f32 to vector<16x1xf32>
    %576 = arith.addf %574, %575 : vector<16x1xf32>
    %577 = math.rsqrt %576 : vector<16x1xf32>
    %578 = vector.broadcast %577 : vector<16x1xf32> to vector<16x128xf32>
    %579 = arith.mulf %569, %578 : vector<16x128xf32>
    %580 = vector.broadcast %561 : vector<1x128xf32> to vector<16x128xf32>
    %581 = arith.mulf %579, %580 : vector<16x128xf32>
    %582 = vector.broadcast %563 : vector<1x128xf32> to vector<16x128xf32>
    %583 = arith.addf %581, %582 : vector<16x128xf32>
    %584 = vector.shape_cast %583 : vector<16x128xf32> to vector<2x8x128xf32>
    %585 = vector.extract_strided_slice %584 {offsets = [0, 7, 0], sizes = [2, 1, 128], strides = [1, 1, 1]} : vector<2x8x128xf32> to vector<2x1x128xf32>
    %c0_251 = arith.constant 0 : index
    %c0_252 = arith.constant 0 : index
    %c0_253 = arith.constant 0 : index
    %586 = vector.load %arg11[%c0_251, %c0_252, %c0_253] : memref<2x1x128xf32, #tpu.memory_space<vmem>>, vector<2x1x128xf32>
    tpu.vector_store %arg11[%c0_251, %c0_252, %c0_253], %585 {strides = array<i32>} : memref<2x1x128xf32, #tpu.memory_space<vmem>>, vector<2x1x128xf32>,
    return
  }
  func.func @transform_0(%arg0: i32) -> (i32, i32, i32) {
    %c0_i32 = arith.constant 0 : i32
    %c0_i32_0 = arith.constant 0 : i32
    %c0_i32_1 = arith.constant 0 : i32
    return %arg0, %c0_i32, %c0_i32_0 : i32, i32, i32
  }
  func.func @transform_1(%arg0: i32) -> (i32, i32, i32) {
    %c0_i32 = arith.constant 0 : i32
    %c0_i32_0 = arith.constant 0 : i32
    %c0_i32_1 = arith.constant 0 : i32
    %c0_i32_2 = arith.constant 0 : i32
    return %c0_i32, %c0_i32_0, %c0_i32_1 : i32, i32, i32
  }
  func.func @transform_2(%arg0: i32) -> (i32, i32, i32) {
    %c0_i32 = arith.constant 0 : i32
    %c0_i32_0 = arith.constant 0 : i32
    %c0_i32_1 = arith.constant 0 : i32
    %c0_i32_2 = arith.constant 0 : i32
    return %c0_i32, %c0_i32_0, %c0_i32_1 : i32, i32, i32
  }
  func.func @transform_3(%arg0: i32) -> (i32, i32, i32) {
    %c0_i32 = arith.constant 0 : i32
    %c0_i32_0 = arith.constant 0 : i32
    %c0_i32_1 = arith.constant 0 : i32
    %c0_i32_2 = arith.constant 0 : i32
    return %c0_i32, %c0_i32_0, %c0_i32_1 : i32, i32, i32
  }
  func.func @transform_4(%arg0: i32) -> (i32, i32, i32) {
    %c0_i32 = arith.constant 0 : i32
    %c0_i32_0 = arith.constant 0 : i32
    %c0_i32_1 = arith.constant 0 : i32
    %c0_i32_2 = arith.constant 0 : i32
    return %c0_i32, %c0_i32_0, %c0_i32_1 : i32, i32, i32
  }
  func.func @transform_5(%arg0: i32) -> (i32, i32, i32, i32) {
    %c0_i32 = arith.constant 0 : i32
    %c0_i32_0 = arith.constant 0 : i32
    %c0_i32_1 = arith.constant 0 : i32
    %c0_i32_2 = arith.constant 0 : i32
    %c0_i32_3 = arith.constant 0 : i32
    return %c0_i32, %c0_i32_0, %c0_i32_1, %c0_i32_2 : i32, i32, i32, i32
  }
  func.func @transform_6(%arg0: i32) -> (i32, i32, i32) {
    %c0_i32 = arith.constant 0 : i32
    %c0_i32_0 = arith.constant 0 : i32
    %c0_i32_1 = arith.constant 0 : i32
    %c0_i32_2 = arith.constant 0 : i32
    return %c0_i32, %c0_i32_0, %c0_i32_1 : i32, i32, i32
  }
  func.func @transform_7(%arg0: i32) -> (i32, i32, i32) {
    %c0_i32 = arith.constant 0 : i32
    %c0_i32_0 = arith.constant 0 : i32
    %c0_i32_1 = arith.constant 0 : i32
    %c0_i32_2 = arith.constant 0 : i32
    return %c0_i32, %c0_i32_0, %c0_i32_1 : i32, i32, i32
  }
  func.func @transform_8(%arg0: i32) -> (i32, i32, i32) {
    %c0_i32 = arith.constant 0 : i32
    %c0_i32_0 = arith.constant 0 : i32
    %c0_i32_1 = arith.constant 0 : i32
    %c0_i32_2 = arith.constant 0 : i32
    return %c0_i32, %c0_i32_0, %c0_i32_1 : i32, i32, i32
  }
  func.func @transform_9(%arg0: i32) -> (i32, i32, i32) {
    %c0_i32 = arith.constant 0 : i32
    %c0_i32_0 = arith.constant 0 : i32
    %c0_i32_1 = arith.constant 0 : i32
    %c0_i32_2 = arith.constant 0 : i32
    return %c0_i32, %c0_i32_0, %c0_i32_1 : i32, i32, i32
  }
  func.func @transform_10(%arg0: i32) -> (i32, i32, i32) {
    %c0_i32 = arith.constant 0 : i32
    %c0_i32_0 = arith.constant 0 : i32
    %c0_i32_1 = arith.constant 0 : i32
    return %arg0, %c0_i32, %c0_i32_0 : i32, i32, i32
  }
}

</mosaic_0001>

<bundles_post_ra>
// kernel: tpu_custom_call.1
= control target key start
LH: loop header
LB: loop body
LE: loop exit
PB: predicated region body
PF: predicated region fallthrough
CT: control target
= control target key end

     0   :  { %s6418_s0 = inlined_call_operand.hbm [shape: f32[4,8,128], index: 0, kind: input, shape index: {}]   ;;  %s6419_s1 = inlined_call_operand.hbm [shape: bf16[2,128,384], index: 1, kind: input, shape index: {}]   ;;  %s6420_s2 = inlined_call_operand.hbm [shape: f32[2,1,384], index: 2, kind: input, shape index: {}]   ;;  %s6421_s3 = inlined_call_operand.hbm [shape: bf16[2,128,128], index: 3, kind: input, shape index: {}]   ;;  %s6422_s4 = inlined_call_operand.hbm [shape: f32[2,1,128], index: 4, kind: input, shape index: {}]   ;;  %s6423_s5 = inlined_call_operand.vmem [shape: f32[2,4,1,128], index: 5, kind: input, shape index: {}]   ;;  %s6424_s6 = inlined_call_operand.hbm [shape: bf16[2,128,256], index: 6, kind: input, shape index: {}]   ;;  %s6425_s7 = inlined_call_operand.vmem [shape: f32[2,1,256], index: 7, kind: input, shape index: {}]   ;;  %s6426_s8 = inlined_call_operand.hbm [shape: bf16[2,256,128], index: 8, kind: input, shape index: {}]   ;;  %s6427_s9 = inlined_call_operand.vmem [shape: f32[2,1,128], index: 9, kind: input, shape index: {}]   ;;  %s6428_s10 = inlined_call_operand.hbm [shape: f32[4,1,128], index: 10, kind: output, shape index: {}]  }
   0x1   :  { %6435 = sst [smem:[#allocation21_spill]] %s6419_s1 }
   0x2   :  { %6436 = sst [smem:[#allocation22_spill]] %s6420_s2 }
   0x3   :  { %6437 = sst [smem:[#allocation23_spill]] %s6421_s3 }
   0x4   :  { %6438 = sst [smem:[#allocation24_spill]] %s6422_s4 }
   0x5   :  { %15 = vsyncpa [#allocation4], 0 }
   0x6   :  { %17 = vsyncpa [#allocation4 + $0x1], 0 }
   0x7   :  { %18 = vsyncpa [#allocation7], 0 }
   0x8   :  { %19 = vsyncpa [#allocation10], 0 }
   0x9   :  { %20 = vsyncpa [#allocation13], 0 }
   0xa   :  { %21 = vsyncpa [#allocation5], 0 }
   0xb   :  { %23 = vsyncpa [#allocation5 + $0x1], 0  ;;  %s5622_s13 = smov 0   ;;  %s5624_s14 = smov 0  }
   0xc   :  { %s5626_s15 = smov 0   ;;  %s5628_s16 = smov 0  }
   0xd LB: > { %s5540_s17 = smov [#allocation6]   ;;  %s5643_s19 = sadd.s32 4294967295, %s5538_s16   ;;  %s5538_s16 = sphi %s5628_s16, %s6467_s16   ;;  %s5534_s15 = sphi %s5626_s15, %s6466_s15   ;;  %s5530_s14 = sphi %s5624_s14, %s6465_s14   ;;  %s5526_s13 = sphi %s5622_s13, %s6464_s13  }
   0xe   : > { %s287_s18 = sshll.u32 %s5540_s17, 4  ;;  %p4254_p0 = scmp.ge.s32.totalorder %s5538_s16, 1  ;;  %s288_s18 = int_to_ptr.vmem [resolvable:$true] %s287_s18 }
   0xf   : > { %p6431_p1 = scmp.eq.s32.totalorder %s5643_s19, 0  ;;  %p275_p2 = scmp.lt.s32.totalorder %s5538_s16, 3 }
  0x10   : > { %s5541_s21 = smov [#allocation9]   ;;  %s5542_s24 = smov [#allocation12]  }
  0x11   : > { %p5648_p3 = pnand %p4254_p0, %p275_p2  ;;  %s313_s22 = sshll.u32 %s5541_s21, 4  ;;  %s5661_s22 = int_to_ptr.vmem [resolvable:$true] %s313_s22 }
  0x12   : > { %s5663_s25 = sshll.u32 %s5542_s24, 4  ;;  %s5289_s27 = scalar_lea.vmem %s288_s18, 6144  ;;  %s343_s25 = int_to_ptr.vmem [resolvable:$true] %s5663_s25 }
  0x13   : > { %s6439_s20 = scalar_select %p5648_p3, 1, 0 }
  0x14   : > { %p4906_p5 = pneg %p5648_p3  ;;  %p5290_p8 = scmp.ne.s32.totalorder %s288_s18, %s5289_s27 }
  0x15   : > { %p5297_p11 = scmp.lt.s32.totalorder %s288_s18, %s288_s18  ;;  %p5298_p12 = scmp.lt.s32.totalorder %s5289_s27, %s5289_s27 }
  0x16   : > { %p5657_p6 = pnand %p4906_p5, %p6431_p1 }
  0x17   : > { %p5299_p13 = por %p5298_p12, %p5297_p11 }
  0x18   : > { %p5667_p7 = pneg %p5657_p6 }
  0x1a   : > { %p5292_p9 = pnand %p5290_p8, %p5667_p7 }
  0x1c   : > { %p5293_p10 = pneg %p5292_p9 }
  0x1e   : > { %p5300_p0 = pnand %p5299_p13, %p5293_p10 }
  0x20   : > { %5303 = shalt.err (!%p5300_p0)
}
  0x21   : > { %s5543_s28 = smov 192   ;;  %s5544_s29 = smov 12  }
  0x22   : > { %s6442_s1 = sld [smem:[#allocation21_spill]]  ;;  %s5315_s12 = scalar_lea.vmem %s5661_s22, 2048 }
  0x23   : > { %p5316_p2 = scmp.ne.s32.totalorder %s5661_s22, %s5315_s12  ;;  %p5323_p9 = scmp.lt.s32.totalorder %s5661_s22, %s5661_s22 }
  0x24   : > { %p5324_p10 = scmp.lt.s32.totalorder %s5315_s12, %s5315_s12 }
  0x25   : > { %p5318_p5 = pnand %p5316_p2, %p5667_p7 }
  0x26   : > { %p5325_p11 = por %p5324_p10, %p5323_p9 }
  0x27   : > { %p5319_p8 = pneg %p5318_p5 }
  0x28   : > { %4909 = dma.hbm_to_vmem [thread:$0]  (!%p5657_p6), %s6442_s1, 6144, %s288_s18, [#allocation7], %s5543_s28, %s5543_s28, %s5544_s29  }
  0x29   : > { %p5326_p12 = pnand %p5325_p11, %p5319_p8 }
  0x2b   : > { %5329 = shalt.err (!%p5326_p12)
}
  0x2c   : > { %s5545_s17 = smov 64   ;;  %s5546_s21 = smov 4  }
  0x2d   : > { %s6443_s3 = sld [smem:[#allocation23_spill]]  ;;  %s5341_s27 = scalar_lea.vmem %s343_s25, 4096 }
  0x2e   : > { %p5342_p13 = scmp.ne.s32.totalorder %s343_s25, %s5341_s27  ;;  %p5349_p5 = scmp.lt.s32.totalorder %s343_s25, %s343_s25 }
  0x2f   : > { %p5350_p8 = scmp.lt.s32.totalorder %s5341_s27, %s5341_s27 }
  0x30   : > { %p5344_p0 = pnand %p5342_p13, %p5667_p7 }
  0x31   : > { %p5351_p9 = por %p5350_p8, %p5349_p5 }
  0x32   : > { %p5345_p2 = pneg %p5344_p0 }
  0x33   : > { %4915 = dma.hbm_to_vmem [thread:$0]  (!%p5657_p6), %s6443_s3, 2048, %s5661_s22, [#allocation10], %s5545_s17, %s5545_s17, %s5546_s21  }
  0x34   : > { %p5352_p10 = pnand %p5351_p9, %p5345_p2 }
  0x36   : > { %5355 = shalt.err (!%p5352_p10)
}
  0x37   : > { %s6429_s28 = smov 128   ;;  %s6430_s29 = smov 8  }
  0x38   : > { %4921 = dma.hbm_to_vmem [thread:$0]  (!%p5657_p6), %s6424_s6, 4096, %s343_s25, [#allocation13], %s6429_s28, %s6429_s28, %s6430_s29  }
  0x39   : > { %s5549_s11 = smov [#allocation8]  }
  0x3a   : > { %s300_s12 = sshll.u32 %s5549_s11, 4  ;;  %s301_s12 = int_to_ptr.vmem [resolvable:$true] %s300_s12 }
  0x3b   : > { %s5367_s18 = scalar_lea.vmem %s301_s12, 96  ;;  %p5375_p0 = scmp.lt.s32.totalorder %s301_s12, %s301_s12 }
  0x3c   : > { %p5368_p11 = scmp.ne.s32.totalorder %s301_s12, %s5367_s18  ;;  %p5376_p2 = scmp.lt.s32.totalorder %s5367_s18, %s5367_s18 }
  0x3e   : > { %p5370_p12 = pnand %p5368_p11, %p5667_p7  ;;  %p5377_p5 = por %p5376_p2, %p5375_p0 }
  0x40   : > { %p5371_p13 = pneg %p5370_p12 }
  0x42   : > { %p5378_p8 = pnand %p5377_p5, %p5371_p13 }
  0x44   : > { %5381 = shalt.err (!%p5378_p8)
}
  0x45   : > { %s5550_s24 = smov 48   ;;  %s5551_s27 = smov 3  }
  0x46   : > { %s6444_s2 = sld [smem:[#allocation22_spill]]  ;;  %s5552_s30 = smov [#allocation11]  }
  0x47   : > { %s326_s11 = sshll.u32 %s5552_s30, 4  ;;  %s327_s11 = int_to_ptr.vmem [resolvable:$true] %s326_s11 }
  0x48   : > { %s5393_s28 = scalar_lea.vmem %s327_s11, 32  ;;  %p5401_p12 = scmp.lt.s32.totalorder %s327_s11, %s327_s11 }
  0x49   : > { %p5394_p9 = scmp.ne.s32.totalorder %s327_s11, %s5393_s28  ;;  %p5402_p13 = scmp.lt.s32.totalorder %s5393_s28, %s5393_s28 }
  0x4b   : > { %p5396_p10 = pnand %p5394_p9, %p5667_p7  ;;  %p5403_p0 = por %p5402_p13, %p5401_p12 }
  0x4c   : > { %4912 = dma.hbm_to_vmem [thread:$0]  (!%p5657_p6), %s6444_s2, 96, %s301_s12, [#allocation7], %s5550_s24, %s5550_s24, %s5551_s27  }
  0x4d   : > { %p5397_p11 = pneg %p5396_p10 }
  0x4f   : > { %p5404_p2 = pnand %p5403_p0, %p5397_p11 }
  0x51   : > { %5407 = shalt.err (!%p5404_p2)
}
  0x52   : > { %s5553_s18 = smov 16   ;;  %s5554_s29 = smov 1  }
  0x53   : > { %s6445_s4 = sld [smem:[#allocation24_spill]]  ;;  %s5555_s24 = smov [#allocation14]  }
  0x54   : > { %s358_s27 = sshll.u32 %s5555_s24, 4  ;;  %s359_s27 = int_to_ptr.vmem [resolvable:$true] %s358_s27 }
  0x55   : > { %s5419_s25 = scalar_lea.vmem %s359_s27, 4096  ;;  %p5427_p10 = scmp.lt.s32.totalorder %s359_s27, %s359_s27 }
  0x56   : > { %p5420_p5 = scmp.ne.s32.totalorder %s359_s27, %s5419_s25  ;;  %p5428_p11 = scmp.lt.s32.totalorder %s5419_s25, %s5419_s25 }
  0x58   : > { %p5422_p8 = pnand %p5420_p5, %p5667_p7  ;;  %p5429_p12 = por %p5428_p11, %p5427_p10 }
  0x59   : > { %4918 = dma.hbm_to_vmem [thread:$0]  (!%p5657_p6), %s6445_s4, 32, %s327_s11, [#allocation10], %s5553_s18, %s5553_s18, %s5554_s29  }
  0x5a   : > { %p5423_p9 = pneg %p5422_p8 }
  0x5c   : > { %p5430_p13 = pnand %p5429_p12, %p5423_p9 }
  0x5e   : > { %5433 = shalt.err (!%p5430_p13)
}
  0x5f   : > { %4924 = dma.hbm_to_vmem [thread:$0]  (!%p5657_p6), %s6426_s8, 4096, %s359_s27, [#allocation13], %s5545_s17, %s5545_s17, %s5546_s21  }
  0x60   : > { %s4253_s23 = sadd.s32 4294967294, %s5538_s16   ;;  %s5730_s26 = sadd.s32 1, %s5538_s16  }
  0x61   : > { %s33_s30 = ssub.s32 %s5538_s16, %s5730_s26  ;;  %s36_s11 = sadd.s32 1, %s5534_s15 }
  0x62   : > { %p34_p7 = scmp.eq.s32.totalorder %s33_s30, 0  ;;  %p43_p0 = scmp.ne.s32.totalorder %s5534_s15, %s5530_s14 }
  0x63   : > { %p44_p2 = scmp.eq.s32.totalorder %s5538_s16, 0  ;;  %p49_p5 = scmp.ne.s32.totalorder %s5530_s14, %s5526_s13 }
  0x64   : > { %s5741_s18 = scalar_select %p34_p7, %s5534_s15, %s36_s11  }
  0x65   : > { %p5743_p8 = por %p44_p2, %p43_p0  ;;  %p5749_p6 = por %p6431_p1, %p49_p5 }
  0x66   : > { %p262_p9 = scmp.eq.s32.totalorder %s5643_s19, 1  ;;  %p268_p10 = scmp.eq.s32.totalorder %s4253_s23, 1 }
  0x67   : > { %s6447_s17 = scalar_select %p5749_p6, 1, 0 }
  0x68   : > { %p4939_p11 = scmp.lt.s32.totalorder %s5538_s16, 2  ;;  %s375_s21 = sand.u32 1, %s5534_s15  }
  0x69   : > { %p5756_p12 = por %p262_p9, %p43_p0  ;;  %p5760_p13 = por %p268_p10, %p49_p5 }
  0x6a   : > { %s4262_s27 = sshll.u32 %s375_s21, 4  ;;  %s4460_s25 = sshll.u32 %s5538_s16, 8 }
  0x6b   : > { %s6448_s12 = scalar_select %p5756_p12, 1, 0 }
  0x6c   : > { %s6449_s24 = scalar_select %p5760_p13, 1, 0 }
  0x6d   : > { %s5768_s30 = scalar_lea.hbm %s6418_s0, %s4460_s25  ;;  %s379_s23 = scalar_lea.vmem [#allocation3], %s4262_s27 }
  0x6e   : > { %s386_s11 = sshll.u32 %s379_s23, 4  ;;  %p5774_p7 = pnand %p4939_p11, %p5743_p8  ;;  %s5770_s11 = int_to_ptr.vmem [resolvable:$true] %s386_s11 }
  0x6f   : > { %s5778_s2 = scalar_lea.sflag [#allocation4], %s375_s21  ;;  %s5434_s3 = scalar_lea.hbm %s5768_s30, 256 }
  0x70   : > { %p5435_p0 = scmp.ne.s32.totalorder %s5768_s30, %s5434_s3  ;;  %p5436_p2 = pneg %p5774_p7 }
  0x71   : > { %s5439_s27 = scalar_lea.hbm %s6418_s0, 512  ;;  %p5440_p8 = scmp.lt.s32.totalorder %s5768_s30, %s6418_s0 }
  0x72   : > { %p5437_p5 = pnand %p5436_p2, %p5435_p0  ;;  %p5441_p10 = scmp.lt.s32.totalorder %s5439_s27, %s5434_s3 }
  0x74   : > { %p5438_p9 = pneg %p5437_p5  ;;  %p5442_p11 = por %p5441_p10, %p5440_p8 }
  0x76   : > { %p5443_p4 = pnand %p5442_p11, %p5438_p9 }
  0x78   : > { %5446 = shalt.err (!%p5443_p4)
}
  0x79   : > { %s5447_s22 = scalar_lea.vmem %s5770_s11, 256  ;;  %s5556_s21 = smov [#allocation3]  }
  0x7a   : > { %p5448_p1 = scmp.ne.s32.totalorder %s5770_s11, %s5447_s22  ;;  %s5452_s4 = sshll.u32 %s5556_s21, 4  ;;  %s5453_s4 = int_to_ptr.vmem [resolvable:$false] %s5452_s4 }
  0x7b   : > { %s5454_s25 = scalar_lea.vmem %s5453_s4, 512  ;;  %p5455_p5 = scmp.lt.s32.totalorder %s5770_s11, %s5453_s4 }
  0x7c   : > { %p5450_p13 = pnand %p5448_p1, %p5436_p2  ;;  %p5456_p12 = scmp.lt.s32.totalorder %s5454_s25, %s5447_s22 }
  0x7e   : > { %p5451_p0 = pneg %p5450_p13  ;;  %p5457_p6 = por %p5456_p12, %p5455_p5 }
  0x80   : > { %p5458_p3 = pnand %p5457_p6, %p5451_p0 }
  0x82   : > { %5461 = shalt.err (!%p5458_p3)
}
  0x83   : > { %s6451_s3 = smov 8   ;;  %s6452_s28 = smov 128  }
  0x84   : > { %4928 = dma.hbm_to_vmem [thread:$0]  (!%p5774_p7), %s5768_s30, 256, %s5770_s11, %s5778_s2, %s6452_s28, %s6452_s28, %s6451_s3  }
  0x85   : > { %p6453_p1 = scmp.ne.s32.totalorder %s6439_s20, 0 }
  0x86   : > { %s5805_s27 = sand.u32 (!%p6453_p1), 1, %s5530_s14   ;;  %p6454_p3 = scmp.ne.s32.totalorder (!%p6453_p1), %s6447_s17, 0 }
  0x87   : > { %398 = sbr.rel (%p6453_p1) target bundleno = 5982 (0x175e), region = 60  ;;  %s4266_s4 = sshll.u32 (!%p6453_p1), %s5805_s27, 4 }
  0x88   : > { %s401_s29 = scalar_lea.sflag (!%p6453_p1), [#allocation4], %s5805_s27  ;;  %s5809_s23 = scalar_lea.vmem (!%p6453_p1), [#allocation3], %s4266_s4 }
  0x8c   : > { %5505 = dma.done.wait (%p6454_p3), %s401_s29, 256  }
  0x8d   : > { %5507 = vsyncadd (%p6454_p3), %s401_s29, 4294967040  ;;  %p6455_p4 = scmp.eq.s32.totalorder %s5643_s19, 0 }
  0x8f   : > { %5509 = dma.done.wait (%p6455_p4), [#allocation7], 6240   ;;  %p6456_p6 = pmov %p6455_p4 }
  0x90   : > { %p6457_p12 = pmov %p6455_p4 }
  0x91   : > { %5511 = vsyncadd (%p6456_p6), [#allocation7], 4294961056 }
  0x92   : > { %5513 = dma.done.wait (%p6457_p12), [#allocation10], 2080   ;;  %p6458_p13 = pmov %p6455_p4 }
  0x93   : > { %p6459_p7 = pmov %p6455_p4 }
  0x94   : > { %5515 = vsyncadd (%p6458_p13), [#allocation10], 4294965216 }
  0x95   : > { %5517 = dma.done.wait (%p6459_p7), [#allocation13], 8192   ;;  %p6460_p2 = pmov %p6455_p4 }
  0x96   : > { %v5557_v0 = vmov 0   ;;  %v5558_v1 = vmov 0.0   ;;  %v5004_v2 = vld [vmem:[#allocation6 + $0xac] ss:$12 sps:$4 sm:$0xff]   ;;  %v5006_v3 = vld [vmem:[#allocation6 + $0xa8] ss:$12 sps:$4 sm:$0xff]   ;;  %v505_v29 = vlaneseq }
  0x97   : > { %5519 = vsyncadd (%p6460_p2), [#allocation13], 4294959104  ;;  %680 = vmatprep.mubr.bf16.mxu0 %v5557_v0  ;;  %4606 = vmatprep.subr.bf16.mxu1 %v5558_v1  ;;  %v5007_v4 = vld [vmem:[#allocation6 + $0x94] ss:$12 sps:$4 sm:$0xff]   ;;  %v5009_v5 = vld [vmem:[#allocation6 + $0x90] ss:$12 sps:$4 sm:$0xff]  }
  0x98   : > { %648 = vmatprep.subr.bf16.mxu0 %v5004_v2  ;;  %v5010_v6 = vld [vmem:[#allocation6 + $0x7c] ss:$12 sps:$4 sm:$0xff]   ;;  %v5012_v7 = vld [vmem:[#allocation6 + $0x78] ss:$12 sps:$4 sm:$0xff]   ;;  %v5015_v9 = vld [vmem:[#allocation6 + $0x60] ss:$12 sps:$4 sm:$0xff]  }
  0x99   : > { %649 = vmatpush1.bf16.msra.mxu0 %v5006_v3  ;;  %v5013_v8 = vld [vmem:[#allocation6 + $0x64] ss:$12 sps:$4 sm:$0xff]   ;;  %v5016_v10 = vld [vmem:[#allocation6 + $0x4c] ss:$12 sps:$4 sm:$0xff]   ;;  %v5018_v13 = vld [vmem:[#allocation6 + $0x48] ss:$12 sps:$4 sm:$0xff]  }
  0x9a   : > { %650 = vmatprep.subr.bf16.mxu0 %v5007_v4  ;;  %v5028_v11 = vld [vmem:[#allocation6 + $0xb0] ss:$12 sps:$4 sm:$0xff]   ;;  %v5029_v12 = vld [vmem:[#allocation6 + $0x98] ss:$12 sps:$4 sm:$0xff]   ;;  %v5019_v14 = vld [vmem:[#allocation6 + $0x34] ss:$12 sps:$4 sm:$0xff]  }
  0x9b   : > { %4607 = vmatpush3.bf16.msra.mxu1 %v5028_v11  ;;  %v5030_v15 = vld [vmem:[#allocation6 + $0x80] ss:$12 sps:$4 sm:$0xff]   ;;  %v5021_v16 = vld [vmem:[#allocation6 + $0x30] ss:$12 sps:$4 sm:$0xff]   ;;  %v5031_v18 = vld [vmem:[#allocation6 + $0x68] ss:$12 sps:$4 sm:$0xff]  }
  0x9c   : > { %4608 = vmatprep.subr.bf16.mxu1 %v5558_v1  ;;  %v5022_v17 = vld [vmem:[#allocation6 + $0x1c] ss:$12 sps:$4 sm:$0xff]   ;;  %v5024_v19 = vld [vmem:[#allocation6 + $0x18] ss:$12 sps:$4 sm:$0xff]   ;;  %v5027_v22 = vld [vmem:[#allocation6] ss:$12 sps:$4 sm:$0xff]  }
  0x9d   : > { %651 = vmatpush1.bf16.msra.mxu0 %v5009_v5  ;;  %v5025_v20 = vld [vmem:[#allocation6 + $0x4] ss:$12 sps:$4 sm:$0xff]   ;;  %v469_v24 = vld [vmem:[%s5809_s23 + $0x8] sm:$0xff]  ;;  %vm5559_vm0 = vmmov 0   ;;  %v5846_v30 = vshrl.u32 %v505_v29, 7  ;;  %vm735_vm1 = vcmask 261120  }
  0x9e   : > { %652 = vmatprep.subr.bf16.mxu0 %v5010_v6  ;;  %v5032_v21 = vld [vmem:[#allocation6 + $0x50] ss:$12 sps:$4 sm:$0xff]   ;;  %v5033_v25 = vld [vmem:[#allocation6 + $0x38] ss:$12 sps:$4 sm:$0xff]   ;;  %v5034_v27 = vld [vmem:[#allocation6 + $0x20] ss:$12 sps:$4 sm:$0xff]   ;;  %4622 = vmatprep.mubr.msk.bf16.mxu1 %vm5559_vm0, %v5558_v1 }
  0x9f   : > { %4609 = vmatpush3.bf16.msra.mxu1 %v5029_v12  ;;  %v468_v23 = vld [vmem:[%s5809_s23] sm:$0xff]  ;;  %v5849_v31 = vsub.s32 1, %v5846_v30  ;;  %v5852_v32 = vsub.s32 0, %v5846_v30  ;;  %s5560_s1 = smov 96   ;;  %s5561_s2 = smov 64   ;;  %v515_v49 = vsub.s32 2, %v5846_v30 }
  0xa0   : > { %4610 = vmatprep.subr.bf16.mxu1 %v5558_v1  ;;  %v470_v26 = vpack.c.bf16 %v469_v24, %v468_v23  ;;  %v5035_v28 = vld [vmem:[#allocation6 + $0x8] ss:$12 sps:$4 sm:$0xff]   ;;  %v503_v33 = vld [vmem:[#allocation8] sm:$0x7]  ;;  %s5562_s20 = smov 32   ;;  %vm798_vm2 = vcmask 1043456  }
  0xa1   : > { %653 = vmatpush1.bf16.msra.mxu0 %v5012_v7  ;;  %v512_v34 = vrot.slane %v503_v33, %v5849_v31  ;;  %v508_v36 = vrot.slane %v503_v33, %v5852_v32  ;;  %v516_v50 = vrot.slane %v503_v33, %v515_v49  ;;  %vm782_vm3 = vcmask 64512   ;;  %s4273_s4 = sshll.u32 %s5805_s27, 1  ;;  %s4461_s17 = sshll.u32 %s5643_s19, 5 }
  0xa2   : > { %654 = vmatprep.subr.bf16.mxu0 %v5013_v8  ;;  %vm960_vm4 = vcmask 523520   ;;  %vm1076_vm5 = vcmask 785920   ;;  %vm1192_vm6 = vcmask 1048320   ;;  %s6373_s11 = scalar_lea.hbm %s6428_s10, %s4461_s17  ;;  %s4110_s22 = scalar_lea.sflag [#allocation5], %s5805_s27 }
  0xa3   : > { %4611 = vmatpush3.bf16.msra.mxu1 %v5030_v15  ;;  %p6461_p8 = scmp.ne.s32.totalorder %s6448_s12, 0  ;;  %s5564_s19 = smov [#allocation15]  }
  0xa4   : > { %4612 = vmatprep.subr.bf16.mxu1 %v5558_v1  ;;  %s5466_s25 = sshll.u32 %s5564_s19, 4  ;;  %s5467_s25 = int_to_ptr.vmem [resolvable:$false] %s5466_s25 }
  0xa5   : > { %655 = vmatpush1.bf16.msra.mxu0 %v5015_v9  ;;  %s5468_s3 = scalar_lea.vmem %s5467_s25, 64 }
  0xa6   : > { %656 = vmatprep.subr.bf16.mxu0 %v5016_v10 }
  0xa7   : > { %4613 = vmatpush3.bf16.msra.mxu1 %v5031_v18 }
  0xa8   : > { %4614 = vmatprep.subr.bf16.mxu1 %v5558_v1 }
  0xa9   : > { %657 = vmatpush1.bf16.msra.mxu0 %v5018_v13 }
  0xaa   : > { %658 = vmatprep.subr.bf16.mxu0 %v5019_v14 }
  0xab   : > { %4615 = vmatpush3.bf16.msra.mxu1 %v5032_v21 }
  0xac   : > { %4616 = vmatprep.subr.bf16.mxu1 %v5558_v1 }
  0xad   : > { %659 = vmatpush1.bf16.msra.mxu0 %v5021_v16 }
  0xae   : > { %660 = vmatprep.subr.bf16.mxu0 %v5022_v17 }
  0xaf   : > { %4617 = vmatpush3.bf16.msra.mxu1 %v5033_v25 }
  0xb0   : > { %4618 = vmatprep.subr.bf16.mxu1 %v5558_v1 }
  0xb1   : > { %661 = vmatpush1.bf16.msra.mxu0 %v5024_v19 }
  0xb2   : > { %662 = vmatprep.subr.bf16.mxu0 %v5025_v20 }
  0xb3   : > { %4619 = vmatpush3.bf16.msra.mxu1 %v5034_v27 }
  0xb4   : > { %4620 = vmatprep.subr.bf16.mxu1 %v5558_v1 }
  0xb5   : > { %663 = vmatpush1.bf16.msra.mxu0 %v5027_v22 }
  0xb6   : > { %4650 = vmatprep.subr.bf16.mxu0 %v5558_v1 }
  0xb7   : > { %4621 = vmatpush3.bf16.msra.mxu1 %v5035_v28 }
  0xb8   : > { %681 = vmatmul.mubr.bf16.vlgmr.msra.gmra.mxu0 %v470_v26  ;;  %4626 = vmatprep.subr.bf16.mxu1 %v5558_v1 }
  0xb9   : > { %4652 = vmatprep.mubr.msk.bf16.mxu0 %vm5559_vm0, %v5558_v1 }
  0xba   : > { %4623 = vmatmul.mubr.bf16.vlgmr.msra.gmra.mxu1 %v470_v26 }
  0xbb   : > { %4628 = vmatprep.mubr.msk.bf16.mxu1 %vm5559_vm0, %v5558_v1 }
 0x178   : > { %v682_v35 = vpop.f32.mrf.mxu0 }
 0x179   : > { %v683_v39 = vadd.f32 %v682_v35, %v508_v36 }
 0x17a   : > { %v684_v37 = vpop.f32.mrf.mxu0  ;;  %v725_v51 = vpop.f32.mrf.mxu1 }
 0x17b   : > { %v685_v38 = vadd.f32 %v684_v37, %v512_v34  ;;  %v732_v42 = vpack.c.bf16 %v683_v39, %v683_v39  ;;  %v726_v52 = vadd.f32 %v725_v51, %v516_v50 }
 0x17c   : > { %v686_v43 = vpop.f32.mrf.mxu0  ;;  %v4624_v53 = vpop.f32.mrf.mxu1 }
 0x17d   : > { %v733_v40 = vpack.c.bf16 %v685_v38, %v685_v38  ;;  %v687_v46 = vadd.f32 %v686_v43, %v508_v36  ;;  %v5876_v54 = vpack.c.bf16 %v726_v52, %v726_v52 }
 0x17e   : > { %v688_v44 = vpop.f32.mrf.mxu0  ;;  %v728_v55 = vpop.f32.mrf.mxu1 }
 0x17f   : > { %847 = vrot.lane.b32.xlu1 %v733_v40, %s5560_s1  ;;  %v740_v41 = vsel %vm735_vm1, %v733_v40, 0  ;;  %v689_v45 = vadd.f32 %v688_v44, %v512_v34  ;;  %v5867_v48 = vpack.c.bf16 %v687_v46, %v687_v46  ;;  %v5878_v56 = vadd.f32 %v728_v55, %v516_v50 }
 0x180   : > { %4627 = vmatpush3.bf16.xpose.msra.mxu1 %v740_v41  ;;  %v800_v57 = vsel %vm798_vm2, %v5876_v54, 0  ;;  %v4625_v58 = vpop.f32.mrf.mxu1 }
 0x181   : > { %4632 = vmatprep.subr.bf16.mxu1 %v5558_v1  ;;  %v1195_v47 = vpack.c.bf16 %v689_v45, %v689_v45 }
 0x183   : > { %844 = vrot.lane.b32.xlu1 %v732_v42, %s5560_s1  ;;  %v1201_v20 = vsel %vm735_vm1, %v1195_v47, 0 }
 0x187   : > { %962 = vrot.lane.b32.xlu1 %v732_v42, %s5561_s2  ;;  %4629 = vmatmul.mubr.msk.bf16.vlgmr.msra.gmra.mxu1 %vm735_vm1, %v732_v42 }
 0x188   : > { %4634 = vmatprep.mubr.msk.bf16.mxu1 %vm5559_vm0, %v5558_v1  ;;  %4633 = vmatpush3.bf16.msra.mxu1 %v800_v57 }
 0x189   : > { %4638 = vmatprep.subr.bf16.mxu1 %v5558_v1 }
 0x18b   : > { %1080 = vrot.lane.b32.xlu1 %v733_v40, %s5562_s20 }
 0x18f   : > { %1078 = vrot.lane.b32.xlu1 %v732_v42, %s5562_s20 }
 0x193   : > { %1307 = vrot.lane.b32.xlu1 %v1195_v47, %s5560_s1 }
 0x197   : > { %1304 = vrot.lane.b32.xlu1 %v5867_v48, %s5560_s1 }
 0x19b   : > { %1423 = vrot.lane.b32.xlu1 %v1195_v47, %s5561_s2 }
 0x19f   : > { %1538 = vrot.lane.b32.xlu1 %v1195_v47, %s5562_s20 }
 0x1f1   : > { %v848_v7 = vpop.permute.xlu1 %847 }
 0x1f2   : > { %v853_v19 = vsel %vm735_vm1, %v848_v7, 0 }
 0x1f5   : > { %v845_v8 = vpop.permute.xlu1 %844 }
 0x1f9   : > { %v963_v10 = vpop.permute.xlu1 %962 }
 0x1fd   : > { %v1081_v13 = vpop.permute.xlu1 %1080 }
 0x1fe   : > { %v1086_v14 = vsel %vm735_vm1, %v1081_v13, 0 }
 0x201   : > { %v1079_v17 = vpop.permute.xlu1 %1078 }
 0x205   : > { %v1308_v21 = vpop.permute.xlu1 %1307 }
 0x206   : > { %v1313_v23 = vsel %vm735_vm1, %v1308_v21, 0 }
 0x209   : > { %v1305_v22 = vpop.permute.xlu1 %1304 }
 0x20d   : > { %v1424_v24 = vpop.permute.xlu1 %1423 }
 0x20e   : > { %v1429_v25 = vsel %vm735_vm1, %v1424_v24, 0 }
 0x211   : > { %v1539_v26 = vpop.permute.xlu1 %1538 }
 0x212   : > { %v1544_v28 = vsel %vm735_vm1, %v1539_v26, 0 }
 0x247   : > { %v776_v59 = vpop.f32.mrf.mxu1 }
 0x248   : > { %v783_v60 = vsel %vm782_vm3, %v776_v59, -inf }
 0x249   : > { %784 = vmax.xlane.f32.xlu0 %v783_v60  ;;  %v4630_v61 = vpop.f32.mrf.mxu1 }
 0x24b   : > { %v779_v62 = vpop.f32.mrf.mxu1 }
 0x24d   : > { %v4631_v63 = vpop.f32.mrf.mxu1 }
 0x2d2   : > { %v785_v2 = vpop.xlane.xlu0 %784 }
 0x2d3   : > { %v786_v3 = vsub.f32 %v776_v59, %v785_v2 }
 0x2d5   : > { %v787_v4 = vmul.f32 1.442695, %v786_v3 }
 0x2d7   : > { %5164 = vpow2.f32 %v787_v4 }
 0x2e4   : > { %v5165_v5 = vpop.eup %5164 }
 0x2e5   : > { %v789_v6 = vsel %vm782_vm3, %v5165_v5, 0.0 }
 0x2e6   : > { %790 = vadd.xlane.f32.xlu0 %v789_v6 }
 0x2fc   : > { %964 = vrot.lane.b32.xlu0 %v733_v40, %s5561_s2 }
 0x300   : > { %1421 = vrot.lane.b32.xlu0 %v5867_v48, %s5561_s2 }
 0x304   : > { %1536 = vrot.lane.b32.xlu0 %v5867_v48, %s5562_s20 }
 0x36f   : > { %v791_v9 = vpop.xlane.xlu0 %790 }
 0x370   : > { %5166 = vrcp.f32 %v791_v9 }
 0x373   : > { %v965_v11 = vpop.permute.xlu0 %964 }
 0x374   : > { %v970_v12 = vsel %vm735_vm1, %v965_v11, 0 }
 0x375   : > { %4651 = vmatpush3.bf16.xpose.msra.mxu0 %v970_v12 }
 0x376   : > { %4662 = vmatprep.subr.bf16.mxu0 %v5558_v1 }
 0x377   : > { %v1422_v27 = vpop.permute.xlu0 %1421 }
 0x37b   : > { %v1537_v29 = vpop.permute.xlu0 %1536 }
 0x37c   : > { %4653 = vmatmul.mubr.msk.bf16.vlgmr.msra.gmra.mxu0 %vm735_vm1, %v963_v10 }
 0x37d   : > { %v5167_v15 = vpop.eup %5166  ;;  %4663 = vmatpush3.bf16.xpose.msra.mxu0 %v1086_v14  ;;  %4664 = vmatprep.mubr.msk.bf16.mxu0 %vm5559_vm0, %v5558_v1 }
 0x37e   : > { %v793_v16 = vmul.f32 %v5167_v15, %v5165_v5  ;;  %4674 = vmatprep.subr.bf16.mxu0 %v5558_v1 }
 0x380   : > { %v794_v18 = vpack.c.bf16 %v793_v16, %v793_v16 }
 0x382   : > { %4635 = vmatmul.mubr.msk.bf16.vlgmr.msra.gmra.mxu1 %vm782_vm3, %v794_v18 }
 0x383   : > { %4639 = vmatpush3.bf16.xpose.msra.mxu1 %v853_v19  ;;  %4640 = vmatprep.mubr.msk.bf16.mxu1 %vm5559_vm0, %v5558_v1 }
 0x384   : > { %4665 = vmatmul.mubr.msk.bf16.vlgmr.msra.gmra.mxu0 %vm735_vm1, %v1079_v17  ;;  %4644 = vmatprep.subr.bf16.mxu1 %v5558_v1 }
 0x385   : > { %4675 = vmatpush3.bf16.xpose.msra.mxu0 %v1201_v20  ;;  %4676 = vmatprep.mubr.msk.bf16.mxu0 %vm5559_vm0, %v5558_v1 }
 0x386   : > { %4686 = vmatprep.subr.bf16.mxu0 %v5558_v1 }
 0x38a   : > { %4641 = vmatmul.mubr.msk.bf16.vlgmr.msra.gmra.mxu1 %vm735_vm1, %v845_v8 }
 0x38b   : > { %4646 = vmatprep.mubr.msk.bf16.mxu1 %vm5559_vm0, %v5558_v1 }
 0x38c   : > { %4677 = vmatmul.mubr.msk.bf16.vlgmr.msra.gmra.mxu0 %vm735_vm1, %v5867_v48 }
 0x38d   : > { %4687 = vmatpush3.bf16.xpose.msra.mxu0 %v1313_v23  ;;  %4688 = vmatprep.mubr.msk.bf16.mxu0 %vm5559_vm0, %v5558_v1 }
 0x38e   : > { %4698 = vmatprep.subr.bf16.mxu0 %v5558_v1 }
 0x394   : > { %4689 = vmatmul.mubr.msk.bf16.vlgmr.msra.gmra.mxu0 %vm735_vm1, %v1305_v22 }
 0x395   : > { %4699 = vmatpush3.bf16.xpose.msra.mxu0 %v1429_v25  ;;  %4700 = vmatprep.mubr.msk.bf16.mxu0 %vm5559_vm0, %v5558_v1 }
 0x396   : > { %4710 = vmatprep.subr.bf16.mxu0 %v5558_v1 }
 0x39c   : > { %4701 = vmatmul.mubr.msk.bf16.vlgmr.msra.gmra.mxu0 %vm735_vm1, %v1422_v27 }
 0x39d   : > { %4711 = vmatpush3.bf16.xpose.msra.mxu0 %v1544_v28  ;;  %4712 = vmatprep.mubr.msk.bf16.mxu0 %vm5559_vm0, %v5558_v1 }
 0x39e   : > { %4722 = vmatprep.subr.bf16.mxu0 %v5558_v1 }
 0x3a4   : > { %4713 = vmatmul.mubr.msk.bf16.vlgmr.msra.gmra.mxu0 %vm735_vm1, %v1537_v29 }
 0x3a5   : > { %4738 = vmatprep.mubr.msk.bf16.mxu0 %vm5559_vm0, %v5558_v1 }
 0x43c   : > { %v1006_v33 = vpop.f32.mrf.mxu0 }
 0x43d   : > { %v1012_v34 = vsel %vm782_vm3, %v1006_v33, -inf }
 0x43e   : > { %1013 = vmax.xlane.f32.xlu0 %v1012_v34  ;;  %v4654_v35 = vpop.f32.mrf.mxu0 }
 0x440   : > { %v1009_v36 = vpop.f32.mrf.mxu0 }
 0x442   : > { %v836_v37 = vpop.f32.mrf.mxu1  ;;  %v4655_v38 = vpop.f32.mrf.mxu0 }
 0x443   : > { %842 = vst.msk [vmem:[#allocation2] sm:$0xff] %vm735_vm1, %v836_v37 }
 0x444   : > { %v4636_v39 = vpop.f32.mrf.mxu1  ;;  %v1122_v40 = vpop.f32.mrf.mxu0 }
 0x445   : > { %v1128_v41 = vsel %vm782_vm3, %v1122_v40, -inf }
 0x446   : > { %1129 = vmax.xlane.f32.xlu0 %v1128_v41  ;;  %v839_v42 = vpop.f32.mrf.mxu1  ;;  %v4666_v43 = vpop.f32.mrf.mxu0 }
 0x448   : > { %v4637_v44 = vpop.f32.mrf.mxu1  ;;  %v1125_v45 = vpop.f32.mrf.mxu0 }
 0x44a   : > { %v889_v46 = vpop.f32.mrf.mxu1  ;;  %v4667_v47 = vpop.f32.mrf.mxu0 }
 0x44b   : > { %v895_v48 = vsel %vm782_vm3, %v889_v46, -inf }
 0x44c   : > { %v1237_v50 = vpop.f32.mrf.mxu0  ;;  %896 = vmax.xlane.f32.xlu1 %v895_v48  ;;  %v4642_v51 = vpop.f32.mrf.mxu1 }
 0x44d   : > { %v1243_v55 = vsel %vm782_vm3, %v1237_v50, -inf }
 0x44e   : > { %v892_v52 = vpop.f32.mrf.mxu1  ;;  %v4678_v53 = vpop.f32.mrf.mxu0 }
 0x44f   : > { %v1196_v52 = vpack.c.bf16 %v5878_v56, %v5878_v56 }
 0x450   : > { %v1240_v57 = vpop.f32.mrf.mxu0  ;;  %1244 = vmax.xlane.f32.xlu1 %v1243_v55  ;;  %v4643_v58 = vpop.f32.mrf.mxu1 }
 0x452   : > { %v4679_v59 = vpop.f32.mrf.mxu0 }
 0x454   : > { %v1349_v60 = vpop.f32.mrf.mxu0 }
 0x455   : > { %v1355_v61 = vsel %vm782_vm3, %v1349_v60, -inf }
 0x456   : > { %1356 = vmax.xlane.f32.xlu0 %v1355_v61  ;;  %v4690_v62 = vpop.f32.mrf.mxu0 }
 0x458   : > { %v1352_v63 = vpop.f32.mrf.mxu0 }
 0x45a   : > { %v4691_v2 = vpop.f32.mrf.mxu0 }
 0x45c   : > { %v1465_v3 = vpop.f32.mrf.mxu0 }
 0x45d   : > { %v1471_v4 = vsel %vm782_vm3, %v1465_v3, -inf }
 0x45e   : > { %v4702_v5 = vpop.f32.mrf.mxu0  ;;  %1472 = vmax.xlane.f32.xlu1 %v1471_v4 }
 0x460   : > { %v1468_v6 = vpop.f32.mrf.mxu0 }
 0x462   : > { %v4703_v7 = vpop.f32.mrf.mxu0 }
 0x464   : > { %v1580_v8 = vpop.f32.mrf.mxu0 }
 0x465   : > { %v1586_v9 = vsel %vm782_vm3, %v1580_v8, -inf }
 0x466   : > { %1587 = vmax.xlane.f32.xlu0 %v1586_v9  ;;  %v4714_v10 = vpop.f32.mrf.mxu0 }
 0x468   : > { %v1583_v11 = vpop.f32.mrf.mxu0 }
 0x46a   : > { %v4715_v12 = vpop.f32.mrf.mxu0 }
 0x46b   : > { %v1259_v12 = vsel %vm798_vm2, %v1196_v52, 0 }
 0x4c7   : > { %v1014_v13 = vpop.xlane.xlu0 %1013 }
 0x4c8   : > { %v1015_v14 = vsub.f32 %v1006_v33, %v1014_v13 }
 0x4ca   : > { %v1016_v15 = vmul.f32 1.442695, %v1015_v14 }
 0x4cc   : > { %5168 = vpow2.f32 %v1016_v15 }
 0x4cf   : > { %v1130_v16 = vpop.xlane.xlu0 %1129 }
 0x4d0   : > { %v1131_v17 = vsub.f32 %v1122_v40, %v1130_v16 }
 0x4d2   : > { %v1132_v18 = vmul.f32 1.442695, %v1131_v17 }
 0x4d4   : > { %5170 = vpow2.f32 %v1132_v18 }
 0x4d5   : > { %v897_v19 = vpop.xlane.xlu1 %896 }
 0x4d6   : > { %v898_v20 = vsub.f32 %v889_v46, %v897_v19 }
 0x4d8   : > { %v899_v21 = vmul.f32 1.442695, %v898_v20 }
 0x4d9   : > { %v5937_v22 = vpop.eup %5168  ;;  %v1245_v23 = vpop.xlane.xlu1 %1244 }
 0x4da   : > { %5172 = vpow2.f32 %v899_v21  ;;  %v1246_v24 = vsub.f32 %v1237_v50, %v1245_v23  ;;  %v1018_v25 = vsel %vm782_vm3, %v5937_v22, 0.0 }
 0x4db   : > { %1019 = vadd.xlane.f32.xlu0 %v1018_v25 }
 0x4dc   : > { %v1247_v26 = vmul.f32 1.442695, %v1246_v24 }
 0x4de   : > { %5174 = vpow2.f32 %v1247_v26 }
 0x4df   : > { %v1357_v27 = vpop.xlane.xlu0 %1356 }
 0x4e0   : > { %v1358_v28 = vsub.f32 %v1349_v60, %v1357_v27 }
 0x4e1   : > { %v5941_v29 = vpop.eup %5170 }
 0x4e2   : > { %v1359_v33 = vmul.f32 1.442695, %v1358_v28  ;;  %v1134_v34 = vsel %vm782_vm3, %v5941_v29, 0.0 }
 0x4e3   : > { %1135 = vadd.xlane.f32.xlu1 %v1134_v34 }
 0x4e4   : > { %5176 = vpow2.f32 %v1359_v33 }
 0x4e7   : > { %v5173_v35 = vpop.eup %5172  ;;  %v1473_v41 = vpop.xlane.xlu1 %1472 }
 0x4e8   : > { %v901_v36 = vsel %vm782_vm3, %v5173_v35, 0.0  ;;  %v1474_v42 = vsub.f32 %v1465_v3, %v1473_v41 }
 0x4e9   : > { %902 = vadd.xlane.f32.xlu1 %v901_v36 }
 0x4ea   : > { %v1475_v43 = vmul.f32 1.442695, %v1474_v42 }
 0x4eb   : > { %v5946_v37 = vpop.eup %5174 }
 0x4ec   : > { %v1249_v38 = vsel %vm782_vm3, %v5946_v37, 0.0  ;;  %5178 = vpow2.f32 %v1475_v43 }
 0x4ed   : > { %1250 = vadd.xlane.f32.xlu0 %v1249_v38 }
 0x4ef   : > { %v1588_v44 = vpop.xlane.xlu0 %1587 }
 0x4f0   : > { %v1589_v45 = vsub.f32 %v1580_v8, %v1588_v44 }
 0x4f1   : > { %v5950_v39 = vpop.eup %5176 }
 0x4f2   : > { %v1361_v40 = vsel %vm782_vm3, %v5950_v39, 0.0  ;;  %v1590_v46 = vmul.f32 1.442695, %v1589_v45 }
 0x4f3   : > { %1362 = vadd.xlane.f32.xlu0 %v1361_v40 }
 0x4f4   : > { %5180 = vpow2.f32 %v1590_v46 }
 0x4f9   : > { %v5960_v47 = vpop.eup %5178 }
 0x4fa   : > { %908 = vrot.lane.b32.xlu1 %v5876_v54, %s5560_s1  ;;  %v1477_v48 = vsel %vm782_vm3, %v5960_v47, 0.0 }
 0x501   : > { %v5964_v50 = vpop.eup %5180 }
 0x502   : > { %v1592_v51 = vsel %vm782_vm3, %v5964_v50, 0.0 }
 0x509   : > { %1024 = vrot.lane.b32.xlu0 %v5876_v54, %s5561_s2 }
 0x50d   : > { %1140 = vrot.lane.b32.xlu0 %v5876_v54, %s5562_s20 }
 0x51e   : > { %1478 = vadd.xlane.f32.xlu1 %v1477_v48 }
 0x52c   : > { %1593 = vadd.xlane.f32.xlu0 %v1592_v51 }
 0x52f   : > { %1368 = vrot.lane.b32.xlu1 %v1196_v52, %s5560_s1 }
 0x533   : > { %1598 = vrot.lane.b32.xlu1 %v1196_v52, %s5562_s20 }
 0x542   : > { %1483 = vrot.lane.b32.xlu0 %v1196_v52, %s5561_s2  ;;  %v5036_v52 = vld [vmem:[#allocation9 + $0x38] sm:$0xff]  }
 0x543   : > { %4723 = vmatpush3.bf16.msra.mxu0 %v5036_v52  ;;  %v5061_v52 = vld [vmem:[#allocation12 + $0x24] ss:$8 sps:$4 sm:$0xff]  }
 0x544   : > { %4724 = vmatprep.subr.bf16.mxu0 %v5558_v1 }
 0x564   : > { %v1020_v55 = vpop.xlane.xlu0 %1019 }
 0x56c   : > { %v1136_v54 = vpop.xlane.xlu1 %1135 }
 0x572   : > { %v903_v53 = vpop.xlane.xlu1 %902 }
 0x573   : > { %5182 = vrcp.f32 %v903_v53  ;;  %v5038_v53 = vld [vmem:[#allocation9 + $0x28] sm:$0xff]  }
 0x574   : > { %5184 = vrcp.f32 %v1020_v55 }
 0x575   : > { %5186 = vrcp.f32 %v1136_v54  ;;  %v5037_v54 = vld [vmem:[#allocation9 + $0x30] sm:$0xff]  }
 0x576   : > { %v909_v57 = vpop.permute.xlu1 %908  ;;  %v1251_v59 = vpop.xlane.xlu0 %1250  ;;  %4725 = vmatpush3.bf16.msra.mxu0 %v5037_v54  ;;  %v5059_v54 = vld [vmem:[#allocation12 + $0x20] ss:$8 sps:$4 sm:$0xff]  }
 0x577   : > { %v914_v58 = vsel %vm798_vm2, %v909_v57, 0  ;;  %5188 = vrcp.f32 %v1251_v59  ;;  %4726 = vmatprep.subr.bf16.mxu0 %v5558_v1 }
 0x578   : > { %4645 = vmatpush3.bf16.msra.mxu1 %v914_v58  ;;  %v5039_v58 = vld [vmem:[#allocation9 + $0x20] sm:$0xff]  }
 0x579   : > { %4656 = vmatprep.subr.bf16.mxu1 %v5558_v1 }
 0x57a   : > { %4727 = vmatpush3.bf16.msra.mxu0 %v5038_v53  ;;  %v5064_v53 = vld [vmem:[#allocation12 + $0x14] ss:$8 sps:$4 sm:$0xff]  }
 0x57b   : > { %4728 = vmatprep.subr.bf16.mxu0 %v5558_v1 }
 0x57c   : > { %v1363_v60 = vpop.xlane.xlu0 %1362 }
 0x57d   : > { %5190 = vrcp.f32 %v1363_v60  ;;  %v5040_v60 = vld [vmem:[#allocation9 + $0x18] sm:$0xff]  }
 0x57e   : > { %4729 = vmatpush3.bf16.msra.mxu0 %v5039_v58  ;;  %v5065_v58 = vld [vmem:[#allocation12] ss:$8 sps:$4 sm:$0xff]  }
 0x57f   : > { %4730 = vmatprep.subr.bf16.mxu0 %v5558_v1 }
 0x580   : > { %v5183_v56 = vpop.eup %5182  ;;  %v1025_v62 = vpop.permute.xlu0 %1024 }
 0x581   : > { %v905_v61 = vmul.f32 %v5183_v56, %v5173_v35  ;;  %v5185_v2 = vpop.eup %5184  ;;  %v1030_v3 = vsel %vm798_vm2, %v1025_v62, 0  ;;  %v5042_v62 = vld [vmem:[#allocation9 + $0x8] sm:$0xff]  }
 0x582   : > { %v1022_v4 = vmul.f32 %v5185_v2, %v5937_v22  ;;  %v5187_v7 = vpop.eup %5186  ;;  %4731 = vmatpush3.bf16.msra.mxu0 %v5040_v60 }
 0x583   : > { %v906_v63 = vpack.c.bf16 %v905_v61, %v905_v61  ;;  %v1138_v9 = vmul.f32 %v5187_v7, %v5941_v29  ;;  %v5041_v61 = vld [vmem:[#allocation9 + $0x10] sm:$0xff]   ;;  %4732 = vmatprep.subr.bf16.mxu0 %v5558_v1 }
 0x584   : > { %v1141_v5 = vpop.permute.xlu0 %1140  ;;  %v1023_v6 = vpack.c.bf16 %v1022_v4, %v1022_v4  ;;  %v5189_v11 = vpop.eup %5188 }
 0x585   : > { %4647 = vmatmul.mubr.msk.bf16.vlgmr.msra.gmra.mxu1 %vm782_vm3, %v906_v63  ;;  %v1146_v8 = vsel %vm798_vm2, %v1141_v5, 0  ;;  %v1139_v10 = vpack.c.bf16 %v1138_v9, %v1138_v9  ;;  %v1253_v13 = vmul.f32 %v5189_v11, %v5946_v37 }
 0x586   : > { %4657 = vmatpush3.bf16.msra.mxu1 %v1030_v3  ;;  %4658 = vmatprep.mubr.msk.bf16.mxu1 %vm5559_vm0, %v5558_v1  ;;  %v5043_v3 = vld [vmem:[#allocation9] sm:$0xff]  }
 0x587   : > { %4668 = vmatprep.subr.bf16.mxu1 %v5558_v1  ;;  %v1254_v14 = vpack.c.bf16 %v1253_v13, %v1253_v13  ;;  %4733 = vmatpush3.bf16.msra.mxu0 %v5041_v61 }
 0x588   : > { %4734 = vmatprep.subr.bf16.mxu0 %v5558_v1 }
 0x58a   : > { %v5191_v15 = vpop.eup %5190 }
 0x58b   : > { %v1365_v17 = vmul.f32 %v5191_v15, %v5950_v39  ;;  %4735 = vmatpush3.bf16.msra.mxu0 %v5042_v62 }
 0x58c   : > { %4736 = vmatprep.subr.bf16.mxu0 %v5558_v1 }
 0x58d   : > { %4659 = vmatmul.mubr.msk.bf16.vlgmr.msra.gmra.mxu1 %vm782_vm3, %v1023_v6  ;;  %v1366_v20 = vpack.c.bf16 %v1365_v17, %v1365_v17 }
 0x58e   : > { %4669 = vmatpush3.bf16.msra.mxu1 %v1146_v8  ;;  %4670 = vmatprep.mubr.msk.bf16.mxu1 %vm5559_vm0, %v5558_v1 }
 0x58f   : > { %4680 = vmatprep.subr.bf16.mxu1 %v5558_v1  ;;  %4737 = vmatpush3.bf16.msra.mxu0 %v5043_v3 }
 0x595   : > { %4671 = vmatmul.mubr.msk.bf16.vlgmr.msra.gmra.mxu1 %vm782_vm3, %v1139_v10 }
 0x596   : > { %4681 = vmatpush3.bf16.msra.mxu1 %v1259_v12  ;;  %4682 = vmatprep.mubr.msk.bf16.mxu1 %vm5559_vm0, %v5558_v1 }
 0x597   : > { %4692 = vmatprep.subr.bf16.mxu1 %v5558_v1 }
 0x59d   : > { %4683 = vmatmul.mubr.msk.bf16.vlgmr.msra.gmra.mxu1 %vm782_vm3, %v1254_v14 }
 0x59e   : > { %4694 = vmatprep.mubr.msk.bf16.mxu1 %vm5559_vm0, %v5558_v1 }
 0x5a7   : > { %v1479_v16 = vpop.xlane.xlu1 %1478 }
 0x5a8   : > { %5192 = vrcp.f32 %v1479_v16 }
 0x5ab   : > { %v1369_v18 = vpop.permute.xlu1 %1368 }
 0x5ac   : > { %v1374_v19 = vsel %vm798_vm2, %v1369_v18, 0 }
 0x5ad   : > { %4693 = vmatpush3.bf16.msra.mxu1 %v1374_v19  ;;  %v4314_v19 = vld [vmem:[#allocation11] ss:$0 sm:$0xff] }
 0x5ae   : > { %4704 = vmatprep.subr.bf16.mxu1 %v5558_v1 }
 0x5af   : > { %v1599_v26 = vpop.permute.xlu1 %1598 }
 0x5b0   : > { %4695 = vmatmul.mubr.msk.bf16.vlgmr.msra.gmra.mxu1 %vm782_vm3, %v1366_v20  ;;  %v1604_v28 = vsel %vm798_vm2, %v1599_v26, 0 }
 0x5b1   : > { %4706 = vmatprep.mubr.msk.bf16.mxu1 %vm5559_vm0, %v5558_v1 }
 0x5b5   : > { %v5193_v21 = vpop.eup %5192  ;;  %v1594_v22 = vpop.xlane.xlu0 %1593 }
 0x5b6   : > { %5194 = vrcp.f32 %v1594_v22  ;;  %v1481_v23 = vmul.f32 %v5193_v21, %v5960_v47 }
 0x5b8   : > { %v1482_v27 = vpack.c.bf16 %v1481_v23, %v1481_v23  ;;  %v5276_v23 = vld [vmem:[%s5809_s23] sm:$0xff] }
 0x5b9   : > { %v1484_v24 = vpop.permute.xlu0 %1483 }
 0x5ba   : > { %v1489_v25 = vsel %vm798_vm2, %v1484_v24, 0 }
 0x5bb   : > { %4705 = vmatpush3.bf16.msra.mxu1 %v1489_v25 }
 0x5bc   : > { %4716 = vmatprep.subr.bf16.mxu1 %v5558_v1 }
 0x5be   : > { %4707 = vmatmul.mubr.msk.bf16.vlgmr.msra.gmra.mxu1 %vm782_vm3, %v1482_v27 }
 0x5bf   : > { %4717 = vmatpush3.bf16.msra.mxu1 %v1604_v28  ;;  %4718 = vmatprep.mubr.msk.bf16.mxu1 %vm5559_vm0, %v5558_v1  ;;  %v5277_v28 = vld [vmem:[%s5809_s23 + $0x8] sm:$0xff] }
 0x5c3   : > { %v5195_v29 = vpop.eup %5194 }
 0x5c4   : > { %v1596_v33 = vmul.f32 %v5195_v29, %v5964_v50 }
 0x5c6   : > { %v1597_v34 = vpack.c.bf16 %v1596_v33, %v1596_v33  ;;  %v5044_v33 = vld [vmem:[#allocation12 + $0x70] ss:$8 sps:$4 sm:$0xff]  }
 0x5c8   : > { %4719 = vmatmul.mubr.msk.bf16.vlgmr.msra.gmra.mxu1 %vm782_vm3, %v1597_v34  ;;  %v5046_v34 = vld [vmem:[#allocation12 + $0x74] ss:$8 sps:$4 sm:$0xff]  }
 0x5c9   : > { %1951 = vmatprep.mubr.bf16.mxu1 %v5557_v0  ;;  %1919 = vmatprep.subr.bf16.mxu1 %v5046_v34 }
 0x5ca   : > { %1920 = vmatpush1.bf16.msra.mxu1 %v5044_v33 }
 0x645   : > { %v950_v35 = vpop.f32.mrf.mxu1 }
 0x646   : > { %957 = vrot.lane.b32.xlu1 %v950_v35, %s5562_s20 }
 0x647   : > { %v4648_v36 = vpop.f32.mrf.mxu1 }
 0x649   : > { %v953_v37 = vpop.f32.mrf.mxu1 }
 0x64b   : > { %v4649_v38 = vpop.f32.mrf.mxu1 }
 0x64d   : > { %v1066_v39 = vpop.f32.mrf.mxu1 }
 0x64e   : > { %1073 = vrot.lane.b32.xlu1 %v1066_v39, %s5561_s2 }
 0x64f   : > { %v4660_v40 = vpop.f32.mrf.mxu1 }
 0x651   : > { %v1069_v41 = vpop.f32.mrf.mxu1 }
 0x653   : > { %v4661_v42 = vpop.f32.mrf.mxu1 }
 0x655   : > { %v1182_v43 = vpop.f32.mrf.mxu1 }
 0x657   : > { %v4672_v44 = vpop.f32.mrf.mxu1 }
 0x658   : > { %v5047_v44 = vld [vmem:[#allocation12 + $0x60] ss:$8 sps:$4 sm:$0xff]  }
 0x659   : > { %v1185_v45 = vpop.f32.mrf.mxu1 }
 0x65a   : > { %v5052_v45 = vld [vmem:[#allocation12 + $0x54] ss:$8 sps:$4 sm:$0xff]  }
 0x65b   : > { %v4673_v46 = vpop.f32.mrf.mxu1 }
 0x65c   : > { %v5050_v46 = vld [vmem:[#allocation12 + $0x50] ss:$8 sps:$4 sm:$0xff]  }
 0x65d   : > { %v1295_v47 = vpop.f32.mrf.mxu1 }
 0x65e   : > { %1302 = vst.msk [vmem:[#allocation2 + $0x8] sm:$0xff] %vm735_vm1, %v1295_v47  ;;  %v5053_v47 = vld [vmem:[#allocation12 + $0x40] ss:$8 sps:$4 sm:$0xff]  }
 0x65f   : > { %v4684_v48 = vpop.f32.mrf.mxu1 }
 0x660   : > { %v5055_v48 = vld [vmem:[#allocation12 + $0x44] ss:$8 sps:$4 sm:$0xff]  }
 0x661   : > { %v1298_v50 = vpop.f32.mrf.mxu1 }
 0x662   : > { %v5058_v50 = vld [vmem:[#allocation12 + $0x34] ss:$8 sps:$4 sm:$0xff]  }
 0x663   : > { %v4685_v51 = vpop.f32.mrf.mxu1 }
 0x664   : > { %v5056_v51 = vld [vmem:[#allocation12 + $0x30] ss:$8 sps:$4 sm:$0xff]  }
 0x670   : > { %v1410_v55 = vpop.f32.mrf.mxu1 }
 0x671   : > { %1417 = vrot.lane.b32.xlu1 %v1410_v55, %s5562_s20  ;;  %v5062_v55 = vld [vmem:[#allocation12 + $0x10] ss:$8 sps:$4 sm:$0xff]  }
 0x672   : > { %v4696_v57 = vpop.f32.mrf.mxu1 }
 0x673   : > { %v5067_v57 = vld [vmem:[#allocation12 + $0x4] ss:$8 sps:$4 sm:$0xff]  }
 0x674   : > { %v1413_v59 = vpop.f32.mrf.mxu1 }
 0x675   : > { %1189 = vrot.lane.b32.xlu1 %v1182_v43, %s5560_s1  ;;  %v5049_v43 = vld [vmem:[#allocation12 + $0x64] ss:$8 sps:$4 sm:$0xff]  }
 0x676   : > { %v4697_v56 = vpop.f32.mrf.mxu1  ;;  %1921 = vmatprep.subr.bf16.mxu1 %v5049_v43 }
 0x677   : > { %1922 = vmatpush1.bf16.msra.mxu1 %v5047_v44 }
 0x678   : > { %1923 = vmatprep.subr.bf16.mxu1 %v5052_v45 }
 0x67b   : > { %1924 = vmatpush1.bf16.msra.mxu1 %v5050_v46 }
 0x67c   : > { %1925 = vmatprep.subr.bf16.mxu1 %v5055_v48 }
 0x67e   : > { %v1525_v63 = vpop.f32.mrf.mxu1 }
 0x67f   : > { %1532 = vrot.lane.b32.xlu0 %v1525_v63, %s5561_s2  ;;  %1926 = vmatpush1.bf16.msra.mxu1 %v5053_v47 }
 0x680   : > { %v4708_v2 = vpop.f32.mrf.mxu1  ;;  %1927 = vmatprep.subr.bf16.mxu1 %v5058_v50 }
 0x682   : > { %v1528_v4 = vpop.f32.mrf.mxu1 }
 0x683   : > { %1928 = vmatpush1.bf16.msra.mxu1 %v5056_v51  ;;  %v4324_v4 = vld [vmem:[%s6423_s5] ss:$0 sm:$0xff] }
 0x684   : > { %v4709_v5 = vpop.f32.mrf.mxu1  ;;  %1929 = vmatprep.subr.bf16.mxu1 %v5061_v52 }
 0x687   : > { %1930 = vmatpush1.bf16.msra.mxu1 %v5059_v54 }
 0x688   : > { %v1640_v6 = vpop.f32.mrf.mxu1  ;;  %1931 = vmatprep.subr.bf16.mxu1 %v5064_v53 }
 0x689   : > { %1647 = vrot.lane.b32.xlu0 %v1640_v6, %s5560_s1 }
 0x68a   : > { %v4720_v7 = vpop.f32.mrf.mxu1 }
 0x68b   : > { %1932 = vmatpush1.bf16.msra.mxu1 %v5062_v55 }
 0x68c   : > { %v1643_v8 = vpop.f32.mrf.mxu1  ;;  %1933 = vmatprep.subr.bf16.mxu1 %v5067_v57 }
 0x68d   : > { %v4325_v8 = vld [vmem:[%s6423_s5 + $0x1] ss:$0 sm:$0xff] }
 0x68e   : > { %v4721_v9 = vpop.f32.mrf.mxu1 }
 0x68f   : > { %1934 = vmatpush1.bf16.msra.mxu1 %v5065_v58 }
 0x6b8   : > { %v958_v10 = vpop.permute.xlu1 %957 }
 0x6b9   : > { %961 = vst.msk [vmem:[#allocation2] sm:$0xff] %vm960_vm4, %v958_v10 }
 0x6c0   : > { %v1074_v11 = vpop.permute.xlu1 %1073 }
 0x6c1   : > { %1077 = vst.msk [vmem:[#allocation2] sm:$0xff] %vm1076_vm5, %v1074_v11 }
 0x6e3   : > { %v1418_v12 = vpop.permute.xlu1 %1417 }
 0x6e4   : > { %1420 = vst.msk [vmem:[#allocation2 + $0x8] sm:$0xff] %vm960_vm4, %v1418_v12 }
 0x6e7   : > { %v1190_v13 = vpop.permute.xlu1 %1189 }
 0x6e8   : > { %1193 = vst.msk [vmem:[#allocation2] sm:$0xff] %vm1192_vm6, %v1190_v13  ;;  %v5068_v13 = vld [vmem:[#allocation14 + $0x78] sm:$0xff]  }
 0x6e9   : > { %4512 = vmatprep.subr.bf16.mxu0 %v5068_v13 }
 0x6ef   : > { %v1651_v16 = vld [vmem:[#allocation2] sm:$0xff] }
 0x6f1   : > { %v1533_v14 = vpop.permute.xlu0 %1532 }
 0x6f2   : > { %1535 = vst.msk [vmem:[#allocation2 + $0x8] sm:$0xff] %vm1076_vm5, %v1533_v14  ;;  %v5069_v14 = vld [vmem:[#allocation14 + $0x38] sm:$0xff]  }
 0x6fb   : > { %v1648_v15 = vpop.permute.xlu0 %1647 }
 0x6fc   : > { %1650 = vst.msk [vmem:[#allocation2 + $0x8] sm:$0xff] %vm1192_vm6, %v1648_v15  ;;  %v5070_v15 = vld [vmem:[#allocation14 + $0x70] sm:$0xff]  }
 0x703   : > { %v1652_v17 = vld [vmem:[#allocation2 + $0x8] sm:$0xff] }
 0x704   : > { %v1653_v18 = vpack.c.bf16 %v1652_v17, %v1651_v16  ;;  %v5071_v16 = vld [vmem:[#allocation14 + $0x30] sm:$0xff]   ;;  %v5072_v17 = vld [vmem:[#allocation14 + $0x68] sm:$0xff]  }
 0x706   : > { %4739 = vmatmul.mubr.bf16.vlgmr.msra.gmra.mxu0 %v1653_v18  ;;  %v5073_v18 = vld [vmem:[#allocation14 + $0x28] sm:$0xff]  }
 0x707   : > { %4513 = vmatpush3.bf16.msra.mxu0 %v5069_v14 }
 0x708   : > { %4514 = vmatprep.subr.bf16.mxu0 %v5070_v15 }
 0x70b   : > { %4515 = vmatpush3.bf16.msra.mxu0 %v5071_v16 }
 0x70c   : > { %4516 = vmatprep.subr.bf16.mxu0 %v5072_v17 }
 0x70f   : > { %4517 = vmatpush3.bf16.msra.mxu0 %v5073_v18 }
 0x7c6   : > { %v1759_v20 = vpop.f32.mrf.mxu0 }
 0x7c7   : > { %v1760_v21 = vadd.f32 %v4314_v19, %v1759_v20  ;;  %v5075_v20 = vld [vmem:[#allocation14 + $0x20] sm:$0xff]  }
 0x7c8   : > { %v4740_v22 = vpop.f32.mrf.mxu0 }
 0x7c9   : > { %v1766_v24 = vadd.f32 %v5276_v23, %v1760_v21  ;;  %v5076_v21 = vld [vmem:[#allocation14 + $0x58] sm:$0xff]   ;;  %v5078_v23 = vld [vmem:[#allocation14 + $0x50] sm:$0xff]  }
 0x7ca   : > { %v1762_v25 = vpop.f32.mrf.mxu0  ;;  %v5077_v22 = vld [vmem:[#allocation14 + $0x18] sm:$0xff]  }
 0x7cb   : > { %v1763_v26 = vadd.f32 %v4314_v19, %v1762_v25  ;;  %1771 = vadd.xlane.f32.xlu1 %v1766_v24  ;;  %v5074_v19 = vld [vmem:[#allocation14 + $0x60] sm:$0xff]   ;;  %v5080_v25 = vld [vmem:[#allocation14 + $0x48] sm:$0xff]  }
 0x7cc   : > { %v4741_v27 = vpop.f32.mrf.mxu0  ;;  %4518 = vmatprep.subr.bf16.mxu0 %v5074_v19 }
 0x7cd   : > { %v1767_v29 = vadd.f32 %v5277_v28, %v1763_v26  ;;  %4519 = vmatpush3.bf16.msra.mxu0 %v5075_v20  ;;  %v5081_v26 = vld [vmem:[#allocation14 + $0x8] sm:$0xff]   ;;  %v5082_v27 = vld [vmem:[#allocation14 + $0x40] sm:$0xff]  }
 0x7ce   : > { %4520 = vmatprep.subr.bf16.mxu0 %v5076_v21  ;;  %v5083_v28 = vld [vmem:[#allocation14] sm:$0xff]  }
 0x7cf   : > { %1773 = vadd.xlane.f32.xlu0 %v1767_v29 }
 0x7d1   : > { %4521 = vmatpush3.bf16.msra.mxu0 %v5077_v22 }
 0x7d2   : > { %4522 = vmatprep.subr.bf16.mxu0 %v5078_v23 }
 0x854   : > { %v1772_v35 = vpop.xlane.xlu1 %1771 }
 0x855   : > { %v1776_v36 = vmul.f32 0.0078125, %v1772_v35 }
 0x857   : > { %v1778_v37 = vsub.f32 %v1766_v24, %v1776_v36  ;;  %v5079_v24 = vld [vmem:[#allocation14 + $0x10] sm:$0xff]  }
 0x858   : > { %v1774_v38 = vpop.xlane.xlu0 %1773  ;;  %4523 = vmatpush3.bf16.msra.mxu0 %v5079_v24 }
 0x859   : > { %v1777_v39 = vmul.f32 0.0078125, %v1774_v38  ;;  %v1780_v40 = vmul.f32 %v1778_v37, %v1778_v37  ;;  %4524 = vmatprep.subr.bf16.mxu0 %v5080_v25 }
 0x85b   : > { %v1779_v41 = vsub.f32 %v1767_v29, %v1777_v39  ;;  %1782 = vadd.xlane.f32.xlu0 %v1780_v40  ;;  %v1827_v29 = vld [vmem:[%s6425_s7] sm:$0x3] }
 0x85c   : > { %4525 = vmatpush3.bf16.msra.mxu0 %v5081_v26  ;;  %v1832_v33 = vrot.slane %v1827_v29, %v5852_v32  ;;  %v1836_v34 = vrot.slane %v1827_v29, %v5849_v31 }
 0x85d   : > { %v1781_v42 = vmul.f32 %v1779_v41, %v1779_v41  ;;  %4526 = vmatprep.subr.bf16.mxu0 %v5082_v27 }
 0x85f   : > { %1784 = vadd.xlane.f32.xlu1 %v1781_v42 }
 0x860   : > { %4527 = vmatpush3.bf16.msra.mxu0 %v5083_v28 }
 0x861   : > { %4742 = vmatprep.subr.bf16.mxu0 %v5558_v1 }
 0x8e4   : > { %v1783_v59 = vpop.xlane.xlu0 %1782 }
 0x8e5   : > { %v1786_v60 = vmul.f32 0.0078125, %v1783_v59 }
 0x8e7   : > { %v1788_v56 = vadd.f32 1e-05, %v1786_v60 }
 0x8e8   : > { %v1785_v61 = vpop.xlane.xlu1 %1784 }
 0x8e9   : > { %5196 = vrsqrt.f32 %v1788_v56  ;;  %v1787_v62 = vmul.f32 0.0078125, %v1785_v61 }
 0x8eb   : > { %v1789_v63 = vadd.f32 1e-05, %v1787_v62 }
 0x8ed   : > { %5198 = vrsqrt.f32 %v1789_v63 }
 0x8f6   : > { %v5197_v2 = vpop.eup %5196 }
 0x8f7   : > { %v1792_v3 = vmul.f32 %v5197_v2, %v1778_v37 }
 0x8f9   : > { %v1800_v7 = vmul.f32 %v4324_v4, %v1792_v3 }
 0x8fa   : > { %v5199_v5 = vpop.eup %5198 }
 0x8fb   : > { %v1793_v6 = vmul.f32 %v5199_v5, %v1779_v41  ;;  %v6040_v10 = vadd.f32 %v4325_v8, %v1800_v7 }
 0x8fd   : > { %v1801_v9 = vmul.f32 %v4324_v4, %v1793_v6 }
 0x8ff   : > { %v6042_v11 = vadd.f32 %v4325_v8, %v1801_v9 }
 0x901   : > { %v1810_v12 = vpack.c.bf16 %v6042_v11, %v6040_v10 }
 0x903   : > { %1952 = vmatmul.mubr.bf16.vlgmr.msra.gmra.mxu1 %v1810_v12 }
 0x904   : > { %2500 = vmatprep.mubr.bf16.mxu1 %v5557_v0 }
 0x9c3   : > { %v1953_v35 = vpop.f32.mrf.mxu1 }
 0x9c4   : > { %v6053_v36 = vadd.f32 %v1953_v35, %v1832_v33 }
 0x9c5   : > { %v1955_v37 = vpop.f32.mrf.mxu1 }
 0x9c6   : > { %v6056_v38 = vmul.f32 0.70710677, %v6053_v36  ;;  %v6058_v39 = vadd.f32 %v1955_v37, %v1836_v34 }
 0x9c7   : > { %v1957_v40 = vpop.f32.mrf.mxu1 }
 0x9c8   : > { %v1978_v41 = vand.u32 2147483647, %v6056_v38  ;;  %v6062_v42 = vmul.f32 0.70710677, %v6058_v39  ;;  %v6064_v43 = vadd.f32 %v1957_v40, %v1832_v33  ;;  %vm1970_vm7 = vcmp.ge.f32.partialorder %v6056_v38, 0.0 }
 0x9c9   : > { %v1959_v44 = vpop.f32.mrf.mxu1 }
 0x9ca   : > { %v1982_v45 = vmul.f32 0.3275911, %v1978_v41  ;;  %v1979_v46 = vand.u32 2147483647, %v6062_v42  ;;  %v6068_v47 = vmul.f32 0.70710677, %v6064_v43  ;;  %v6070_v48 = vadd.f32 %v1959_v44, %v1836_v34 }
 0x9cb   : > { %v2030_v56 = vsub.f32 0.0, %v1978_v41  ;;  %vm1971_vm8 = vcmp.ge.f32.partialorder %v6062_v42, 0.0 }
 0x9cc   : > { %v1986_v50 = vadd.f32 1.0, %v1982_v45  ;;  %v1983_v51 = vmul.f32 0.3275911, %v1979_v46  ;;  %v1980_v52 = vand.u32 2147483647, %v6068_v47  ;;  %v2031_v61 = vsub.f32 0.0, %v1979_v46 }
 0x9cd   : > { %v6074_v54 = vmul.f32 0.70710677, %v6070_v48  ;;  %v2034_v62 = vmul.f32 %v2030_v56, %v1978_v41  ;;  %vm1972_vm9 = vcmp.ge.f32.partialorder %v6068_v47, 0.0 }
 0x9ce   : > { %5200 = vrcp.f32 %v1986_v50  ;;  %v1987_v53 = vadd.f32 1.0, %v1983_v51  ;;  %v1984_v55 = vmul.f32 0.3275911, %v1980_v52  ;;  %v2032_v63 = vsub.f32 0.0, %v1980_v52 }
 0x9cf   : > { %v1981_v57 = vand.u32 2147483647, %v6074_v54  ;;  %v2035_v3 = vmul.f32 %v2031_v61, %v1979_v46  ;;  %v2038_v6 = vmul.f32 1.442695, %v2034_v62  ;;  %vm1973_vm10 = vcmp.ge.f32.partialorder %v6074_v54, 0.0 }
 0x9d0   : > { %5202 = vrcp.f32 %v1987_v53  ;;  %v1988_v58 = vadd.f32 1.0, %v1984_v55  ;;  %v2036_v7 = vmul.f32 %v2032_v63, %v1980_v52 }
 0x9d1   : > { %v1985_v59 = vmul.f32 0.3275911, %v1981_v57  ;;  %v2033_v5 = vsub.f32 0.0, %v1981_v57  ;;  %v2040_v13 = vmul.f32 1.442695, %v2035_v3 }
 0x9d2   : > { %5204 = vrcp.f32 %v1988_v58  ;;  %v2042_v19 = vmul.f32 1.442695, %v2036_v7 }
 0x9d3   : > { %v1989_v60 = vadd.f32 1.0, %v1985_v59  ;;  %v2037_v16 = vmul.f32 %v2033_v5, %v1981_v57 }
 0x9d5   : > { %5206 = vrcp.f32 %v1989_v60  ;;  %v2044_v26 = vmul.f32 1.442695, %v2037_v16 }
 0x9d6   : > { %5208 = vpow2.f32 %v2038_v6 }
 0x9d7   : > { %5210 = vpow2.f32 %v2040_v13 }
 0x9d8   : > { %5212 = vpow2.f32 %v2042_v19 }
 0x9d9   : > { %5214 = vpow2.f32 %v2044_v26  ;;  %v1963_v26 = vmul.f32 0.5, %v6058_v39  ;;  %v4342_v39 = vld [vmem:[%s6427_s9] ss:$0 sm:$0xff] }
 0x9db   : > { %v5201_v2 = vpop.eup %5200 }
 0x9dc   : > { %v1994_v4 = vmul.f32 1.0614054, %v5201_v2 }
 0x9dd   : > { %v5203_v8 = vpop.eup %5202 }
 0x9de   : > { %v1998_v9 = vadd.f32 -1.4531521, %v1994_v4  ;;  %v1995_v12 = vmul.f32 1.0614054, %v5203_v8 }
 0x9df   : > { %v5205_v14 = vpop.eup %5204 }
 0x9e0   : > { %v2002_v15 = vmul.f32 %v5201_v2, %v1998_v9  ;;  %v1999_v17 = vadd.f32 -1.4531521, %v1995_v12  ;;  %v1996_v18 = vmul.f32 1.0614054, %v5205_v14 }
 0x9e2   : > { %v2006_v20 = vadd.f32 1.4214138, %v2002_v15  ;;  %v5207_v21 = vpop.eup %5206  ;;  %v2003_v22 = vmul.f32 %v5203_v8, %v1999_v17  ;;  %v2000_v23 = vadd.f32 -1.4531521, %v1996_v18  ;;  %v5563_v15 = vmov -1.0  }
 0x9e3   : > { %v1997_v25 = vmul.f32 1.0614054, %v5207_v21  ;;  %v5209_v58 = vpop.eup %5208  ;;  %v1975_v16 = vsel %vm1971_vm8, 1.0, %v5563_v15  ;;  %v1976_v18 = vsel %vm1972_vm9, 1.0, %v5563_v15  ;;  %v1977_v47 = vsel %vm1973_vm10, 1.0, %v5563_v15 }
 0x9e4   : > { %v2010_v24 = vmul.f32 %v5201_v2, %v2006_v20  ;;  %v2007_v27 = vadd.f32 1.4214138, %v2003_v22  ;;  %v2004_v28 = vmul.f32 %v5205_v14, %v2000_v23  ;;  %v5211_v62 = vpop.eup %5210 }
 0x9e5   : > { %v2001_v33 = vadd.f32 -1.4531521, %v1997_v25  ;;  %v5213_v5 = vpop.eup %5212  ;;  %v1964_v25 = vmul.f32 0.5, %v6064_v43 }
 0x9e6   : > { %v2014_v29 = vadd.f32 -0.28449672, %v2010_v24  ;;  %v2011_v34 = vmul.f32 %v5203_v8, %v2007_v27  ;;  %v2008_v35 = vadd.f32 1.4214138, %v2004_v28  ;;  %v5215_v13 = vpop.eup %5214  ;;  %v1965_v27 = vmul.f32 0.5, %v6070_v48 }
 0x9e7   : > { %v2005_v40 = vmul.f32 %v5207_v21, %v2001_v33 }
 0x9e8   : > { %v2018_v37 = vmul.f32 %v5201_v2, %v2014_v29  ;;  %v2015_v41 = vadd.f32 -0.28449672, %v2011_v34  ;;  %v2012_v44 = vmul.f32 %v5205_v14, %v2008_v35  ;;  %v1962_v29 = vmul.f32 0.5, %v6053_v36 }
 0x9e9   : > { %v2009_v46 = vadd.f32 1.4214138, %v2005_v40 }
 0x9ea   : > { %v2022_v45 = vadd.f32 0.2548296, %v2018_v37  ;;  %v2019_v50 = vmul.f32 %v5203_v8, %v2015_v41  ;;  %v2016_v51 = vadd.f32 -0.28449672, %v2012_v44 }
 0x9eb   : > { %v2013_v53 = vmul.f32 %v5207_v21, %v2009_v46 }
 0x9ec   : > { %v2026_v52 = vmul.f32 %v5201_v2, %v2022_v45  ;;  %v2023_v55 = vadd.f32 0.2548296, %v2019_v50  ;;  %v2020_v57 = vmul.f32 %v5205_v14, %v2016_v51 }
 0x9ed   : > { %v2017_v59 = vadd.f32 -0.28449672, %v2013_v53  ;;  %v5084_v53 = vld [vmem:[#allocation6 + $0x168] ss:$12 sps:$4 sm:$0xff]  }
 0x9ee   : > { %v2046_v60 = vmul.f32 %v5209_v58, %v2026_v52  ;;  %v2027_v56 = vmul.f32 %v5203_v8, %v2023_v55  ;;  %v2024_v61 = vadd.f32 0.2548296, %v2020_v57  ;;  %v1974_v8 = vsel %vm1970_vm7, 1.0, %v5563_v15  ;;  %v5086_v55 = vld [vmem:[#allocation6 + $0x16c] ss:$12 sps:$4 sm:$0xff]  }
 0x9ef   : > { %v2021_v63 = vmul.f32 %v5207_v21, %v2017_v59  ;;  %v5087_v57 = vld [vmem:[#allocation6 + $0x170] ss:$12 sps:$4 sm:$0xff]   ;;  %2468 = vmatprep.subr.bf16.mxu1 %v5086_v55 }
 0x9f0   : > { %v2047_v3 = vmul.f32 %v5211_v62, %v2027_v56  ;;  %v2028_v4 = vmul.f32 %v5205_v14, %v2024_v61  ;;  %v2050_v7 = vsub.f32 1.0, %v2046_v60  ;;  %2469 = vmatpush1.bf16.msra.mxu1 %v5084_v53 }
 0x9f1   : > { %v2025_v6 = vadd.f32 0.2548296, %v2021_v63  ;;  %v5090_v63 = vld [vmem:[#allocation6 + $0x154] ss:$12 sps:$4 sm:$0xff]  }
 0x9f2   : > { %v2051_v2 = vsub.f32 1.0, %v2047_v3  ;;  %v2048_v9 = vmul.f32 %v5213_v5, %v2028_v4  ;;  %v2054_v42 = vmul.f32 %v2050_v7, %v1974_v8  ;;  %v5088_v3 = vld [vmem:[#allocation6 + $0x150] ss:$12 sps:$4 sm:$0xff]   ;;  %v5091_v4 = vld [vmem:[#allocation6 + $0x158] ss:$12 sps:$4 sm:$0xff]   ;;  %2470 = vmatprep.subr.bf16.mxu1 %v5090_v63 }
 0x9f3   : > { %v2029_v12 = vmul.f32 %v5207_v21, %v2025_v6  ;;  %v5094_v5 = vld [vmem:[#allocation6 + $0x13c] ss:$12 sps:$4 sm:$0xff]   ;;  %v5092_v6 = vld [vmem:[#allocation6 + $0x138] ss:$12 sps:$4 sm:$0xff]   ;;  %v5095_v7 = vld [vmem:[#allocation6 + $0x140] ss:$12 sps:$4 sm:$0xff]  }
 0x9f4   : > { %v2052_v17 = vsub.f32 1.0, %v2048_v9  ;;  %v2055_v14 = vmul.f32 %v2051_v2, %v1975_v16  ;;  %v2058_v24 = vadd.f32 1.0, %v2054_v42  ;;  %2471 = vmatpush1.bf16.msra.mxu1 %v5088_v3  ;;  %v5096_v2 = vld [vmem:[#allocation6 + $0x120] ss:$12 sps:$4 sm:$0xff]   ;;  %v5098_v9 = vld [vmem:[#allocation6 + $0x124] ss:$12 sps:$4 sm:$0xff]  }
 0x9f5   : > { %v2049_v38 = vmul.f32 %v5215_v13, %v2029_v12  ;;  %2472 = vmatprep.subr.bf16.mxu1 %v5094_v5  ;;  %v5099_v12 = vld [vmem:[#allocation6 + $0x128] ss:$12 sps:$4 sm:$0xff]   ;;  %v5102_v13 = vld [vmem:[#allocation6 + $0x10c] ss:$12 sps:$4 sm:$0xff]   ;;  %v5103_v16 = vld [vmem:[#allocation6 + $0x110] ss:$12 sps:$4 sm:$0xff]  }
 0x9f6   : > { %v2056_v19 = vmul.f32 %v2052_v17, %v1976_v18  ;;  %v2059_v21 = vadd.f32 1.0, %v2055_v14  ;;  %v2062_v35 = vmul.f32 %v2058_v24, %v1962_v29  ;;  %v5100_v8 = vld [vmem:[#allocation6 + $0x108] ss:$12 sps:$4 sm:$0xff]   ;;  %v5104_v14 = vld [vmem:[#allocation6 + $0xf0] ss:$12 sps:$4 sm:$0xff]  }
 0x9f7   : > { %v2053_v20 = vsub.f32 1.0, %v2049_v38  ;;  %v5106_v17 = vld [vmem:[#allocation6 + $0xf4] ss:$12 sps:$4 sm:$0xff]   ;;  %v5107_v18 = vld [vmem:[#allocation6 + $0xf8] ss:$12 sps:$4 sm:$0xff]  }
 0x9f8   : > { %v2060_v22 = vadd.f32 1.0, %v2056_v19  ;;  %v2063_v33 = vmul.f32 %v2059_v21, %v1963_v26  ;;  %2473 = vmatpush1.bf16.msra.mxu1 %v5092_v6  ;;  %v5110_v38 = vld [vmem:[#allocation6 + $0xdc] ss:$12 sps:$4 sm:$0xff]   ;;  %v5108_v42 = vld [vmem:[#allocation6 + $0xd8] ss:$12 sps:$4 sm:$0xff]  }
 0x9f9   : > { %v2057_v23 = vmul.f32 %v2053_v20, %v1977_v47  ;;  %2474 = vmatprep.subr.bf16.mxu1 %v5098_v9  ;;  %v5111_v19 = vld [vmem:[#allocation6 + $0xe0] ss:$12 sps:$4 sm:$0xff]   ;;  %v5114_v20 = vld [vmem:[#allocation6 + $0xc4] ss:$12 sps:$4 sm:$0xff]   ;;  %v5115_v47 = vld [vmem:[#allocation6 + $0xc8] ss:$12 sps:$4 sm:$0xff]  }
 0x9fa   : > { %v2064_v54 = vmul.f32 %v2060_v22, %v1964_v25  ;;  %v5112_v22 = vld [vmem:[#allocation6 + $0xc0] ss:$12 sps:$4 sm:$0xff]  }
 0x9fb   : > { %v2061_v28 = vadd.f32 1.0, %v2057_v23 }
 0x9fc   : > { %v2066_v40 = vpack.c.bf16 %v2064_v54, %v2062_v35  ;;  %2475 = vmatpush1.bf16.msra.mxu1 %v5096_v2  ;;  %v4361_v54 = vld [vmem:[%s6423_s5 + $0x2] ss:$0 sm:$0xff] }
 0x9fd   : > { %v2065_v34 = vmul.f32 %v2061_v28, %v1965_v27  ;;  %2476 = vmatprep.subr.bf16.mxu1 %v5102_v13 }
 0x9ff   : > { %v2067_v37 = vpack.c.bf16 %v2065_v34, %v2063_v33 }
 0xa00   : > { %2477 = vmatpush1.bf16.msra.mxu1 %v5100_v8 }
 0xa01   : > { %2235 = vmatprep.mubr.bf16.mxu0 %v2067_v37  ;;  %2478 = vmatprep.subr.bf16.mxu1 %v5106_v17  ;;  %v4362_v37 = vld [vmem:[%s6423_s5 + $0x3] ss:$0 sm:$0xff] }
 0xa02   : > { %2236 = vmatmul.mubr.bf16.vlgmr.msra.gmra.mxu0 %v2066_v40 }
 0xa03   : > { %4758 = vmatprep.mubr.msk.bf16.mxu0 %vm5559_vm0, %v5558_v1  ;;  %4743 = vmatpush3.bf16.msra.mxu0 %v5087_v57 }
 0xa04   : > { %4744 = vmatprep.subr.bf16.mxu0 %v5558_v1  ;;  %2479 = vmatpush1.bf16.msra.mxu1 %v5104_v14 }
 0xa05   : > { %2480 = vmatprep.subr.bf16.mxu1 %v5110_v38 }
 0xa07   : > { %4745 = vmatpush3.bf16.msra.mxu0 %v5091_v4 }
 0xa08   : > { %4746 = vmatprep.subr.bf16.mxu0 %v5558_v1  ;;  %2481 = vmatpush1.bf16.msra.mxu1 %v5108_v42 }
 0xa09   : > { %2482 = vmatprep.subr.bf16.mxu1 %v5114_v20 }
 0xa0b   : > { %4747 = vmatpush3.bf16.msra.mxu0 %v5095_v7 }
 0xa0c   : > { %4748 = vmatprep.subr.bf16.mxu0 %v5558_v1  ;;  %2483 = vmatpush1.bf16.msra.mxu1 %v5112_v22 }
 0xa0d   : > { %4762 = vmatprep.subr.bf16.mxu1 %v5558_v1 }
 0xa0f   : > { %4749 = vmatpush3.bf16.msra.mxu0 %v5099_v12 }
 0xa10   : > { %4750 = vmatprep.subr.bf16.mxu0 %v5558_v1 }
 0xa13   : > { %4751 = vmatpush3.bf16.msra.mxu0 %v5103_v16 }
 0xa14   : > { %4752 = vmatprep.subr.bf16.mxu0 %v5558_v1 }
 0xa17   : > { %4753 = vmatpush3.bf16.msra.mxu0 %v5107_v18 }
 0xa18   : > { %4754 = vmatprep.subr.bf16.mxu0 %v5558_v1 }
 0xa1b   : > { %4755 = vmatpush3.bf16.msra.mxu0 %v5111_v19 }
 0xa1c   : > { %4756 = vmatprep.subr.bf16.mxu0 %v5558_v1 }
 0xa1f   : > { %4757 = vmatpush3.bf16.msra.mxu0 %v5115_v47 }
 0xa20   : > { %4786 = vmatprep.subr.bf16.mxu0 %v5558_v1 }
 0xac2   : > { %v4528_v41 = vpop.f32.mrf.mxu0 }
 0xac4   : > { %v4529_v43 = vpop.f32.mrf.mxu0 }
 0xac5   : > { %v4530_v48 = vadd.f32 %v4529_v43, %v4528_v41 }
 0xac6   : > { %v4531_v44 = vpop.f32.mrf.mxu0 }
 0xac7   : > { %v2238_v36 = vadd.f32 %v4530_v48, %v4342_v39  ;;  %v2323_v48 = vld [vmem:[#allocation8 + $0x3] sm:$0x7] }
 0xac8   : > { %v4532_v45 = vpop.f32.mrf.mxu0  ;;  %v2328_v55 = vrot.slane %v2323_v48, %v5852_v32 }
 0xac9   : > { %v4533_v46 = vadd.f32 %v4532_v45, %v4531_v44  ;;  %v2244_v50 = vadd.f32 %v2238_v36, %v6040_v10  ;;  %v2332_v44 = vrot.slane %v2323_v48, %v5849_v31 }
 0xacb   : > { %v2241_v51 = vadd.f32 %v4533_v46, %v4342_v39  ;;  %2250 = vadd.xlane.f32.xlu0 %v2244_v50 }
 0xacd   : > { %v2245_v52 = vadd.f32 %v2241_v51, %v6042_v11  ;;  %v2336_v51 = vrot.slane %v2323_v48, %v515_v49 }
 0xacf   : > { %2252 = vadd.xlane.f32.xlu1 %v2245_v52 }
 0xb54   : > { %v2251_v58 = vpop.xlane.xlu0 %2250 }
 0xb55   : > { %v2254_v59 = vmul.f32 0.0078125, %v2251_v58 }
 0xb57   : > { %v6097_v60 = vsub.f32 %v2244_v50, %v2254_v59 }
 0xb58   : > { %v2253_v56 = vpop.xlane.xlu1 %2252 }
 0xb59   : > { %v2255_v61 = vmul.f32 0.0078125, %v2253_v56  ;;  %v2258_v10 = vmul.f32 %v6097_v60, %v6097_v60 }
 0xb5b   : > { %v6101_v62 = vsub.f32 %v2245_v52, %v2255_v61  ;;  %2260 = vadd.xlane.f32.xlu0 %v2258_v10 }
 0xb5d   : > { %v2259_v11 = vmul.f32 %v6101_v62, %v6101_v62 }
 0xb5f   : > { %2262 = vadd.xlane.f32.xlu1 %v2259_v11 }
 0xbe4   : > { %v2261_v21 = vpop.xlane.xlu0 %2260 }
 0xbe5   : > { %v2264_v23 = vmul.f32 0.0078125, %v2261_v21 }
 0xbe7   : > { %v2266_v24 = vadd.f32 1e-05, %v2264_v23 }
 0xbe8   : > { %v2263_v25 = vpop.xlane.xlu1 %2262 }
 0xbe9   : > { %5216 = vrsqrt.f32 %v2266_v24  ;;  %v2265_v26 = vmul.f32 0.0078125, %v2263_v25 }
 0xbeb   : > { %v2267_v27 = vadd.f32 1e-05, %v2265_v26 }
 0xbed   : > { %5218 = vrsqrt.f32 %v2267_v27 }
 0xbf6   : > { %v5217_v28 = vpop.eup %5216 }
 0xbf7   : > { %v2270_v29 = vmul.f32 %v5217_v28, %v6097_v60 }
 0xbf9   : > { %v2278_v35 = vmul.f32 %v4361_v54, %v2270_v29 }
 0xbfa   : > { %v5219_v33 = vpop.eup %5218 }
 0xbfb   : > { %v2271_v34 = vmul.f32 %v5219_v33, %v6101_v62  ;;  %v6121_v41 = vadd.f32 %v4362_v37, %v2278_v35 }
 0xbfd   : > { %v2279_v40 = vmul.f32 %v4361_v54, %v2271_v34 }
 0xbff   : > { %v6123_v39 = vadd.f32 %v4362_v37, %v2279_v40 }
 0xc01   : > { %v2288_v43 = vpack.c.bf16 %v6123_v39, %v6121_v41 }
 0xc03   : > { %2501 = vmatmul.mubr.bf16.vlgmr.msra.gmra.mxu1 %v2288_v43  ;;  %4759 = vmatmul.mubr.bf16.vlgmr.msra.gmra.mxu0 %v2288_v43 }
 0xc04   : > { %4764 = vmatprep.mubr.msk.bf16.mxu1 %vm5559_vm0, %v5558_v1  ;;  %4788 = vmatprep.mubr.msk.bf16.mxu0 %vm5559_vm0, %v5558_v1 }
 0xcc3   : > { %v2502_v36 = vpop.f32.mrf.mxu1  ;;  %v2545_v45 = vpop.f32.mrf.mxu0 }
 0xcc4   : > { %v2546_v60 = vadd.f32 %v2545_v45, %v2336_v51  ;;  %v2503_v61 = vadd.f32 %v2502_v36, %v2328_v55 }
 0xcc5   : > { %v2504_v46 = vpop.f32.mrf.mxu1  ;;  %v4760_v50 = vpop.f32.mrf.mxu0 }
 0xcc6   : > { %v2505_v52 = vadd.f32 %v2504_v46, %v2332_v44  ;;  %v6139_v10 = vpack.c.bf16 %v2546_v60, %v2546_v60  ;;  %v2552_v62 = vpack.c.bf16 %v2503_v61, %v2503_v61 }
 0xcc7   : > { %v2548_v53 = vpop.f32.mrf.mxu0  ;;  %v2506_v49 = vpop.f32.mrf.mxu1 }
 0xcc8   : > { %v2553_v57 = vpack.c.bf16 %v2505_v52, %v2505_v52  ;;  %v6135_v58 = vadd.f32 %v2548_v53, %v2336_v51  ;;  %v2617_v30 = vsel %vm798_vm2, %v6139_v10, 0  ;;  %v2507_v7 = vadd.f32 %v2506_v49, %v2328_v55 }
 0xcc9   : > { %v4761_v59 = vpop.f32.mrf.mxu0  ;;  %v2508_v11 = vpop.f32.mrf.mxu1 }
 0xcca   : > { %v2559_v56 = vsel %vm735_vm1, %v2553_v57, 0  ;;  %v3008_v2 = vpack.c.bf16 %v2507_v7, %v2507_v7  ;;  %v2509_v17 = vadd.f32 %v2508_v11, %v2332_v44 }
 0xccb   : > { %4763 = vmatpush3.bf16.xpose.msra.mxu1 %v2559_v56 }
 0xccc   : > { %4768 = vmatprep.subr.bf16.mxu1 %v5558_v1  ;;  %v3009_v14 = vpack.c.bf16 %v2509_v17, %v2509_v17 }
 0xcce   : > { %v3015_v28 = vsel %vm735_vm1, %v3009_v14, 0 }
 0xcd2   : > { %4765 = vmatmul.mubr.msk.bf16.vlgmr.msra.gmra.mxu1 %vm735_vm1, %v2552_v62 }
 0xcd3   : > { %4769 = vmatpush3.bf16.msra.mxu1 %v2617_v30  ;;  %4770 = vmatprep.mubr.msk.bf16.mxu1 %vm5559_vm0, %v5558_v1 }
 0xcd4   : > { %4774 = vmatprep.subr.bf16.mxu1 %v5558_v1 }
 0xd92   : > { %v2595_v63 = vpop.f32.mrf.mxu1 }
 0xd93   : > { %v2601_v3 = vsel %vm782_vm3, %v2595_v63, -inf }
 0xd94   : > { %2602 = vmax.xlane.f32.xlu0 %v2601_v3  ;;  %v4766_v4 = vpop.f32.mrf.mxu1 }
 0xd96   : > { %v2598_v5 = vpop.f32.mrf.mxu1 }
 0xd98   : > { %v4767_v6 = vpop.f32.mrf.mxu1 }
 0xdaa   : > { %2664 = vrot.lane.b32.xlu0 %v2553_v57, %s5560_s1 }
 0xdae   : > { %2778 = vrot.lane.b32.xlu0 %v2552_v62, %s5561_s2 }
 0xdb2   : > { %2893 = vrot.lane.b32.xlu0 %v2552_v62, %s5562_s20 }
 0xdb6   : > { %3117 = vrot.lane.b32.xlu0 %v3008_v2, %s5560_s1 }
 0xdba   : > { %3234 = vrot.lane.b32.xlu0 %v3008_v2, %s5561_s2 }
 0xdbe   : > { %3349 = vrot.lane.b32.xlu0 %v3008_v2, %s5562_s20 }
 0xe1d   : > { %v2603_v9 = vpop.xlane.xlu0 %2602 }
 0xe1e   : > { %v2604_v12 = vsub.f32 %v2595_v63, %v2603_v9 }
 0xe20   : > { %v2605_v13 = vmul.f32 1.442695, %v2604_v12 }
 0xe21   : > { %v2665_v20 = vpop.permute.xlu0 %2664 }
 0xe22   : > { %5220 = vpow2.f32 %v2605_v13  ;;  %v2670_v26 = vsel %vm735_vm1, %v2665_v20, 0 }
 0xe25   : > { %v2779_v23 = vpop.permute.xlu0 %2778 }
 0xe29   : > { %v2894_v27 = vpop.permute.xlu0 %2893 }
 0xe2d   : > { %v3118_v34 = vpop.permute.xlu0 %3117 }
 0xe2f   : > { %v5221_v8 = vpop.eup %5220 }
 0xe30   : > { %v2607_v16 = vsel %vm782_vm3, %v5221_v8, 0.0 }
 0xe31   : > { %2608 = vadd.xlane.f32.xlu1 %v2607_v16  ;;  %v3235_v40 = vpop.permute.xlu0 %3234 }
 0xe35   : > { %v3350_v48 = vpop.permute.xlu0 %3349 }
 0xe42   : > { %2661 = vrot.lane.b32.xlu1 %v2552_v62, %s5560_s1 }
 0xe46   : > { %2780 = vrot.lane.b32.xlu1 %v2553_v57, %s5561_s2 }
 0xe4a   : > { %2895 = vrot.lane.b32.xlu1 %v2553_v57, %s5562_s20 }
 0xe4e   : > { %3120 = vrot.lane.b32.xlu1 %v3009_v14, %s5560_s1 }
 0xe52   : > { %3236 = vrot.lane.b32.xlu1 %v3009_v14, %s5561_s2 }
 0xe56   : > { %3351 = vrot.lane.b32.xlu1 %v3009_v14, %s5562_s20 }
 0xeba   : > { %v2609_v18 = vpop.xlane.xlu1 %2608 }
 0xebb   : > { %5222 = vrcp.f32 %v2609_v18 }
 0xebe   : > { %v2662_v38 = vpop.permute.xlu1 %2661 }
 0xec2   : > { %v2781_v42 = vpop.permute.xlu1 %2780 }
 0xec3   : > { %v2786_v19 = vsel %vm735_vm1, %v2781_v42, 0 }
 0xec4   : > { %4787 = vmatpush3.bf16.xpose.msra.mxu0 %v2786_v19 }
 0xec5   : > { %4798 = vmatprep.subr.bf16.mxu0 %v5558_v1 }
 0xec6   : > { %v2896_v47 = vpop.permute.xlu1 %2895 }
 0xec7   : > { %v2901_v24 = vsel %vm735_vm1, %v2896_v47, 0 }
 0xec8   : > { %v5223_v22 = vpop.eup %5222 }
 0xec9   : > { %v2611_v21 = vmul.f32 %v5223_v22, %v5221_v8 }
 0xeca   : > { %v3121_v29 = vpop.permute.xlu1 %3120 }
 0xecb   : > { %4789 = vmatmul.mubr.msk.bf16.vlgmr.msra.gmra.mxu0 %vm735_vm1, %v2779_v23  ;;  %v2612_v25 = vpack.c.bf16 %v2611_v21, %v2611_v21  ;;  %v3126_v54 = vsel %vm735_vm1, %v3121_v29, 0 }
 0xecc   : > { %4799 = vmatpush3.bf16.xpose.msra.mxu0 %v2901_v24  ;;  %4800 = vmatprep.mubr.msk.bf16.mxu0 %vm5559_vm0, %v5558_v1 }
 0xecd   : > { %4771 = vmatmul.mubr.msk.bf16.vlgmr.msra.gmra.mxu1 %vm782_vm3, %v2612_v25  ;;  %4810 = vmatprep.subr.bf16.mxu0 %v5558_v1 }
 0xece   : > { %4775 = vmatpush3.bf16.xpose.msra.mxu1 %v2670_v26  ;;  %4776 = vmatprep.mubr.msk.bf16.mxu1 %vm5559_vm0, %v5558_v1  ;;  %v3237_v33 = vpop.permute.xlu1 %3236 }
 0xecf   : > { %4780 = vmatprep.subr.bf16.mxu1 %v5558_v1  ;;  %v3242_v35 = vsel %vm735_vm1, %v3237_v33, 0 }
 0xed2   : > { %v3352_v37 = vpop.permute.xlu1 %3351 }
 0xed3   : > { %4801 = vmatmul.mubr.msk.bf16.vlgmr.msra.gmra.mxu0 %vm735_vm1, %v2894_v27  ;;  %v3357_v43 = vsel %vm735_vm1, %v3352_v37, 0 }
 0xed4   : > { %4811 = vmatpush3.bf16.xpose.msra.mxu0 %v3015_v28  ;;  %4812 = vmatprep.mubr.msk.bf16.mxu0 %vm5559_vm0, %v5558_v1 }
 0xed5   : > { %4777 = vmatmul.mubr.msk.bf16.vlgmr.msra.gmra.mxu1 %vm735_vm1, %v2662_v38  ;;  %4822 = vmatprep.subr.bf16.mxu0 %v5558_v1 }
 0xed6   : > { %4782 = vmatprep.mubr.msk.bf16.mxu1 %vm5559_vm0, %v5558_v1 }
 0xedb   : > { %4813 = vmatmul.mubr.msk.bf16.vlgmr.msra.gmra.mxu0 %vm735_vm1, %v3008_v2 }
 0xedc   : > { %4823 = vmatpush3.bf16.xpose.msra.mxu0 %v3126_v54  ;;  %4824 = vmatprep.mubr.msk.bf16.mxu0 %vm5559_vm0, %v5558_v1 }
 0xedd   : > { %4834 = vmatprep.subr.bf16.mxu0 %v5558_v1 }
 0xee3   : > { %4825 = vmatmul.mubr.msk.bf16.vlgmr.msra.gmra.mxu0 %vm735_vm1, %v3118_v34 }
 0xee4   : > { %4835 = vmatpush3.bf16.xpose.msra.mxu0 %v3242_v35  ;;  %4836 = vmatprep.mubr.msk.bf16.mxu0 %vm5559_vm0, %v5558_v1 }
 0xee5   : > { %4846 = vmatprep.subr.bf16.mxu0 %v5558_v1 }
 0xeeb   : > { %4837 = vmatmul.mubr.msk.bf16.vlgmr.msra.gmra.mxu0 %vm735_vm1, %v3235_v40 }
 0xeec   : > { %4847 = vmatpush3.bf16.xpose.msra.mxu0 %v3357_v43  ;;  %4848 = vmatprep.mubr.msk.bf16.mxu0 %vm5559_vm0, %v5558_v1 }
 0xeed   : > { %4858 = vmatprep.subr.bf16.mxu0 %v5558_v1 }
 0xef3   : > { %4849 = vmatmul.mubr.msk.bf16.vlgmr.msra.gmra.mxu0 %vm735_vm1, %v3350_v48 }
 0xef4   : > { %4874 = vmatprep.mubr.msk.bf16.mxu0 %vm5559_vm0, %v5558_v1 }
 0xf8b   : > { %v2822_v44 = vpop.f32.mrf.mxu0 }
 0xf8c   : > { %v2828_v36 = vsel %vm782_vm3, %v2822_v44, -inf }
 0xf8d   : > { %2829 = vmax.xlane.f32.xlu0 %v2828_v36  ;;  %v2653_v45 = vpop.f32.mrf.mxu1  ;;  %v4790_v46 = vpop.f32.mrf.mxu0 }
 0xf8e   : > { %2659 = vst.msk [vmem:[#allocation2] sm:$0xff] %vm735_vm1, %v2653_v45 }
 0xf8f   : > { %v4772_v50 = vpop.f32.mrf.mxu1  ;;  %v2825_v51 = vpop.f32.mrf.mxu0 }
 0xf91   : > { %v2656_v52 = vpop.f32.mrf.mxu1  ;;  %v4791_v53 = vpop.f32.mrf.mxu0 }
 0xf93   : > { %v4773_v55 = vpop.f32.mrf.mxu1  ;;  %v2937_v57 = vpop.f32.mrf.mxu0 }
 0xf94   : > { %v2943_v59 = vsel %vm782_vm3, %v2937_v57, -inf }
 0xf95   : > { %2944 = vmax.xlane.f32.xlu0 %v2943_v59  ;;  %v2706_v60 = vpop.f32.mrf.mxu1  ;;  %v4802_v56 = vpop.f32.mrf.mxu0 }
 0xf96   : > { %v2712_v61 = vsel %vm782_vm3, %v2706_v60, -inf }
 0xf97   : > { %v2940_v62 = vpop.f32.mrf.mxu0  ;;  %2713 = vmax.xlane.f32.xlu1 %v2712_v61  ;;  %v4778_v30 = vpop.f32.mrf.mxu1 }
 0xf99   : > { %v2709_v49 = vpop.f32.mrf.mxu1  ;;  %v4803_v11 = vpop.f32.mrf.mxu0 }
 0xf9b   : > { %v4779_v63 = vpop.f32.mrf.mxu1  ;;  %v3051_v3 = vpop.f32.mrf.mxu0 }
 0xf9c   : > { %v3057_v4 = vsel %vm782_vm3, %v3051_v3, -inf  ;;  %v3010_v63 = vpack.c.bf16 %v6135_v58, %v6135_v58 }
 0xf9d   : > { %v4814_v5 = vpop.f32.mrf.mxu0  ;;  %3058 = vmax.xlane.f32.xlu1 %v3057_v4 }
 0xf9f   : > { %v3054_v6 = vpop.f32.mrf.mxu0 }
 0xfa1   : > { %v4815_v7 = vpop.f32.mrf.mxu0 }
 0xfa3   : > { %v3162_v2 = vpop.f32.mrf.mxu0 }
 0xfa4   : > { %v3168_v9 = vsel %vm782_vm3, %v3162_v2, -inf }
 0xfa5   : > { %3169 = vmax.xlane.f32.xlu0 %v3168_v9  ;;  %v4826_v12 = vpop.f32.mrf.mxu0 }
 0xfa7   : > { %v3165_v13 = vpop.f32.mrf.mxu0 }
 0xfa9   : > { %v4827_v8 = vpop.f32.mrf.mxu0 }
 0xfab   : > { %v3278_v16 = vpop.f32.mrf.mxu0 }
 0xfac   : > { %v3284_v17 = vsel %vm782_vm3, %v3278_v16, -inf }
 0xfad   : > { %v4838_v14 = vpop.f32.mrf.mxu0  ;;  %3285 = vmax.xlane.f32.xlu1 %v3284_v17 }
 0xfaf   : > { %v3281_v18 = vpop.f32.mrf.mxu0 }
 0xfb1   : > { %v4839_v38 = vpop.f32.mrf.mxu0 }
 0xfb3   : > { %v3393_v42 = vpop.f32.mrf.mxu0 }
 0xfb4   : > { %v3399_v19 = vsel %vm782_vm3, %v3393_v42, -inf }
 0xfb5   : > { %3400 = vmax.xlane.f32.xlu0 %v3399_v19  ;;  %v4850_v20 = vpop.f32.mrf.mxu0 }
 0xfb7   : > { %v3396_v22 = vpop.f32.mrf.mxu0 }
 0xfb9   : > { %v4851_v47 = vpop.f32.mrf.mxu0 }
0x1016   : > { %v2830_v21 = vpop.xlane.xlu0 %2829 }
0x1017   : > { %v2831_v23 = vsub.f32 %v2822_v44, %v2830_v21  ;;  %v3073_v21 = vsel %vm798_vm2, %v3010_v63, 0 }
0x1019   : > { %v2832_v24 = vmul.f32 1.442695, %v2831_v23 }
0x101b   : > { %5224 = vpow2.f32 %v2832_v24 }
0x101e   : > { %v2945_v25 = vpop.xlane.xlu0 %2944 }
0x101f   : > { %v2946_v26 = vsub.f32 %v2937_v57, %v2945_v25 }
0x1020   : > { %v2714_v27 = vpop.xlane.xlu1 %2713 }
0x1021   : > { %v2947_v28 = vmul.f32 1.442695, %v2946_v26  ;;  %v2715_v29 = vsub.f32 %v2706_v60, %v2714_v27 }
0x1023   : > { %5226 = vpow2.f32 %v2947_v28  ;;  %v2716_v54 = vmul.f32 1.442695, %v2715_v29 }
0x1025   : > { %5228 = vpow2.f32 %v2716_v54 }
0x1026   : > { %v3059_v33 = vpop.xlane.xlu1 %3058 }
0x1027   : > { %v3060_v34 = vsub.f32 %v3051_v3, %v3059_v33 }
0x1028   : > { %v6207_v35 = vpop.eup %5224 }
0x1029   : > { %v3061_v37 = vmul.f32 1.442695, %v3060_v34  ;;  %v2834_v40 = vsel %vm782_vm3, %v6207_v35, 0.0 }
0x102a   : > { %2835 = vadd.xlane.f32.xlu0 %v2834_v40 }
0x102b   : > { %5230 = vpow2.f32 %v3061_v37 }
0x102e   : > { %v3170_v43 = vpop.xlane.xlu0 %3169 }
0x102f   : > { %v3171_v48 = vsub.f32 %v3162_v2, %v3170_v43 }
0x1030   : > { %v6211_v44 = vpop.eup %5226 }
0x1031   : > { %v3172_v36 = vmul.f32 1.442695, %v3171_v48  ;;  %v2949_v45 = vsel %vm782_vm3, %v6211_v44, 0.0 }
0x1032   : > { %v5229_v46 = vpop.eup %5228  ;;  %2950 = vadd.xlane.f32.xlu1 %v2949_v45 }
0x1033   : > { %5232 = vpow2.f32 %v3172_v36  ;;  %v2718_v50 = vsel %vm782_vm3, %v5229_v46, 0.0 }
0x1036   : > { %2719 = vadd.xlane.f32.xlu1 %v2718_v50  ;;  %v3286_v57 = vpop.xlane.xlu1 %3285 }
0x1037   : > { %v3287_v59 = vsub.f32 %v3278_v16, %v3286_v57 }
0x1038   : > { %v6216_v51 = vpop.eup %5230 }
0x1039   : > { %v3063_v52 = vsel %vm782_vm3, %v6216_v51, 0.0  ;;  %v3288_v60 = vmul.f32 1.442695, %v3287_v59 }
0x103a   : > { %3064 = vadd.xlane.f32.xlu0 %v3063_v52 }
0x103b   : > { %5234 = vpow2.f32 %v3288_v60 }
0x103e   : > { %v3401_v56 = vpop.xlane.xlu0 %3400 }
0x103f   : > { %v3402_v61 = vsub.f32 %v3393_v42, %v3401_v56 }
0x1040   : > { %v6220_v53 = vpop.eup %5232 }
0x1041   : > { %v3174_v55 = vsel %vm782_vm3, %v6220_v53, 0.0  ;;  %v3403_v62 = vmul.f32 1.442695, %v3402_v61 }
0x1042   : > { %3175 = vadd.xlane.f32.xlu0 %v3174_v55 }
0x1043   : > { %5236 = vpow2.f32 %v3403_v62 }
0x1047   : > { %2725 = vrot.lane.b32.xlu1 %v6139_v10, %s5560_s1 }
0x1048   : > { %v6230_v30 = vpop.eup %5234 }
0x1049   : > { %v3290_v49 = vsel %vm782_vm3, %v6230_v30, 0.0 }
0x1050   : > { %v6234_v11 = vpop.eup %5236 }
0x1051   : > { %v3405_v3 = vsel %vm782_vm3, %v6234_v11, 0.0 }
0x1058   : > { %2840 = vrot.lane.b32.xlu0 %v6139_v10, %s5561_s2 }
0x105c   : > { %2955 = vrot.lane.b32.xlu0 %v6139_v10, %s5562_s20 }
0x106b   : > { %3291 = vadd.xlane.f32.xlu1 %v3290_v49 }
0x107b   : > { %3406 = vadd.xlane.f32.xlu0 %v3405_v3  ;;  %v5116_v3 = vld [vmem:[#allocation9 + $0x78] sm:$0xff]  }
0x107c   : > { %3181 = vrot.lane.b32.xlu1 %v3010_v63, %s5560_s1  ;;  %4859 = vmatpush3.bf16.msra.mxu0 %v5116_v3  ;;  %v5145_v3 = vld [vmem:[#allocation12 + $0x80] ss:$8 sps:$4 sm:$0xff]  }
0x107d   : > { %4860 = vmatprep.subr.bf16.mxu0 %v5558_v1 }
0x1080   : > { %3411 = vrot.lane.b32.xlu1 %v3010_v63, %s5562_s20 }
0x1091   : > { %3296 = vrot.lane.b32.xlu0 %v3010_v63, %s5561_s2 }
0x10b3   : > { %v2836_v5 = vpop.xlane.xlu0 %2835 }
0x10bb   : > { %v2951_v10 = vpop.xlane.xlu1 %2950 }
0x10bf   : > { %v2720_v4 = vpop.xlane.xlu1 %2719 }
0x10c0   : > { %5238 = vrcp.f32 %v2720_v4  ;;  %v5118_v4 = vld [vmem:[#allocation9 + $0x68] sm:$0xff]  }
0x10c1   : > { %5240 = vrcp.f32 %v2836_v5 }
0x10c2   : > { %5242 = vrcp.f32 %v2951_v10  ;;  %v5117_v10 = vld [vmem:[#allocation9 + $0x70] sm:$0xff]  }
0x10c3   : > { %v2726_v6 = vpop.permute.xlu1 %2725  ;;  %v3065_v58 = vpop.xlane.xlu0 %3064  ;;  %4861 = vmatpush3.bf16.msra.mxu0 %v5117_v10 }
0x10c4   : > { %v2731_v7 = vsel %vm798_vm2, %v2726_v6, 0  ;;  %5244 = vrcp.f32 %v3065_v58  ;;  %4862 = vmatprep.subr.bf16.mxu0 %v5558_v1  ;;  %v5119_v58 = vld [vmem:[#allocation9 + $0x60] sm:$0xff]  }
0x10c5   : > { %4781 = vmatpush3.bf16.msra.mxu1 %v2731_v7 }
0x10c6   : > { %4792 = vmatprep.subr.bf16.mxu1 %v5558_v1 }
0x10c7   : > { %4863 = vmatpush3.bf16.msra.mxu0 %v5118_v4 }
0x10c8   : > { %4864 = vmatprep.subr.bf16.mxu0 %v5558_v1 }
0x10cb   : > { %v3176_v2 = vpop.xlane.xlu0 %3175  ;;  %4865 = vmatpush3.bf16.msra.mxu0 %v5119_v58 }
0x10cc   : > { %5246 = vrcp.f32 %v3176_v2  ;;  %4866 = vmatprep.subr.bf16.mxu0 %v5558_v1 }
0x10cd   : > { %v5239_v9 = vpop.eup %5238 }
0x10ce   : > { %v2722_v12 = vmul.f32 %v5239_v9, %v5229_v46  ;;  %v5241_v17 = vpop.eup %5240  ;;  %v5120_v9 = vld [vmem:[#allocation9 + $0x58] sm:$0xff]  }
0x10cf   : > { %v2841_v13 = vpop.permute.xlu0 %2840  ;;  %v2838_v14 = vmul.f32 %v5241_v17, %v6207_v35  ;;  %v5243_v42 = vpop.eup %5242  ;;  %4867 = vmatpush3.bf16.msra.mxu0 %v5120_v9  ;;  %v5123_v17 = vld [vmem:[#allocation9 + $0x40] sm:$0xff]  }
0x10d0   : > { %v2846_v8 = vsel %vm798_vm2, %v2841_v13, 0  ;;  %v2723_v16 = vpack.c.bf16 %v2722_v12, %v2722_v12  ;;  %v2953_v20 = vmul.f32 %v5243_v42, %v6211_v44  ;;  %v5121_v12 = vld [vmem:[#allocation9 + $0x50] sm:$0xff]   ;;  %4868 = vmatprep.subr.bf16.mxu0 %v5558_v1  ;;  %v5122_v13 = vld [vmem:[#allocation9 + $0x48] sm:$0xff]  }
0x10d1   : > { %v2839_v38 = vpack.c.bf16 %v2838_v14, %v2838_v14  ;;  %v5245_v47 = vpop.eup %5244 }
0x10d2   : > { %4783 = vmatmul.mubr.msk.bf16.vlgmr.msra.gmra.mxu1 %vm782_vm3, %v2723_v16  ;;  %v2954_v22 = vpack.c.bf16 %v2953_v20, %v2953_v20  ;;  %v3067_v23 = vmul.f32 %v5245_v47, %v6216_v51 }
0x10d3   : > { %4793 = vmatpush3.bf16.msra.mxu1 %v2846_v8  ;;  %4794 = vmatprep.mubr.msk.bf16.mxu1 %vm5559_vm0, %v5558_v1  ;;  %v2956_v18 = vpop.permute.xlu0 %2955 }
0x10d4   : > { %4804 = vmatprep.subr.bf16.mxu1 %v5558_v1  ;;  %v2961_v19 = vsel %vm798_vm2, %v2956_v18, 0  ;;  %v3068_v24 = vpack.c.bf16 %v3067_v23, %v3067_v23  ;;  %4869 = vmatpush3.bf16.msra.mxu0 %v5121_v12  ;;  %v4414_v12 = vld [vmem:[%s6423_s5 + $0x4] ss:$0 sm:$0xff] }
0x10d5   : > { %4870 = vmatprep.subr.bf16.mxu0 %v5558_v1 }
0x10d8   : > { %4871 = vmatpush3.bf16.msra.mxu0 %v5122_v13 }
0x10d9   : > { %v5247_v25 = vpop.eup %5246  ;;  %4872 = vmatprep.subr.bf16.mxu0 %v5558_v1 }
0x10da   : > { %4795 = vmatmul.mubr.msk.bf16.vlgmr.msra.gmra.mxu1 %vm782_vm3, %v2839_v38  ;;  %v3178_v27 = vmul.f32 %v5247_v25, %v6220_v53 }
0x10db   : > { %4805 = vmatpush3.bf16.msra.mxu1 %v2961_v19  ;;  %4806 = vmatprep.mubr.msk.bf16.mxu1 %vm5559_vm0, %v5558_v1 }
0x10dc   : > { %4816 = vmatprep.subr.bf16.mxu1 %v5558_v1  ;;  %v3179_v54 = vpack.c.bf16 %v3178_v27, %v3178_v27  ;;  %4873 = vmatpush3.bf16.msra.mxu0 %v5123_v17  ;;  %v4415_v17 = vld [vmem:[%s6423_s5 + $0x5] ss:$0 sm:$0xff] }
0x10e2   : > { %4807 = vmatmul.mubr.msk.bf16.vlgmr.msra.gmra.mxu1 %vm782_vm3, %v2954_v22 }
0x10e3   : > { %4817 = vmatpush3.bf16.msra.mxu1 %v3073_v21  ;;  %4818 = vmatprep.mubr.msk.bf16.mxu1 %vm5559_vm0, %v5558_v1 }
0x10e4   : > { %4828 = vmatprep.subr.bf16.mxu1 %v5558_v1 }
0x10ea   : > { %4819 = vmatmul.mubr.msk.bf16.vlgmr.msra.gmra.mxu1 %vm782_vm3, %v3068_v24 }
0x10eb   : > { %4830 = vmatprep.mubr.msk.bf16.mxu1 %vm5559_vm0, %v5558_v1 }
0x10f4   : > { %v3292_v26 = vpop.xlane.xlu1 %3291 }
0x10f5   : > { %5248 = vrcp.f32 %v3292_v26 }
0x10f8   : > { %v3182_v28 = vpop.permute.xlu1 %3181 }
0x10f9   : > { %v3187_v29 = vsel %vm798_vm2, %v3182_v28, 0  ;;  %v4403_v28 = vld [vmem:[#allocation11 + $0x1] ss:$0 sm:$0xff] }
0x10fa   : > { %4829 = vmatpush3.bf16.msra.mxu1 %v3187_v29 }
0x10fb   : > { %4840 = vmatprep.subr.bf16.mxu1 %v5558_v1 }
0x10fc   : > { %v3412_v43 = vpop.permute.xlu1 %3411 }
0x10fd   : > { %4831 = vmatmul.mubr.msk.bf16.vlgmr.msra.gmra.mxu1 %vm782_vm3, %v3179_v54  ;;  %v3417_v44 = vsel %vm798_vm2, %v3412_v43, 0 }
0x10fe   : > { %4842 = vmatprep.mubr.msk.bf16.mxu1 %vm5559_vm0, %v5558_v1 }
0x1102   : > { %v5249_v33 = vpop.eup %5248 }
0x1103   : > { %v3294_v35 = vmul.f32 %v5249_v33, %v6230_v30 }
0x1104   : > { %v3407_v34 = vpop.xlane.xlu0 %3406 }
0x1105   : > { %5250 = vrcp.f32 %v3407_v34  ;;  %v3295_v48 = vpack.c.bf16 %v3294_v35, %v3294_v35 }
0x1108   : > { %v3297_v37 = vpop.permute.xlu0 %3296 }
0x1109   : > { %v3302_v40 = vsel %vm798_vm2, %v3297_v37, 0 }
0x110a   : > { %4841 = vmatpush3.bf16.msra.mxu1 %v3302_v40 }
0x110b   : > { %4852 = vmatprep.subr.bf16.mxu1 %v5558_v1 }
0x110d   : > { %4843 = vmatmul.mubr.msk.bf16.vlgmr.msra.gmra.mxu1 %vm782_vm3, %v3295_v48  ;;  %v5124_v48 = vld [vmem:[#allocation12 + $0xf0] ss:$8 sps:$4 sm:$0xff]  }
0x110e   : > { %4853 = vmatpush3.bf16.msra.mxu1 %v3417_v44  ;;  %4854 = vmatprep.mubr.msk.bf16.mxu1 %vm5559_vm0, %v5558_v1  ;;  %v5126_v44 = vld [vmem:[#allocation12 + $0xf4] ss:$8 sps:$4 sm:$0xff]  }
0x110f   : > { %3736 = vmatprep.subr.bf16.mxu1 %v5126_v44 }
0x1112   : > { %v5251_v36 = vpop.eup %5250 }
0x1113   : > { %v3409_v45 = vmul.f32 %v5251_v36, %v6234_v11 }
0x1115   : > { %v3410_v46 = vpack.c.bf16 %v3409_v45, %v3409_v45 }
0x1117   : > { %4855 = vmatmul.mubr.msk.bf16.vlgmr.msra.gmra.mxu1 %vm782_vm3, %v3410_v46 }
0x1118   : > { %3768 = vmatprep.mubr.bf16.mxu1 %v5557_v0  ;;  %3737 = vmatpush1.bf16.msra.mxu1 %v5124_v48 }
0x1192   : > { %v2767_v50 = vpop.f32.mrf.mxu1 }
0x1193   : > { %2774 = vrot.lane.b32.xlu1 %v2767_v50, %s5562_s20 }
0x1194   : > { %v4784_v51 = vpop.f32.mrf.mxu1 }
0x1196   : > { %v2770_v52 = vpop.f32.mrf.mxu1 }
0x1198   : > { %v4785_v53 = vpop.f32.mrf.mxu1 }
0x119a   : > { %v2882_v55 = vpop.f32.mrf.mxu1 }
0x119b   : > { %2889 = vrot.lane.b32.xlu1 %v2882_v55, %s5561_s2  ;;  %v5129_v55 = vld [vmem:[#allocation12 + $0xe4] ss:$8 sps:$4 sm:$0xff]  }
0x119c   : > { %v4796_v57 = vpop.f32.mrf.mxu1  ;;  %3738 = vmatprep.subr.bf16.mxu1 %v5129_v55 }
0x119d   : > { %v5127_v57 = vld [vmem:[#allocation12 + $0xe0] ss:$8 sps:$4 sm:$0xff]  }
0x119e   : > { %v2885_v59 = vpop.f32.mrf.mxu1  ;;  %3739 = vmatpush1.bf16.msra.mxu1 %v5127_v57 }
0x119f   : > { %v5130_v59 = vld [vmem:[#allocation12 + $0xd0] ss:$8 sps:$4 sm:$0xff]  }
0x11a0   : > { %v4797_v60 = vpop.f32.mrf.mxu1 }
0x11a1   : > { %v5133_v60 = vld [vmem:[#allocation12 + $0xc0] ss:$8 sps:$4 sm:$0xff]  }
0x11a2   : > { %v2997_v56 = vpop.f32.mrf.mxu1 }
0x11a4   : > { %v4808_v61 = vpop.f32.mrf.mxu1 }
0x11a5   : > { %v5138_v61 = vld [vmem:[#allocation12 + $0xb4] ss:$8 sps:$4 sm:$0xff]  }
0x11a6   : > { %v3000_v62 = vpop.f32.mrf.mxu1 }
0x11a7   : > { %v5136_v62 = vld [vmem:[#allocation12 + $0xb0] ss:$8 sps:$4 sm:$0xff]  }
0x11a8   : > { %v4809_v30 = vpop.f32.mrf.mxu1 }
0x11a9   : > { %v5141_v30 = vld [vmem:[#allocation12 + $0xa4] ss:$8 sps:$4 sm:$0xff]  }
0x11aa   : > { %v3109_v49 = vpop.f32.mrf.mxu1 }
0x11ab   : > { %3115 = vst.msk [vmem:[#allocation2 + $0x8] sm:$0xff] %vm735_vm1, %v3109_v49  ;;  %v5139_v49 = vld [vmem:[#allocation12 + $0xa0] ss:$8 sps:$4 sm:$0xff]  }
0x11ac   : > { %v4820_v0 = vpop.f32.mrf.mxu1 }
0x11ad   : > { %v5144_v0 = vld [vmem:[#allocation12 + $0x94] ss:$8 sps:$4 sm:$0xff]  }
0x11ae   : > { %v3112_v11 = vpop.f32.mrf.mxu1 }
0x11af   : > { %v5142_v11 = vld [vmem:[#allocation12 + $0x90] ss:$8 sps:$4 sm:$0xff]  }
0x11b0   : > { %v4821_v63 = vpop.f32.mrf.mxu1 }
0x11b1   : > { %v5147_v63 = vld [vmem:[#allocation12 + $0x84] ss:$8 sps:$4 sm:$0xff]  }
0x11bd   : > { %v3223_v5 = vpop.f32.mrf.mxu1 }
0x11be   : > { %3230 = vrot.lane.b32.xlu1 %v3223_v5, %s5562_s20 }
0x11bf   : > { %v4832_v6 = vpop.f32.mrf.mxu1 }
0x11c1   : > { %v3226_v7 = vpop.f32.mrf.mxu1 }
0x11c2   : > { %3004 = vrot.lane.b32.xlu1 %v2997_v56, %s5560_s1  ;;  %v5135_v56 = vld [vmem:[#allocation12 + $0xc4] ss:$8 sps:$4 sm:$0xff]  }
0x11c3   : > { %v4833_v2 = vpop.f32.mrf.mxu1 }
0x11cd   : > { %v3338_v8 = vpop.f32.mrf.mxu1 }
0x11ce   : > { %3345 = vrot.lane.b32.xlu0 %v3338_v8, %s5561_s2 }
0x11cf   : > { %v4844_v16 = vpop.f32.mrf.mxu1 }
0x11d1   : > { %v3341_v14 = vpop.f32.mrf.mxu1 }
0x11d3   : > { %v4845_v18 = vpop.f32.mrf.mxu1 }
0x11d7   : > { %v3453_v38 = vpop.f32.mrf.mxu1 }
0x11d8   : > { %3460 = vrot.lane.b32.xlu0 %v3453_v38, %s5560_s1  ;;  %s464_s1 = scalar_lea.vmem [#allocation15], %s4273_s4 }
0x11d9   : > { %v4856_v42 = vpop.f32.mrf.mxu1  ;;  %s4123_s2 = sshll.u32 %s464_s1, 4  ;;  %s6375_s2 = int_to_ptr.vmem [resolvable:$true] %s4123_s2 }
0x11da   : > { %s5462_s21 = scalar_lea.vmem %s6375_s2, 32  ;;  %p5469_p0 = scmp.lt.s32.totalorder %s6375_s2, %s5467_s25 }
0x11db   : > { %v3456_v19 = vpop.f32.mrf.mxu1  ;;  %p5463_p9 = scmp.ne.s32.totalorder %s6375_s2, %s5462_s21  ;;  %p5470_p5 = scmp.lt.s32.totalorder %s5468_s3, %s5462_s21 }
0x11dc   : > { %v5148_v19 = vld [vmem:[#allocation14 + $0xf8] sm:$0xff]  }
0x11dd   : > { %v4857_v20 = vpop.f32.mrf.mxu1  ;;  %4584 = vmatprep.subr.bf16.mxu0 %v5148_v19  ;;  %p5464_p10 = pnand %p5463_p9, %p6461_p8  ;;  %p5471_p1 = por %p5470_p5, %p5469_p0 }
0x11de   : > { %v5149_v20 = vld [vmem:[#allocation14 + $0xb8] sm:$0xff]  }
0x11df   : > { %p5465_p11 = pneg %p5464_p10 }
0x11e1   : > { %p5472_p3 = pnand %p5471_p1, %p5465_p11 }
0x1205   : > { %v2775_v22 = vpop.permute.xlu1 %2774 }
0x1206   : > { %2777 = vst.msk [vmem:[#allocation2] sm:$0xff] %vm960_vm4, %v2775_v22  ;;  %v5150_v22 = vld [vmem:[#allocation14 + $0xf0] sm:$0xff]  }
0x120d   : > { %v2890_v47 = vpop.permute.xlu1 %2889 }
0x120e   : > { %2892 = vst.msk [vmem:[#allocation2] sm:$0xff] %vm1076_vm5, %v2890_v47  ;;  %v5151_v47 = vld [vmem:[#allocation14 + $0xb0] sm:$0xff]  }
0x1230   : > { %v3231_v21 = vpop.permute.xlu1 %3230 }
0x1231   : > { %3233 = vst.msk [vmem:[#allocation2 + $0x8] sm:$0xff] %vm960_vm4, %v3231_v21  ;;  %v5152_v21 = vld [vmem:[#allocation14 + $0xe8] sm:$0xff]  }
0x1234   : > { %v3005_v23 = vpop.permute.xlu1 %3004 }
0x1235   : > { %3007 = vst.msk [vmem:[#allocation2] sm:$0xff] %vm1192_vm6, %v3005_v23  ;;  %v5153_v23 = vld [vmem:[#allocation14 + $0xa8] sm:$0xff]  }
0x123c   : > { %v3464_v25 = vld [vmem:[#allocation2] sm:$0xff] }
0x1240   : > { %v3346_v1 = vpop.permute.xlu0 %3345 }
0x1241   : > { %3348 = vst.msk [vmem:[#allocation2 + $0x8] sm:$0xff] %vm1076_vm5, %v3346_v1  ;;  %v5154_v1 = vld [vmem:[#allocation14 + $0xe0] sm:$0xff]  }
0x124a   : > { %v3461_v24 = vpop.permute.xlu0 %3460 }
0x124b   : > { %3463 = vst.msk [vmem:[#allocation2 + $0x8] sm:$0xff] %vm1192_vm6, %v3461_v24  ;;  %v5155_v24 = vld [vmem:[#allocation14 + $0xa0] sm:$0xff]  }
0x1252   : > { %v3465_v26 = vld [vmem:[#allocation2 + $0x8] sm:$0xff] }
0x1253   : > { %v3466_v27 = vpack.c.bf16 %v3465_v26, %v3464_v25  ;;  %v5156_v25 = vld [vmem:[#allocation14 + $0xd8] sm:$0xff]  }
0x1254   : > { %v5157_v26 = vld [vmem:[#allocation14 + $0x98] sm:$0xff]  }
0x1255   : > { %4875 = vmatmul.mubr.bf16.vlgmr.msra.gmra.mxu0 %v3466_v27  ;;  %v5158_v27 = vld [vmem:[#allocation14 + $0xd0] sm:$0xff]  }
0x1256   : > { %4585 = vmatpush3.bf16.msra.mxu0 %v5149_v20 }
0x1257   : > { %4586 = vmatprep.subr.bf16.mxu0 %v5150_v22 }
0x125a   : > { %4587 = vmatpush3.bf16.msra.mxu0 %v5151_v47 }
0x125b   : > { %4588 = vmatprep.subr.bf16.mxu0 %v5152_v21 }
0x125e   : > { %4589 = vmatpush3.bf16.msra.mxu0 %v5153_v23 }
0x125f   : > { %4590 = vmatprep.subr.bf16.mxu0 %v5154_v1 }
0x1262   : > { %4591 = vmatpush3.bf16.msra.mxu0 %v5155_v24 }
0x1263   : > { %4592 = vmatprep.subr.bf16.mxu0 %v5156_v25 }
0x1266   : > { %4593 = vmatpush3.bf16.msra.mxu0 %v5157_v26 }
0x1267   : > { %4594 = vmatprep.subr.bf16.mxu0 %v5158_v27 }
0x1315   : > { %v3574_v29 = vpop.f32.mrf.mxu0 }
0x1316   : > { %v3575_v54 = vadd.f32 %v4403_v28, %v3574_v29  ;;  %v5160_v29 = vld [vmem:[#allocation14 + $0xc8] sm:$0xff]  }
0x1317   : > { %v4876_v33 = vpop.f32.mrf.mxu0 }
0x1318   : > { %v3581_v34 = vadd.f32 %v3575_v54, %v6121_v41  ;;  %v5161_v54 = vld [vmem:[#allocation14 + $0x88] sm:$0xff]   ;;  %v5162_v33 = vld [vmem:[#allocation14 + $0xc0] sm:$0xff]  }
0x1319   : > { %v3577_v35 = vpop.f32.mrf.mxu0 }
0x131a   : > { %v3578_v37 = vadd.f32 %v4403_v28, %v3577_v35  ;;  %3587 = vadd.xlane.f32.xlu1 %v3581_v34  ;;  %v5159_v28 = vld [vmem:[#allocation14 + $0x90] sm:$0xff]   ;;  %v4416_v35 = vld [vmem:[%s6425_s7 + $0x2] sm:$0x3] }
0x131b   : > { %v4877_v40 = vpop.f32.mrf.mxu0  ;;  %4595 = vmatpush3.bf16.msra.mxu0 %v5159_v28 }
0x131c   : > { %v3582_v43 = vadd.f32 %v3578_v37, %v6123_v39  ;;  %v5132_v39 = vld [vmem:[#allocation12 + $0xd4] ss:$8 sps:$4 sm:$0xff]   ;;  %4596 = vmatprep.subr.bf16.mxu0 %v5160_v29  ;;  %v3649_v37 = vrot.slane %v4416_v35, %v5852_v32  ;;  %v3653_v40 = vrot.slane %v4416_v35, %v5849_v31 }
0x131d   : > { %3740 = vmatprep.subr.bf16.mxu1 %v5132_v39 }
0x131e   : > { %3589 = vadd.xlane.f32.xlu0 %v3582_v43  ;;  %3741 = vmatpush1.bf16.msra.mxu1 %v5130_v59 }
0x131f   : > { %3742 = vmatprep.subr.bf16.mxu1 %v5135_v56  ;;  %4597 = vmatpush3.bf16.msra.mxu0 %v5161_v54 }
0x1320   : > { %4598 = vmatprep.subr.bf16.mxu0 %v5162_v33 }
0x1322   : > { %3743 = vmatpush1.bf16.msra.mxu1 %v5133_v60 }
0x1323   : > { %3744 = vmatprep.subr.bf16.mxu1 %v5138_v61 }
0x1326   : > { %3745 = vmatpush1.bf16.msra.mxu1 %v5136_v62 }
0x1327   : > { %3746 = vmatprep.subr.bf16.mxu1 %v5141_v30 }
0x132a   : > { %3747 = vmatpush1.bf16.msra.mxu1 %v5139_v49 }
0x132b   : > { %3748 = vmatprep.subr.bf16.mxu1 %v5144_v0 }
0x132e   : > { %3749 = vmatpush1.bf16.msra.mxu1 %v5142_v11 }
0x132f   : > { %3750 = vmatprep.subr.bf16.mxu1 %v5147_v63 }
0x1332   : > { %3751 = vmatpush1.bf16.msra.mxu1 %v5145_v3 }
0x13a3   : > { %v3588_v36 = vpop.xlane.xlu1 %3587 }
0x13a4   : > { %v3591_v45 = vmul.f32 0.0078125, %v3588_v36 }
0x13a6   : > { %v3593_v46 = vsub.f32 %v3581_v34, %v3591_v45  ;;  %v5163_v34 = vld [vmem:[#allocation14 + $0x80] sm:$0xff]  }
0x13a7   : > { %v3590_v50 = vpop.xlane.xlu0 %3589  ;;  %4599 = vmatpush3.bf16.msra.mxu0 %v5163_v34 }
0x13a8   : > { %v3592_v51 = vmul.f32 0.0078125, %v3590_v50  ;;  %v3595_v52 = vmul.f32 %v3593_v46, %v3593_v46 }
0x13aa   : > { %v3594_v53 = vsub.f32 %v3582_v43, %v3592_v51  ;;  %3597 = vadd.xlane.f32.xlu0 %v3595_v52 }
0x13ac   : > { %v3596_v41 = vmul.f32 %v3594_v53, %v3594_v53 }
0x13ae   : > { %3599 = vadd.xlane.f32.xlu1 %v3596_v41 }
0x1433   : > { %v3598_v10 = vpop.xlane.xlu0 %3597 }
0x1434   : > { %v3601_v4 = vmul.f32 0.0078125, %v3598_v10 }
0x1436   : > { %v3603_v5 = vadd.f32 1e-05, %v3601_v4 }
0x1437   : > { %v3600_v6 = vpop.xlane.xlu1 %3599 }
0x1438   : > { %5252 = vrsqrt.f32 %v3603_v5  ;;  %v3602_v7 = vmul.f32 0.0078125, %v3600_v6 }
0x143a   : > { %v3604_v58 = vadd.f32 1e-05, %v3602_v7 }
0x143c   : > { %5254 = vrsqrt.f32 %v3604_v58 }
0x1445   : > { %v5253_v2 = vpop.eup %5252 }
0x1446   : > { %v3607_v9 = vmul.f32 %v5253_v2, %v3593_v46 }
0x1448   : > { %v3615_v16 = vmul.f32 %v4414_v12, %v3607_v9 }
0x1449   : > { %v5255_v13 = vpop.eup %5254 }
0x144a   : > { %v3608_v8 = vmul.f32 %v5255_v13, %v3594_v53  ;;  %v6310_v18 = vadd.f32 %v4415_v17, %v3615_v16 }
0x144c   : > { %v3616_v14 = vmul.f32 %v4414_v12, %v3608_v8 }
0x144e   : > { %v6312_v38 = vadd.f32 %v4415_v17, %v3616_v14 }
0x1450   : > { %v3625_v42 = vpack.c.bf16 %v6312_v38, %v6310_v18 }
0x1452   : > { %3769 = vmatmul.mubr.bf16.vlgmr.msra.gmra.mxu1 %v3625_v42 }
0x1512   : > { %v3770_v43 = vpop.f32.mrf.mxu1 }
0x1513   : > { %v6321_v48 = vadd.f32 %v3770_v43, %v3649_v37 }
0x1514   : > { %v3772_v44 = vpop.f32.mrf.mxu1 }
0x1515   : > { %v6324_v36 = vmul.f32 0.70710677, %v6321_v48  ;;  %v6326_v45 = vadd.f32 %v3772_v44, %v3653_v40 }
0x1516   : > { %v3774_v46 = vpop.f32.mrf.mxu1 }
0x1517   : > { %v3795_v50 = vand.u32 2147483647, %v6324_v36  ;;  %v6330_v51 = vmul.f32 0.70710677, %v6326_v45  ;;  %v6332_v52 = vadd.f32 %v3774_v46, %v3649_v37  ;;  %vm3787_vm11 = vcmp.ge.f32.partialorder %v6324_v36, 0.0 }
0x1518   : > { %v3776_v32 = vpop.f32.mrf.mxu1 }
0x1519   : > { %v3799_v53 = vmul.f32 0.3275911, %v3795_v50  ;;  %v3796_v31 = vand.u32 2147483647, %v6330_v51  ;;  %v6336_v41 = vmul.f32 0.70710677, %v6332_v52  ;;  %v6338_v55 = vadd.f32 %v3776_v32, %v3653_v40 }
0x151a   : > { %v3847_v11 = vsub.f32 0.0, %v3795_v50  ;;  %vm3788_vm12 = vcmp.ge.f32.partialorder %v6330_v51, 0.0 }
0x151b   : > { %v3803_v57 = vadd.f32 1.0, %v3799_v53  ;;  %v3800_v39 = vmul.f32 0.3275911, %v3796_v31  ;;  %v3797_v59 = vand.u32 2147483647, %v6336_v41  ;;  %v3848_v63 = vsub.f32 0.0, %v3796_v31 }
0x151c   : > { %v6342_v60 = vmul.f32 0.70710677, %v6338_v55  ;;  %v3851_v3 = vmul.f32 %v3847_v11, %v3795_v50  ;;  %vm3789_vm13 = vcmp.ge.f32.partialorder %v6336_v41, 0.0 }
0x151d   : > { %5256 = vrcp.f32 %v3803_v57  ;;  %v3804_v56 = vadd.f32 1.0, %v3800_v39  ;;  %v3801_v61 = vmul.f32 0.3275911, %v3797_v59  ;;  %v3849_v10 = vsub.f32 0.0, %v3797_v59 }
0x151e   : > { %v3798_v62 = vand.u32 2147483647, %v6342_v60  ;;  %v3852_v5 = vmul.f32 %v3848_v63, %v3796_v31  ;;  %v3855_v58 = vmul.f32 1.442695, %v3851_v3  ;;  %vm3790_vm14 = vcmp.ge.f32.partialorder %v6342_v60, 0.0 }
0x151f   : > { %5258 = vrcp.f32 %v3804_v56  ;;  %v3805_v30 = vadd.f32 1.0, %v3801_v61  ;;  %v3853_v2 = vmul.f32 %v3849_v10, %v3797_v59  ;;  %v3794_v41 = vsel %vm3790_vm14, 1.0, %v5563_v15 }
0x1520   : > { %v3802_v49 = vmul.f32 0.3275911, %v3798_v62  ;;  %v3850_v7 = vsub.f32 0.0, %v3798_v62  ;;  %v3857_v8 = vmul.f32 1.442695, %v3852_v5 }
0x1521   : > { %5260 = vrcp.f32 %v3805_v30  ;;  %v3859_v20 = vmul.f32 1.442695, %v3853_v2  ;;  %v3792_v2 = vsel %vm3788_vm12, 1.0, %v5563_v15 }
0x1522   : > { %v3806_v0 = vadd.f32 1.0, %v3802_v49  ;;  %v3854_v14 = vmul.f32 %v3850_v7, %v3798_v62 }
0x1524   : > { %5262 = vrcp.f32 %v3806_v0  ;;  %v3861_v25 = vmul.f32 1.442695, %v3854_v14 }
0x1525   : > { %5264 = vpow2.f32 %v3855_v58  ;;  %v3791_v58 = vsel %vm3787_vm11, 1.0, %v5563_v15 }
0x1526   : > { %5266 = vpow2.f32 %v3857_v8 }
0x1527   : > { %5268 = vpow2.f32 %v3859_v20  ;;  %v3781_v20 = vmul.f32 0.5, %v6332_v52  ;;  %v4434_v52 = vld [vmem:[%s6427_s9 + $0x1] ss:$0 sm:$0xff] }
0x1528   : > { %5270 = vpow2.f32 %v3861_v25 }
0x152a   : > { %v5257_v4 = vpop.eup %5256 }
0x152b   : > { %v3811_v6 = vmul.f32 1.0614054, %v5257_v4 }
0x152c   : > { %v5259_v9 = vpop.eup %5258 }
0x152d   : > { %v3815_v12 = vadd.f32 -1.4531521, %v3811_v6  ;;  %v3812_v13 = vmul.f32 1.0614054, %v5259_v9 }
0x152e   : > { %v5261_v16 = vpop.eup %5260 }
0x152f   : > { %v3819_v17 = vmul.f32 %v5257_v4, %v3815_v12  ;;  %v3816_v42 = vadd.f32 -1.4531521, %v3812_v13  ;;  %v3813_v19 = vmul.f32 1.0614054, %v5261_v16  ;;  %v3793_v13 = vsel %vm3789_vm13, 1.0, %v5563_v15 }
0x1531   : > { %v3823_v22 = vadd.f32 1.4214138, %v3819_v17  ;;  %v5263_v47 = vpop.eup %5262  ;;  %v3820_v21 = vmul.f32 %v5259_v9, %v3816_v42  ;;  %v3817_v23 = vadd.f32 -1.4531521, %v3813_v19 }
0x1532   : > { %v3814_v24 = vmul.f32 1.0614054, %v5263_v47  ;;  %v5265_v39 = vpop.eup %5264 }
0x1533   : > { %v3827_v1 = vmul.f32 %v5257_v4, %v3823_v22  ;;  %v3824_v26 = vadd.f32 1.4214138, %v3820_v21  ;;  %v3821_v27 = vmul.f32 %v5261_v16, %v3817_v23  ;;  %v5267_v30 = vpop.eup %5266  ;;  %v3780_v22 = vmul.f32 0.5, %v6326_v45 }
0x1534   : > { %v3818_v29 = vadd.f32 -1.4531521, %v3814_v24  ;;  %v5269_v63 = vpop.eup %5268  ;;  %v3779_v23 = vmul.f32 0.5, %v6321_v48 }
0x1535   : > { %v3831_v28 = vadd.f32 -0.28449672, %v3827_v1  ;;  %v3828_v54 = vmul.f32 %v5259_v9, %v3824_v26  ;;  %v3825_v33 = vadd.f32 1.4214138, %v3821_v27  ;;  %v5271_v7 = vpop.eup %5270 }
0x1536   : > { %v3822_v35 = vmul.f32 %v5263_v47, %v3818_v29 }
0x1537   : > { %v3835_v34 = vmul.f32 %v5257_v4, %v3831_v28  ;;  %v3832_v37 = vadd.f32 -0.28449672, %v3828_v54  ;;  %v3829_v40 = vmul.f32 %v5261_v16, %v3825_v33 }
0x1538   : > { %v3826_v44 = vadd.f32 1.4214138, %v3822_v35 }
0x1539   : > { %v3839_v43 = vadd.f32 0.2548296, %v3835_v34  ;;  %v3836_v46 = vmul.f32 %v5259_v9, %v3832_v37  ;;  %v3833_v50 = vadd.f32 -0.28449672, %v3829_v40 }
0x153a   : > { %v3830_v53 = vmul.f32 %v5263_v47, %v3826_v44 }
0x153b   : > { %v3843_v32 = vmul.f32 %v5257_v4, %v3839_v43  ;;  %v3840_v31 = vadd.f32 0.2548296, %v3836_v46  ;;  %v3837_v57 = vmul.f32 %v5261_v16, %v3833_v50 }
0x153c   : > { %v3834_v59 = vadd.f32 -0.28449672, %v3830_v53 }
0x153d   : > { %v3863_v56 = vmul.f32 %v5265_v39, %v3843_v32  ;;  %v3844_v61 = vmul.f32 %v5259_v9, %v3840_v31  ;;  %v3841_v62 = vadd.f32 0.2548296, %v3837_v57 }
0x153e   : > { %v3838_v49 = vmul.f32 %v5263_v47, %v3834_v59 }
0x153f   : > { %v3864_v0 = vmul.f32 %v5267_v30, %v3844_v61  ;;  %v3845_v11 = vmul.f32 %v5261_v16, %v3841_v62  ;;  %v3867_v10 = vsub.f32 1.0, %v3863_v56  ;;  %v4453_v61 = vld [vmem:[%s6423_s5 + $0x6] ss:$0 sm:$0xff]  ;;  %v4454_v30 = vld [vmem:[%s6423_s5 + $0x7] ss:$0 sm:$0xff] }
0x1540   : > { %v3842_v3 = vadd.f32 0.2548296, %v3838_v49 }
0x1541   : > { %v3868_v4 = vsub.f32 1.0, %v3864_v0  ;;  %v3865_v5 = vmul.f32 %v5269_v63, %v3845_v11  ;;  %v3871_v51 = vmul.f32 %v3867_v10, %v3791_v58 }
0x1542   : > { %v3846_v6 = vmul.f32 %v5263_v47, %v3842_v3  ;;  %v3782_v47 = vmul.f32 0.5, %v6338_v55 }
0x1543   : > { %v3869_v9 = vsub.f32 1.0, %v3865_v5  ;;  %v3872_v12 = vmul.f32 %v3868_v4, %v3792_v2  ;;  %v3875_v19 = vadd.f32 1.0, %v3871_v51 }
0x1544   : > { %v3866_v36 = vmul.f32 %v5271_v7, %v3846_v6 }
0x1545   : > { %v3873_v8 = vmul.f32 %v3869_v9, %v3793_v13  ;;  %v3876_v14 = vadd.f32 1.0, %v3872_v12  ;;  %v3879_v25 = vmul.f32 %v3875_v19, %v3779_v23 }
0x1546   : > { %v3870_v16 = vsub.f32 1.0, %v3866_v36 }
0x1547   : > { %v3877_v17 = vadd.f32 1.0, %v3873_v8  ;;  %v3880_v1 = vmul.f32 %v3876_v14, %v3780_v22 }
0x1548   : > { %v3874_v42 = vmul.f32 %v3870_v16, %v3794_v41 }
0x1549   : > { %v3881_v60 = vmul.f32 %v3877_v17, %v3781_v20 }
0x154a   : > { %v3878_v21 = vadd.f32 1.0, %v3874_v42 }
0x154b   : > { %v3883_v27 = vpack.c.bf16 %v3881_v60, %v3879_v25 }
0x154c   : > { %v3882_v24 = vmul.f32 %v3878_v21, %v3782_v47 }
0x154e   : > { %v3884_v26 = vpack.c.bf16 %v3882_v24, %v3880_v1 }
0x1550   : > { %4054 = vmatprep.mubr.bf16.mxu0 %v3884_v26 }
0x1551   : > { %4055 = vmatmul.mubr.bf16.vlgmr.msra.gmra.mxu0 %v3883_v27 }
0x1611   : > { %v4600_v15 = vpop.f32.mrf.mxu0 }
0x1613   : > { %v4601_v28 = vpop.f32.mrf.mxu0 }
0x1614   : > { %v4602_v45 = vadd.f32 %v4601_v28, %v4600_v15 }
0x1615   : > { %v4603_v29 = vpop.f32.mrf.mxu0 }
0x1616   : > { %v4057_v55 = vadd.f32 %v4602_v45, %v4434_v52 }
0x1617   : > { %v4604_v54 = vpop.f32.mrf.mxu0 }
0x1618   : > { %v4605_v33 = vadd.f32 %v4604_v54, %v4603_v29  ;;  %v4063_v48 = vadd.f32 %v4057_v55, %v6310_v18 }
0x161a   : > { %v4060_v34 = vadd.f32 %v4605_v33, %v4434_v52  ;;  %4069 = vadd.xlane.f32.xlu0 %v4063_v48 }
0x161c   : > { %v4064_v35 = vadd.f32 %v4060_v34, %v6312_v38 }
0x161e   : > { %4071 = vadd.xlane.f32.xlu1 %v4064_v35 }
0x16a3   : > { %v4070_v37 = vpop.xlane.xlu0 %4069 }
0x16a4   : > { %v4073_v40 = vmul.f32 0.0078125, %v4070_v37 }
0x16a6   : > { %v4075_v43 = vsub.f32 %v4063_v48, %v4073_v40 }
0x16a7   : > { %v4072_v44 = vpop.xlane.xlu1 %4071 }
0x16a8   : > { %v4074_v46 = vmul.f32 0.0078125, %v4072_v44  ;;  %v4077_v50 = vmul.f32 %v4075_v43, %v4075_v43 }
0x16aa   : > { %v4076_v32 = vsub.f32 %v4064_v35, %v4074_v46  ;;  %4079 = vadd.xlane.f32.xlu0 %v4077_v50 }
0x16ac   : > { %v4078_v53 = vmul.f32 %v4076_v32, %v4076_v32 }
0x16ae   : > { %4081 = vadd.xlane.f32.xlu1 %v4078_v53 }
0x1733   : > { %v4080_v31 = vpop.xlane.xlu0 %4079 }
0x1734   : > { %v4083_v57 = vmul.f32 0.0078125, %v4080_v31 }
0x1736   : > { %v4085_v18 = vadd.f32 1e-05, %v4083_v57 }
0x1737   : > { %v4082_v39 = vpop.xlane.xlu1 %4081 }
0x1738   : > { %5272 = vrsqrt.f32 %v4085_v18  ;;  %v4084_v59 = vmul.f32 0.0078125, %v4082_v39 }
0x173a   : > { %v4086_v38 = vadd.f32 1e-05, %v4084_v59 }
0x173c   : > { %5274 = vrsqrt.f32 %v4086_v38 }
0x1745   : > { %v5273_v56 = vpop.eup %5272 }
0x1746   : > { %v4089_v62 = vmul.f32 %v5273_v56, %v4075_v43 }
0x1748   : > { %v4097_v49 = vmul.f32 %v4453_v61, %v4089_v62 }
0x1749   : > { %v5275_v0 = vpop.eup %5274 }
0x174a   : > { %v4105_v11 = vadd.f32 %v4454_v30, %v4097_v49  ;;  %v4090_v63 = vmul.f32 %v5275_v0, %v4076_v32 }
0x174c   : > { %v4098_v3 = vmul.f32 %v4453_v61, %v4090_v63  ;;  %4107 = vst [vmem:[%s464_s1 - $0x7] sm:$0x80] %v4105_v11 }
0x174e   : > { %v4106_v10 = vadd.f32 %v4454_v30, %v4098_v3 }
0x1750   : > { %4108 = vst [vmem:[%s464_s1 - $0x6] sm:$0x80] %v4106_v10 }
0x1751   : > { %5475 = shalt.err (!%p5472_p3)
}
0x1752   : > { %s5476_s28 = scalar_lea.hbm %s6373_s11, 32  ;;  %s5480_s23 = scalar_lea.hbm %s6428_s10, 64 }
0x1753   : > { %p5477_p4 = scmp.ne.s32.totalorder %s6373_s11, %s5476_s28  ;;  %p5481_p13 = scmp.lt.s32.totalorder %s6373_s11, %s6428_s10 }
0x1754   : > { %p5482_p7 = scmp.lt.s32.totalorder %s5480_s23, %s5476_s28 }
0x1755   : > { %p5478_p6 = pnand %p5477_p4, %p6461_p8 }
0x1756   : > { %p5483_p2 = por %p5482_p7, %p5481_p13 }
0x1757   : > { %p5479_p12 = pneg %p5478_p6 }
0x1759   : > { %p5484_p9 = pnand %p5483_p2, %p5479_p12 }
0x175b   : > { %5487 = shalt.err (!%p5484_p9)
}
0x175c   : > { %s5565_s20 = smov 16   ;;  %s5566_s30 = smov 1  }
0x175d   : > { %4904 = dma.vmem_to_hbm [thread:$0]  (%p6461_p8), %s6375_s2, 32, %s6373_s11, %s4110_s22, %s5565_s20, %s5565_s20, %s5566_s30  }
0x175e PF: > { %s4138_s21 = sand.u32 1, %s5526_s13   ;;  %p6462_p10 = scmp.ne.s32.totalorder %s6449_s24, 0 }
0x175f   : > { %p6463_p11 = scmp.ge.s32.totalorder %s5538_s16, 2  ;;  %s4139_s19 = scalar_lea.sflag [#allocation5], %s4138_s21 }
0x1761   : > { %p4930_p0 = pnand %p6463_p11, %p6462_p10 }
0x1763   : > { %p4931_p5 = pneg %p4930_p0 }
0x1765   : > { %5521 = dma.done.wait (%p4931_p5), %s4139_s19, 32  }
0x1766   : > { %5523 = vsyncadd (%p4931_p5), %s4139_s19, 4294967264  ;;  %p26_p1 = scmp.ge.s32.totalorder %s5730_s26, 4   ;;  %s6464_s13 = smov %s5530_s14 }
0x1767   : > { %s6465_s14 = smov %s5534_s15  ;;  %s6466_s15 = smov %s5741_s18 }
0x1768   : > { %s6467_s16 = smov %s5730_s26  ;;  %28 = sbr.rel (!%p26_p1) target bundleno = 13 (0xd), region = 145 }
0x176d   :  { %4144 = vsyncpa [#allocation4], 1 }
0x176e   :  { %4146 = vsyncpa [#allocation4 + $0x1], 1 }
0x176f   :  { %4147 = vsyncpa [#allocation7], 1 }
0x1770   :  { %4148 = vsyncpa [#allocation10], 1 }
0x1771   :  { %4149 = vsyncpa [#allocation13], 1 }
0x1772   :  { %4150 = vsyncpa [#allocation5], 1 }
0x1773   :  { %4152 = vsyncpa [#allocation5 + $0x1], 1 }

</bundles_post_ra>
